<compile_context>
chip_gen: v6e
topology: v6e:2x2x1
jax: 0.10.0
libtpu: 0.0.40
codegen_flags: <defaults>
</compile_context>

<pallas_src>
import functools

import jax
import jax.numpy as jnp
from jax import lax
from jax.experimental import pallas as pl
from jax.experimental.pallas import tpu as pltpu


VMEM_LIMIT = 32 * 1024 * 1024          # explicit scoped-VMEM request (safe on v5e/v6e/v7x)
VMEM_BUDGET = 28 * 1024 * 1024         # target for sizing the recurrence chunk


def _round_up(x, m):
    return ((x + m - 1) // m) * m


def _pick_batch_block(bp):
    """Split (independent) batch rows across two TensorCores when possible."""
    if bp >= 16 and bp % 16 == 0:
        return bp // 2
    return bp


def _pick_time_chunk(t, bb, dp, hp, budget_bytes=VMEM_BUDGET):
    """Largest time chunk whose VMEM working set fits the budget (cap 64)."""
    # weights/bias (double-buffered) + h0/c0/hn/cn blocks
    fixed = 4 * (2 * dp * 4 * hp + 2 * hp * 4 * hp + 2 * 4 * hp + 8 * bb * hp)
    # per-timestep: double-buffered input chunk + double-buffered all_h out
    # + fused-gates scratch
    per_t = 4 * bb * (2 * dp + 2 * hp + 4 * hp)
    avail = max(budget_bytes - fixed, per_t)
    tc = int(min(t, 64, max(1, avail // per_t)))
    # prefer a chunk that divides T exactly (no padded/masked timesteps)
    for cand in range(tc, max(tc // 2, 1) - 1, -1):
        if t % cand == 0:
            return cand
    return tc


# ----------------------------------------------------------------------------
# Generic (M, K) @ (K, N) + bias kernel, tiled over M and N (both "parallel").
# Used for the FC head (the per-layer input projection is fused into the
# recurrence kernel below).
# ----------------------------------------------------------------------------
def _matmul_bias_kernel(x_ref, w_ref, b_ref, o_ref):
    o_ref[...] = (jnp.dot(x_ref[...], w_ref[...],
                          preferred_element_type=jnp.float32) + b_ref[...])


def matmul_bias(x, w_t, b, *, max_tm=512, max_tn=512):
    M, K = x.shape
    N = w_t.shape[1]
    assert M % 8 == 0 and N % 128 == 0
    # Exact-divisor tiles: no wasted MXU work from rounding M up to the tile.
    tm = min(M, max_tm)
    while M % tm:
        tm -= 8
    tn = min(N, max_tn)
    while N % tn:
        tn -= 128
    return pl.pallas_call(
        _matmul_bias_kernel,
        out_shape=jax.ShapeDtypeStruct((M, N), jnp.float32),
        grid_spec=pltpu.PrefetchScalarGridSpec(
            num_scalar_prefetch=0,
            grid=(M // tm, N // tn),
            in_specs=[
                pl.BlockSpec((tm, K), lambda i, j: (i, 0)),
                pl.BlockSpec((K, tn), lambda i, j: (0, j)),
                pl.BlockSpec((1, tn), lambda i, j: (0, j)),
            ],
            out_specs=pl.BlockSpec((tm, tn), lambda i, j: (i, j))),
        compiler_params=pltpu.CompilerParams(
            dimension_semantics=("parallel", "parallel"),
            vmem_limit_bytes=VMEM_LIMIT),
        cost_estimate=pl.CostEstimate(
            flops=2 * M * K * N,
            transcendentals=0,
            bytes_accessed=4 * (M * K + K * N + M * N + N)),
    )(x, w_t, b)


# ----------------------------------------------------------------------------
# Fused LSTM layer kernel.
#   grid = (batch blocks ["parallel"], time chunks ["arbitrary"])
# Per grid step:
#   1) one MXU matmul computes gates_x = x_chunk @ W_ih^T + b into VMEM scratch
#      (never touches HBM),
#   2) a partially-unrolled fori_loop walks the chunk's timesteps, computing
#      only h @ W_hh^T per step.
# Gate layout (lane-aligned, Hp = 128-padded H): [ i | f | o | g ].
# h_n / c_n are output-resident accumulators carrying state across chunks.
# ----------------------------------------------------------------------------
def _lstm_layer_kernel(x_ref, wih_ref, b_ref, whh_ref, h0_ref, c0_ref,
                       allh_ref, hn_ref, cn_ref, gx_ref,
                       *, t_valid, needs_mask, unroll):
    ci = pl.program_id(1)                     # time-chunk index
    tc, bb, dp = x_ref.shape
    hp = hn_ref.shape[-1]

    @pl.when(ci == 0)
    def _():
        hn_ref[...] = h0_ref[...]
        cn_ref[...] = c0_ref[...]

    # Fused input projection for the whole chunk: one big MXU matmul, result
    # stays resident in VMEM (no gates_x HBM round-trip).
    x2d = x_ref[...].reshape(tc * bb, dp)
    gx_ref[...] = (jnp.dot(x2d, wih_ref[...],
                           preferred_element_type=jnp.float32) + b_ref[...])

    def step(t, carry):
        h, c = carry
        row = pl.multiple_of(t * bb, 8)
        gates = gx_ref[pl.ds(row, bb), :] + jnp.dot(
            h, whh_ref[...], preferred_element_type=jnp.float32)
        # sigmoid via single-EUP tanh form: sigmoid(x) = 0.5*tanh(x/2) + 0.5
        sig = 0.5 * jnp.tanh(0.5 * gates[:, :3 * hp]) + 0.5   # [i | f | o]
        i_g = sig[:, 0 * hp:1 * hp]
        f_g = sig[:, 1 * hp:2 * hp]
        o_g = sig[:, 2 * hp:3 * hp]
        g_g = jnp.tanh(gates[:, 3 * hp:4 * hp])
        c_new = f_g * c + i_g * g_g
        h_new = o_g * jnp.tanh(c_new)
        if needs_mask:
            # T was padded up to a chunk multiple: freeze state on padded steps.
            m = (ci * tc + t < t_valid).astype(jnp.float32)
            h_new = m * h_new + (1.0 - m) * h
            c_new = m * c_new + (1.0 - m) * c
        allh_ref[t] = h_new                     # single store per step
        return h_new, c_new

    h_fin, c_fin = lax.fori_loop(0, tc, step,
                                 (hn_ref[...], cn_ref[...]),
                                 unroll=unroll)
    hn_ref[...] = h_fin                         # once per chunk
    cn_ref[...] = c_fin


def lstm_layer(x_tm, w_ih_t, b, w_hh_t, h0, c0, *, t_valid, tc, bb):
    """x_tm: (Tp, Bp, Dp) time-major; returns (all_h (Tp,Bp,Hp), h_n, c_n)."""
    Tp, Bp, Dp = x_tm.shape
    Hp = h0.shape[1]
    G4 = 4 * Hp
    n_b = Bp // bb
    n_c = Tp // tc

    kernel = functools.partial(
        _lstm_layer_kernel,
        t_valid=t_valid,
        needs_mask=(Tp != t_valid),
        unroll=min(8, tc))

    return pl.pallas_call(
        kernel,
        out_shape=(jax.ShapeDtypeStruct((Tp, Bp, Hp), jnp.float32),
                   jax.ShapeDtypeStruct((Bp, Hp), jnp.float32),
                   jax.ShapeDtypeStruct((Bp, Hp), jnp.float32)),
        grid_spec=pltpu.PrefetchScalarGridSpec(
            num_scalar_prefetch=0,
            grid=(n_b, n_c),
            in_specs=[
                pl.BlockSpec((tc, bb, Dp), lambda bi, ci: (ci, bi, 0)),  # x chunk
                pl.BlockSpec((Dp, G4), lambda bi, ci: (0, 0)),           # W_ih^T
                pl.BlockSpec((1, G4), lambda bi, ci: (0, 0)),            # bias
                pl.BlockSpec((Hp, G4), lambda bi, ci: (0, 0)),           # W_hh^T
                pl.BlockSpec((bb, Hp), lambda bi, ci: (bi, 0)),          # h0
                pl.BlockSpec((bb, Hp), lambda bi, ci: (bi, 0)),          # c0
            ],
            out_specs=(
                pl.BlockSpec((tc, bb, Hp), lambda bi, ci: (ci, bi, 0)),  # all_h
                pl.BlockSpec((bb, Hp), lambda bi, ci: (bi, 0)),          # h_n (resident)
                pl.BlockSpec((bb, Hp), lambda bi, ci: (bi, 0)),          # c_n (resident)
            ),
            scratch_shapes=[pltpu.VMEM((tc * bb, G4), jnp.float32)]),    # fused gates_x
        compiler_params=pltpu.CompilerParams(
            dimension_semantics=("parallel", "arbitrary"),
            vmem_limit_bytes=VMEM_LIMIT),
        cost_estimate=pl.CostEstimate(
            flops=2 * Tp * Bp * (Dp + Hp) * G4,
            transcendentals=5 * Tp * Bp * Hp,
            bytes_accessed=4 * (Tp * Bp * Dp + Tp * Bp * Hp
                                + Dp * G4 + Hp * G4 + G4 + 4 * Bp * Hp)),
    )(x_tm, w_ih_t, b, w_hh_t, h0, c0)


# ----------------------------------------------------------------------------
# Parameter init (PyTorch-style U(-1/sqrt(H), 1/sqrt(H)), raw layout) and
# packing into the padded, lane-aligned kernel layout.
# ----------------------------------------------------------------------------
def init_params(key, vocab_size, hidden_size, num_layers):
    bound = 1.0 / float(hidden_size) ** 0.5
    raw = {"lstm": []}
    for layer in range(num_layers):
        d_in = vocab_size if layer == 0 else hidden_size
        key, k1, k2, k3, k4 = jax.random.split(key, 5)
        raw["lstm"].append({
            "w_ih": jax.random.uniform(k1, (4 * hidden_size, d_in),
                                       minval=-bound, maxval=bound,
                                       dtype=jnp.float32),
            "w_hh": jax.random.uniform(k2, (4 * hidden_size, hidden_size),
                                       minval=-bound, maxval=bound,
                                       dtype=jnp.float32),
            "b_ih": jax.random.uniform(k3, (4 * hidden_size,),
                                       minval=-bound, maxval=bound,
                                       dtype=jnp.float32),
            "b_hh": jax.random.uniform(k4, (4 * hidden_size,),
                                       minval=-bound, maxval=bound,
                                       dtype=jnp.float32),
        })
    key, k5, k6 = jax.random.split(key, 3)
    raw["fc"] = {
        "w": jax.random.uniform(k5, (vocab_size, hidden_size),
                                minval=-bound, maxval=bound, dtype=jnp.float32),
        "b": jax.random.uniform(k6, (vocab_size,),
                                minval=-bound, maxval=bound, dtype=jnp.float32),
    }
    return raw


def pack_params(raw, vocab_size, hidden_size):
    """Reorder gates [i,f,g,o] -> [i,f,o,g], transpose, zero-pad to 128 lanes."""
    H = hidden_size
    Hp = _round_up(H, 128)
    Vp = _round_up(vocab_size, 128)

    def pack_gate_matrix(w, d_in, d_in_p):
        i, f, g, o = jnp.split(w, 4, axis=0)             # each (H, d_in)
        out = jnp.zeros((d_in_p, 4 * Hp), jnp.float32)
        for idx, blk in enumerate((i, f, o, g)):
            out = out.at[:d_in, idx * Hp:idx * Hp + H].set(blk.T)
        return out

    def pack_gate_bias(b_ih, b_hh):
        bi, bf, bg, bo = jnp.split(b_ih + b_hh, 4)
        out = jnp.zeros((1, 4 * Hp), jnp.float32)
        for idx, blk in enumerate((bi, bf, bo, bg)):
            out = out.at[0, idx * Hp:idx * Hp + H].set(blk)
        return out

    packed = {"lstm": []}
    for layer, p in enumerate(raw["lstm"]):
        d_in = p["w_ih"].shape[1]
        d_in_p = _round_up(d_in, 128) if layer == 0 else Hp
        packed["lstm"].append({
            "w_ih_t": pack_gate_matrix(p["w_ih"], d_in, d_in_p),   # (Dp, 4Hp)
            "w_hh_t": pack_gate_matrix(p["w_hh"], H, Hp),          # (Hp, 4Hp)
            "b": pack_gate_bias(p["b_ih"], p["b_hh"]),             # (1, 4Hp)
        })
    w_fc_t = jnp.zeros((Hp, Vp), jnp.float32).at[:H, :vocab_size].set(
        raw["fc"]["w"].T)
    b_fc = jnp.zeros((1, Vp), jnp.float32).at[0, :vocab_size].set(raw["fc"]["b"])
    packed["fc"] = {"w_t": w_fc_t, "b": b_fc}
    return packed


# ----------------------------------------------------------------------------
# CharLSTM forward wrapper (matches the PyTorch module's forward signature)
# ----------------------------------------------------------------------------
@jax.jit
def char_lstm_forward(x, h0, c0, packed):
    """x: (B, T, vocab) float32; h0, c0: (num_layers, B, H)."""
    B, T, V = x.shape
    L, _, H = h0.shape
    Hp, Vp = packed["fc"]["w_t"].shape
    Bp = _round_up(B, 8)
    d0p = packed["lstm"][0]["w_ih_t"].shape[0]

    bb = _pick_batch_block(Bp)
    tc = _pick_time_chunk(T, bb, max(d0p, Hp), Hp)
    Tp = _round_up(T, tc)

    # TODO(synk): fold this batch_first -> time-major transpose of the (small)
    #             model input into the first layer's BlockSpec index_map.
    x_tm = jnp.transpose(x, (1, 0, 2))                       # (T, B, V)
    x_tm = jnp.pad(x_tm, ((0, Tp - T), (0, Bp - B), (0, d0p - V)))

    h0p = jnp.pad(h0, ((0, 0), (0, Bp - B), (0, Hp - H)))
    c0p = jnp.pad(c0, ((0, 0), (0, Bp - B), (0, Hp - H)))

    layer_in = x_tm
    h_ns, c_ns = [], []
    for layer in range(L):
        p = packed["lstm"][layer]
        all_h, h_n, c_n = lstm_layer(layer_in, p["w_ih_t"], p["b"], p["w_hh_t"],
                                     h0p[layer], c0p[layer],
                                     t_valid=T, tc=tc, bb=bb)
        h_ns.append(h_n[:B, :H])
        c_ns.append(c_n[:B, :H])
        layer_in = all_h
        # (inter-layer dropout skipped: eval mode)

    out_flat = matmul_bias(layer_in.reshape(Tp * Bp, Hp),
                           packed["fc"]["w_t"], packed["fc"]["b"])
    # TODO(synk): fold this slice + batch_first transpose into the FC kernel's
    #             output BlockSpec.
    out = out_flat.reshape(Tp, Bp, Vp)[:T, :B, :V].transpose(1, 0, 2)
    return out, (jnp.stack(h_ns, 0), jnp.stack(c_ns, 0))


# ----------------------------------------------------------------------------
# Pure-JAX reference (PyTorch gate order / raw weights) for correctness check.
# ----------------------------------------------------------------------------
def reference_forward(x, h0, c0, raw):
    B, T, _ = x.shape
    L, _, H = h0.shape
    x_tm = jnp.transpose(x, (1, 0, 2))
    layer_in = x_tm
    h_ns, c_ns = [], []
    for layer in range(L):
        p = raw["lstm"][layer]
        w_ih_t = p["w_ih"].T
        w_hh_t = p["w_hh"].T
        b = (p["b_ih"] + p["b_hh"])[None, :]
        h, c = h0[layer], c0[layer]
        outs = []
        for t in range(T):
            gates = layer_in[t] @ w_ih_t + h @ w_hh_t + b
            i_g = jax.nn.sigmoid(gates[:, 0 * H:1 * H])
            f_g = jax.nn.sigmoid(gates[:, 1 * H:2 * H])
            g_g = jnp.tanh(gates[:, 2 * H:3 * H])
            o_g = jax.nn.sigmoid(gates[:, 3 * H:4 * H])
            c = f_g * c + i_g * g_g
            h = o_g * jnp.tanh(c)
            outs.append(h)
        layer_in = jnp.stack(outs, 0)
        h_ns.append(h)
        c_ns.append(c)
    out = layer_in @ raw["fc"]["w"].T + raw["fc"]["b"][None, :]
    return out.transpose(1, 0, 2), (jnp.stack(h_ns, 0), jnp.stack(c_ns, 0))


if __name__ == "__main__":
    batch, seq_len = 2, 8
    vocab_size, hidden_size, num_layers = 16, 100, 2

    key = jax.random.PRNGKey(0)
    key, kx = jax.random.split(key)
    raw_params = init_params(key, vocab_size, hidden_size, num_layers)
    packed_params = pack_params(raw_params, vocab_size, hidden_size)

    x = jax.random.uniform(kx, (batch, seq_len, vocab_size), dtype=jnp.float32)
    h0 = jnp.zeros((num_layers, batch, hidden_size), jnp.float32)
    c0 = jnp.zeros((num_layers, batch, hidden_size), jnp.float32)

    out, (h_n, c_n) = char_lstm_forward(x, h0, c0, packed_params)
    jax.block_until_ready((out, h_n, c_n))

    ref_out, (ref_h, ref_c) = reference_forward(x, h0, c0, raw_params)
    assert out.shape == (batch, seq_len, vocab_size)
    assert h_n.shape == (num_layers, batch, hidden_size)
    assert c_n.shape == (num_layers, batch, hidden_size)
    assert jnp.allclose(out, ref_out, atol=5e-5, rtol=5e-5)
    assert jnp.allclose(h_n, ref_h, atol=5e-5, rtol=5e-5)
    assert jnp.allclose(c_n, ref_c, atol=5e-5, rtol=5e-5)

    print("KERNEL_OK")
</pallas_src>

<mosaic_0001>
module attributes {stable_mosaic.version = 11 : i64} {
  func.func @_lstm_layer_kernel(%arg0: i32, %arg1: i32, %arg2: memref<8x8x128xf32, #tpu.memory_space<vmem>>, %arg3: memref<128x512xf32, #tpu.memory_space<vmem>>, %arg4: memref<1x512xf32, #tpu.memory_space<vmem>>, %arg5: memref<128x512xf32, #tpu.memory_space<vmem>>, %arg6: memref<8x128xf32, #tpu.memory_space<vmem>>, %arg7: memref<8x128xf32, #tpu.memory_space<vmem>>, %arg8: memref<8x8x128xf32, #tpu.memory_space<vmem>>, %arg9: memref<8x128xf32, #tpu.memory_space<vmem>>, %arg10: memref<8x128xf32, #tpu.memory_space<vmem>>, %arg11: memref<64x512xf32, #tpu.memory_space<vmem>>) attributes {dimension_semantics = [#tpu.dimension_semantics<parallel>, #tpu.dimension_semantics<arbitrary>], iteration_bounds = array<i64: 1, 1>, scalar_prefetch = 0 : i64, scratch_operands = 1 : i64, tpu.core_type = #tpu.core_type<tc>, window_params = [{transform_indices = @transform_0, window_bounds = array<i64: 8, 8, 128>}, {pipeline_mode = #tpu.pipeline_mode<synchronous>, transform_indices = @transform_1, window_bounds = array<i64: 128, 512>}, {pipeline_mode = #tpu.pipeline_mode<synchronous>, transform_indices = @transform_2, window_bounds = array<i64: 1, 512>}, {pipeline_mode = #tpu.pipeline_mode<synchronous>, transform_indices = @transform_3, window_bounds = array<i64: 128, 512>}, {transform_indices = @transform_4, window_bounds = array<i64: 8, 128>}, {transform_indices = @transform_5, window_bounds = array<i64: 8, 128>}, {transform_indices = @transform_6, window_bounds = array<i64: 8, 8, 128>}, {transform_indices = @transform_7, window_bounds = array<i64: 8, 128>}, {transform_indices = @transform_8, window_bounds = array<i64: 8, 128>}]} {
    %c0_i32 = arith.constant 0 : i32
    %0 = arith.cmpi eq, %arg1, %c0_i32 : i32
    %1 = arith.extui %0 : i1 to i32
    %c0_i32_0 = arith.constant 0 : i32
    %2 = arith.cmpi ne, %1, %c0_i32_0 : i32
    scf.if %2 {
      %c0_98 = arith.constant 0 : index
      %c0_99 = arith.constant 0 : index
      %247 = vector.load %arg6[%c0_98, %c0_99] : memref<8x128xf32, #tpu.memory_space<vmem>>, vector<8x128xf32>
      %c0_100 = arith.constant 0 : index
      %c0_101 = arith.constant 0 : index
      %248 = vector.load %arg9[%c0_100, %c0_101] : memref<8x128xf32, #tpu.memory_space<vmem>>, vector<8x128xf32>
      tpu.vector_store %arg9[%c0_100, %c0_101], %247 {strides = array<i32>} : memref<8x128xf32, #tpu.memory_space<vmem>>, vector<8x128xf32>,
      %c0_102 = arith.constant 0 : index
      %c0_103 = arith.constant 0 : index
      %249 = vector.load %arg7[%c0_102, %c0_103] : memref<8x128xf32, #tpu.memory_space<vmem>>, vector<8x128xf32>
      %c0_104 = arith.constant 0 : index
      %c0_105 = arith.constant 0 : index
      %250 = vector.load %arg10[%c0_104, %c0_105] : memref<8x128xf32, #tpu.memory_space<vmem>>, vector<8x128xf32>
      tpu.vector_store %arg10[%c0_104, %c0_105], %249 {strides = array<i32>} : memref<8x128xf32, #tpu.memory_space<vmem>>, vector<8x128xf32>,
    } else {
    }
    %c0 = arith.constant 0 : index
    %c0_1 = arith.constant 0 : index
    %c0_2 = arith.constant 0 : index
    %3 = vector.load %arg2[%c0, %c0_1, %c0_2] : memref<8x8x128xf32, #tpu.memory_space<vmem>>, vector<8x8x128xf32>
    %4 = vector.shape_cast %3 : vector<8x8x128xf32> to vector<64x128xf32>
    %c0_3 = arith.constant 0 : index
    %c0_4 = arith.constant 0 : index
    %5 = vector.load %arg3[%c0_3, %c0_4] : memref<128x512xf32, #tpu.memory_space<vmem>>, vector<128x512xf32>
    %cst = arith.constant dense<0.000000e+00> : vector<64x512xf32>
    %6 = tpu.matmul %4, %5, %cst {dimension_numbers = #tpu.dot_dimension_numbers<[1], [0], [0], [1], [0, 0, 1, 1], [], []>} : vector<64x128xf32>, vector<128x512xf32>, vector<64x512xf32> -> vector<64x512xf32>
    %c0_5 = arith.constant 0 : index
    %c0_6 = arith.constant 0 : index
    %7 = vector.load %arg4[%c0_5, %c0_6] : memref<1x512xf32, #tpu.memory_space<vmem>>, vector<1x512xf32>
    %8 = vector.broadcast %7 : vector<1x512xf32> to vector<64x512xf32>
    %9 = arith.addf %6, %8 : vector<64x512xf32>
    %c0_7 = arith.constant 0 : index
    %c0_8 = arith.constant 0 : index
    %10 = vector.load %arg11[%c0_7, %c0_8] : memref<64x512xf32, #tpu.memory_space<vmem>>, vector<64x512xf32>
    tpu.vector_store %arg11[%c0_7, %c0_8], %9 {strides = array<i32>} : memref<64x512xf32, #tpu.memory_space<vmem>>, vector<64x512xf32>,
    %c0_9 = arith.constant 0 : index
    %c0_10 = arith.constant 0 : index
    %11 = vector.load %arg9[%c0_9, %c0_10] : memref<8x128xf32, #tpu.memory_space<vmem>>, vector<8x128xf32>
    %c0_11 = arith.constant 0 : index
    %c0_12 = arith.constant 0 : index
    %12 = vector.load %arg10[%c0_11, %c0_12] : memref<8x128xf32, #tpu.memory_space<vmem>>, vector<8x128xf32>
    %c0_i32_13 = arith.constant 0 : i32
    %c8_i32 = arith.constant 8 : i32
    %13 = arith.muli %c0_i32_13, %c8_i32 : i32
    %14 = tpu.assume_multiple %13, 8 : i32
    %15 = arith.index_cast %14 : i32 to index
    %c0_14 = arith.constant 0 : index
    %16 = vector.load %arg11[%15, %c0_14] : memref<64x512xf32, #tpu.memory_space<vmem>>, vector<8x512xf32>
    %c0_15 = arith.constant 0 : index
    %c0_16 = arith.constant 0 : index
    %17 = vector.load %arg5[%c0_15, %c0_16] : memref<128x512xf32, #tpu.memory_space<vmem>>, vector<128x512xf32>
    %cst_17 = arith.constant dense<0.000000e+00> : vector<8x512xf32>
    %18 = tpu.matmul %11, %17, %cst_17 {dimension_numbers = #tpu.dot_dimension_numbers<[1], [0], [0], [1], [0, 0, 1, 1], [], []>} : vector<8x128xf32>, vector<128x512xf32>, vector<8x512xf32> -> vector<8x512xf32>
    %19 = arith.addf %16, %18 : vector<8x512xf32>
    %20 = vector.extract_strided_slice %19 {offsets = [0, 0], sizes = [8, 384], strides = [1, 1]} : vector<8x512xf32> to vector<8x384xf32>
    %cst_18 = arith.constant 5.000000e-01 : f32
    %21 = vector.broadcast %cst_18 : f32 to vector<8x384xf32>
    %22 = arith.mulf %21, %20 : vector<8x384xf32>
    %23 = math.tanh %22 : vector<8x384xf32>
    %cst_19 = arith.constant 5.000000e-01 : f32
    %24 = vector.broadcast %cst_19 : f32 to vector<8x384xf32>
    %25 = arith.mulf %24, %23 : vector<8x384xf32>
    %cst_20 = arith.constant 5.000000e-01 : f32
    %26 = vector.broadcast %cst_20 : f32 to vector<8x384xf32>
    %27 = arith.addf %25, %26 : vector<8x384xf32>
    %28 = vector.extract_strided_slice %27 {offsets = [0, 0], sizes = [8, 128], strides = [1, 1]} : vector<8x384xf32> to vector<8x128xf32>
    %29 = vector.extract_strided_slice %27 {offsets = [0, 128], sizes = [8, 128], strides = [1, 1]} : vector<8x384xf32> to vector<8x128xf32>
    %30 = vector.extract_strided_slice %27 {offsets = [0, 256], sizes = [8, 128], strides = [1, 1]} : vector<8x384xf32> to vector<8x128xf32>
    %31 = vector.extract_strided_slice %19 {offsets = [0, 384], sizes = [8, 128], strides = [1, 1]} : vector<8x512xf32> to vector<8x128xf32>
    %32 = math.tanh %31 : vector<8x128xf32>
    %33 = arith.mulf %29, %12 : vector<8x128xf32>
    %34 = arith.mulf %28, %32 : vector<8x128xf32>
    %35 = arith.addf %33, %34 : vector<8x128xf32>
    %36 = math.tanh %35 : vector<8x128xf32>
    %37 = arith.mulf %30, %36 : vector<8x128xf32>
    %38 = arith.index_cast %c0_i32_13 : i32 to index
    %c0_21 = arith.constant 0 : index
    %c0_22 = arith.constant 0 : index
    %39 = vector.load %arg8[%38, %c0_21, %c0_22] : memref<8x8x128xf32, #tpu.memory_space<vmem>>, vector<1x8x128xf32>
    %40 = vector.shape_cast %39 : vector<1x8x128xf32> to vector<8x128xf32>
    %41 = vector.shape_cast %37 : vector<8x128xf32> to vector<1x8x128xf32>
    tpu.vector_store %arg8[%38, %c0_21, %c0_22], %41 {strides = array<i32>} : memref<8x8x128xf32, #tpu.memory_space<vmem>>, vector<1x8x128xf32>,
    %c1_i32 = arith.constant 1 : i32
    %c8_i32_23 = arith.constant 8 : i32
    %42 = arith.muli %c1_i32, %c8_i32_23 : i32
    %43 = tpu.assume_multiple %42, 8 : i32
    %44 = arith.index_cast %43 : i32 to index
    %c0_24 = arith.constant 0 : index
    %45 = vector.load %arg11[%44, %c0_24] : memref<64x512xf32, #tpu.memory_space<vmem>>, vector<8x512xf32>
    %c0_25 = arith.constant 0 : index
    %c0_26 = arith.constant 0 : index
    %46 = vector.load %arg5[%c0_25, %c0_26] : memref<128x512xf32, #tpu.memory_space<vmem>>, vector<128x512xf32>
    %cst_27 = arith.constant dense<0.000000e+00> : vector<8x512xf32>
    %47 = tpu.matmul %37, %46, %cst_27 {dimension_numbers = #tpu.dot_dimension_numbers<[1], [0], [0], [1], [0, 0, 1, 1], [], []>} : vector<8x128xf32>, vector<128x512xf32>, vector<8x512xf32> -> vector<8x512xf32>
    %48 = arith.addf %45, %47 : vector<8x512xf32>
    %49 = vector.extract_strided_slice %48 {offsets = [0, 0], sizes = [8, 384], strides = [1, 1]} : vector<8x512xf32> to vector<8x384xf32>
    %cst_28 = arith.constant 5.000000e-01 : f32
    %50 = vector.broadcast %cst_28 : f32 to vector<8x384xf32>
    %51 = arith.mulf %50, %49 : vector<8x384xf32>
    %52 = math.tanh %51 : vector<8x384xf32>
    %cst_29 = arith.constant 5.000000e-01 : f32
    %53 = vector.broadcast %cst_29 : f32 to vector<8x384xf32>
    %54 = arith.mulf %53, %52 : vector<8x384xf32>
    %cst_30 = arith.constant 5.000000e-01 : f32
    %55 = vector.broadcast %cst_30 : f32 to vector<8x384xf32>
    %56 = arith.addf %54, %55 : vector<8x384xf32>
    %57 = vector.extract_strided_slice %56 {offsets = [0, 0], sizes = [8, 128], strides = [1, 1]} : vector<8x384xf32> to vector<8x128xf32>
    %58 = vector.extract_strided_slice %56 {offsets = [0, 128], sizes = [8, 128], strides = [1, 1]} : vector<8x384xf32> to vector<8x128xf32>
    %59 = vector.extract_strided_slice %56 {offsets = [0, 256], sizes = [8, 128], strides = [1, 1]} : vector<8x384xf32> to vector<8x128xf32>
    %60 = vector.extract_strided_slice %48 {offsets = [0, 384], sizes = [8, 128], strides = [1, 1]} : vector<8x512xf32> to vector<8x128xf32>
    %61 = math.tanh %60 : vector<8x128xf32>
    %62 = arith.mulf %58, %35 : vector<8x128xf32>
    %63 = arith.mulf %57, %61 : vector<8x128xf32>
    %64 = arith.addf %62, %63 : vector<8x128xf32>
    %65 = math.tanh %64 : vector<8x128xf32>
    %66 = arith.mulf %59, %65 : vector<8x128xf32>
    %67 = arith.index_cast %c1_i32 : i32 to index
    %c0_31 = arith.constant 0 : index
    %c0_32 = arith.constant 0 : index
    %68 = vector.load %arg8[%67, %c0_31, %c0_32] : memref<8x8x128xf32, #tpu.memory_space<vmem>>, vector<1x8x128xf32>
    %69 = vector.shape_cast %68 : vector<1x8x128xf32> to vector<8x128xf32>
    %70 = vector.shape_cast %66 : vector<8x128xf32> to vector<1x8x128xf32>
    tpu.vector_store %arg8[%67, %c0_31, %c0_32], %70 {strides = array<i32>} : memref<8x8x128xf32, #tpu.memory_space<vmem>>, vector<1x8x128xf32>,
    %c2_i32 = arith.constant 2 : i32
    %c8_i32_33 = arith.constant 8 : i32
    %71 = arith.muli %c2_i32, %c8_i32_33 : i32
    %72 = tpu.assume_multiple %71, 8 : i32
    %73 = arith.index_cast %72 : i32 to index
    %c0_34 = arith.constant 0 : index
    %74 = vector.load %arg11[%73, %c0_34] : memref<64x512xf32, #tpu.memory_space<vmem>>, vector<8x512xf32>
    %c0_35 = arith.constant 0 : index
    %c0_36 = arith.constant 0 : index
    %75 = vector.load %arg5[%c0_35, %c0_36] : memref<128x512xf32, #tpu.memory_space<vmem>>, vector<128x512xf32>
    %cst_37 = arith.constant dense<0.000000e+00> : vector<8x512xf32>
    %76 = tpu.matmul %66, %75, %cst_37 {dimension_numbers = #tpu.dot_dimension_numbers<[1], [0], [0], [1], [0, 0, 1, 1], [], []>} : vector<8x128xf32>, vector<128x512xf32>, vector<8x512xf32> -> vector<8x512xf32>
    %77 = arith.addf %74, %76 : vector<8x512xf32>
    %78 = vector.extract_strided_slice %77 {offsets = [0, 0], sizes = [8, 384], strides = [1, 1]} : vector<8x512xf32> to vector<8x384xf32>
    %cst_38 = arith.constant 5.000000e-01 : f32
    %79 = vector.broadcast %cst_38 : f32 to vector<8x384xf32>
    %80 = arith.mulf %79, %78 : vector<8x384xf32>
    %81 = math.tanh %80 : vector<8x384xf32>
    %cst_39 = arith.constant 5.000000e-01 : f32
    %82 = vector.broadcast %cst_39 : f32 to vector<8x384xf32>
    %83 = arith.mulf %82, %81 : vector<8x384xf32>
    %cst_40 = arith.constant 5.000000e-01 : f32
    %84 = vector.broadcast %cst_40 : f32 to vector<8x384xf32>
    %85 = arith.addf %83, %84 : vector<8x384xf32>
    %86 = vector.extract_strided_slice %85 {offsets = [0, 0], sizes = [8, 128], strides = [1, 1]} : vector<8x384xf32> to vector<8x128xf32>
    %87 = vector.extract_strided_slice %85 {offsets = [0, 128], sizes = [8, 128], strides = [1, 1]} : vector<8x384xf32> to vector<8x128xf32>
    %88 = vector.extract_strided_slice %85 {offsets = [0, 256], sizes = [8, 128], strides = [1, 1]} : vector<8x384xf32> to vector<8x128xf32>
    %89 = vector.extract_strided_slice %77 {offsets = [0, 384], sizes = [8, 128], strides = [1, 1]} : vector<8x512xf32> to vector<8x128xf32>
    %90 = math.tanh %89 : vector<8x128xf32>
    %91 = arith.mulf %87, %64 : vector<8x128xf32>
    %92 = arith.mulf %86, %90 : vector<8x128xf32>
    %93 = arith.addf %91, %92 : vector<8x128xf32>
    %94 = math.tanh %93 : vector<8x128xf32>
    %95 = arith.mulf %88, %94 : vector<8x128xf32>
    %96 = arith.index_cast %c2_i32 : i32 to index
    %c0_41 = arith.constant 0 : index
    %c0_42 = arith.constant 0 : index
    %97 = vector.load %arg8[%96, %c0_41, %c0_42] : memref<8x8x128xf32, #tpu.memory_space<vmem>>, vector<1x8x128xf32>
    %98 = vector.shape_cast %97 : vector<1x8x128xf32> to vector<8x128xf32>
    %99 = vector.shape_cast %95 : vector<8x128xf32> to vector<1x8x128xf32>
    tpu.vector_store %arg8[%96, %c0_41, %c0_42], %99 {strides = array<i32>} : memref<8x8x128xf32, #tpu.memory_space<vmem>>, vector<1x8x128xf32>,
    %c3_i32 = arith.constant 3 : i32
    %c8_i32_43 = arith.constant 8 : i32
    %100 = arith.muli %c3_i32, %c8_i32_43 : i32
    %101 = tpu.assume_multiple %100, 8 : i32
    %102 = arith.index_cast %101 : i32 to index
    %c0_44 = arith.constant 0 : index
    %103 = vector.load %arg11[%102, %c0_44] : memref<64x512xf32, #tpu.memory_space<vmem>>, vector<8x512xf32>
    %c0_45 = arith.constant 0 : index
    %c0_46 = arith.constant 0 : index
    %104 = vector.load %arg5[%c0_45, %c0_46] : memref<128x512xf32, #tpu.memory_space<vmem>>, vector<128x512xf32>
    %cst_47 = arith.constant dense<0.000000e+00> : vector<8x512xf32>
    %105 = tpu.matmul %95, %104, %cst_47 {dimension_numbers = #tpu.dot_dimension_numbers<[1], [0], [0], [1], [0, 0, 1, 1], [], []>} : vector<8x128xf32>, vector<128x512xf32>, vector<8x512xf32> -> vector<8x512xf32>
    %106 = arith.addf %103, %105 : vector<8x512xf32>
    %107 = vector.extract_strided_slice %106 {offsets = [0, 0], sizes = [8, 384], strides = [1, 1]} : vector<8x512xf32> to vector<8x384xf32>
    %cst_48 = arith.constant 5.000000e-01 : f32
    %108 = vector.broadcast %cst_48 : f32 to vector<8x384xf32>
    %109 = arith.mulf %108, %107 : vector<8x384xf32>
    %110 = math.tanh %109 : vector<8x384xf32>
    %cst_49 = arith.constant 5.000000e-01 : f32
    %111 = vector.broadcast %cst_49 : f32 to vector<8x384xf32>
    %112 = arith.mulf %111, %110 : vector<8x384xf32>
    %cst_50 = arith.constant 5.000000e-01 : f32
    %113 = vector.broadcast %cst_50 : f32 to vector<8x384xf32>
    %114 = arith.addf %112, %113 : vector<8x384xf32>
    %115 = vector.extract_strided_slice %114 {offsets = [0, 0], sizes = [8, 128], strides = [1, 1]} : vector<8x384xf32> to vector<8x128xf32>
    %116 = vector.extract_strided_slice %114 {offsets = [0, 128], sizes = [8, 128], strides = [1, 1]} : vector<8x384xf32> to vector<8x128xf32>
    %117 = vector.extract_strided_slice %114 {offsets = [0, 256], sizes = [8, 128], strides = [1, 1]} : vector<8x384xf32> to vector<8x128xf32>
    %118 = vector.extract_strided_slice %106 {offsets = [0, 384], sizes = [8, 128], strides = [1, 1]} : vector<8x512xf32> to vector<8x128xf32>
    %119 = math.tanh %118 : vector<8x128xf32>
    %120 = arith.mulf %116, %93 : vector<8x128xf32>
    %121 = arith.mulf %115, %119 : vector<8x128xf32>
    %122 = arith.addf %120, %121 : vector<8x128xf32>
    %123 = math.tanh %122 : vector<8x128xf32>
    %124 = arith.mulf %117, %123 : vector<8x128xf32>
    %125 = arith.index_cast %c3_i32 : i32 to index
    %c0_51 = arith.constant 0 : index
    %c0_52 = arith.constant 0 : index
    %126 = vector.load %arg8[%125, %c0_51, %c0_52] : memref<8x8x128xf32, #tpu.memory_space<vmem>>, vector<1x8x128xf32>
    %127 = vector.shape_cast %126 : vector<1x8x128xf32> to vector<8x128xf32>
    %128 = vector.shape_cast %124 : vector<8x128xf32> to vector<1x8x128xf32>
    tpu.vector_store %arg8[%125, %c0_51, %c0_52], %128 {strides = array<i32>} : memref<8x8x128xf32, #tpu.memory_space<vmem>>, vector<1x8x128xf32>,
    %c4_i32 = arith.constant 4 : i32
    %c8_i32_53 = arith.constant 8 : i32
    %129 = arith.muli %c4_i32, %c8_i32_53 : i32
    %130 = tpu.assume_multiple %129, 8 : i32
    %131 = arith.index_cast %130 : i32 to index
    %c0_54 = arith.constant 0 : index
    %132 = vector.load %arg11[%131, %c0_54] : memref<64x512xf32, #tpu.memory_space<vmem>>, vector<8x512xf32>
    %c0_55 = arith.constant 0 : index
    %c0_56 = arith.constant 0 : index
    %133 = vector.load %arg5[%c0_55, %c0_56] : memref<128x512xf32, #tpu.memory_space<vmem>>, vector<128x512xf32>
    %cst_57 = arith.constant dense<0.000000e+00> : vector<8x512xf32>
    %134 = tpu.matmul %124, %133, %cst_57 {dimension_numbers = #tpu.dot_dimension_numbers<[1], [0], [0], [1], [0, 0, 1, 1], [], []>} : vector<8x128xf32>, vector<128x512xf32>, vector<8x512xf32> -> vector<8x512xf32>
    %135 = arith.addf %132, %134 : vector<8x512xf32>
    %136 = vector.extract_strided_slice %135 {offsets = [0, 0], sizes = [8, 384], strides = [1, 1]} : vector<8x512xf32> to vector<8x384xf32>
    %cst_58 = arith.constant 5.000000e-01 : f32
    %137 = vector.broadcast %cst_58 : f32 to vector<8x384xf32>
    %138 = arith.mulf %137, %136 : vector<8x384xf32>
    %139 = math.tanh %138 : vector<8x384xf32>
    %cst_59 = arith.constant 5.000000e-01 : f32
    %140 = vector.broadcast %cst_59 : f32 to vector<8x384xf32>
    %141 = arith.mulf %140, %139 : vector<8x384xf32>
    %cst_60 = arith.constant 5.000000e-01 : f32
    %142 = vector.broadcast %cst_60 : f32 to vector<8x384xf32>
    %143 = arith.addf %141, %142 : vector<8x384xf32>
    %144 = vector.extract_strided_slice %143 {offsets = [0, 0], sizes = [8, 128], strides = [1, 1]} : vector<8x384xf32> to vector<8x128xf32>
    %145 = vector.extract_strided_slice %143 {offsets = [0, 128], sizes = [8, 128], strides = [1, 1]} : vector<8x384xf32> to vector<8x128xf32>
    %146 = vector.extract_strided_slice %143 {offsets = [0, 256], sizes = [8, 128], strides = [1, 1]} : vector<8x384xf32> to vector<8x128xf32>
    %147 = vector.extract_strided_slice %135 {offsets = [0, 384], sizes = [8, 128], strides = [1, 1]} : vector<8x512xf32> to vector<8x128xf32>
    %148 = math.tanh %147 : vector<8x128xf32>
    %149 = arith.mulf %145, %122 : vector<8x128xf32>
    %150 = arith.mulf %144, %148 : vector<8x128xf32>
    %151 = arith.addf %149, %150 : vector<8x128xf32>
    %152 = math.tanh %151 : vector<8x128xf32>
    %153 = arith.mulf %146, %152 : vector<8x128xf32>
    %154 = arith.index_cast %c4_i32 : i32 to index
    %c0_61 = arith.constant 0 : index
    %c0_62 = arith.constant 0 : index
    %155 = vector.load %arg8[%154, %c0_61, %c0_62] : memref<8x8x128xf32, #tpu.memory_space<vmem>>, vector<1x8x128xf32>
    %156 = vector.shape_cast %155 : vector<1x8x128xf32> to vector<8x128xf32>
    %157 = vector.shape_cast %153 : vector<8x128xf32> to vector<1x8x128xf32>
    tpu.vector_store %arg8[%154, %c0_61, %c0_62], %157 {strides = array<i32>} : memref<8x8x128xf32, #tpu.memory_space<vmem>>, vector<1x8x128xf32>,
    %c5_i32 = arith.constant 5 : i32
    %c8_i32_63 = arith.constant 8 : i32
    %158 = arith.muli %c5_i32, %c8_i32_63 : i32
    %159 = tpu.assume_multiple %158, 8 : i32
    %160 = arith.index_cast %159 : i32 to index
    %c0_64 = arith.constant 0 : index
    %161 = vector.load %arg11[%160, %c0_64] : memref<64x512xf32, #tpu.memory_space<vmem>>, vector<8x512xf32>
    %c0_65 = arith.constant 0 : index
    %c0_66 = arith.constant 0 : index
    %162 = vector.load %arg5[%c0_65, %c0_66] : memref<128x512xf32, #tpu.memory_space<vmem>>, vector<128x512xf32>
    %cst_67 = arith.constant dense<0.000000e+00> : vector<8x512xf32>
    %163 = tpu.matmul %153, %162, %cst_67 {dimension_numbers = #tpu.dot_dimension_numbers<[1], [0], [0], [1], [0, 0, 1, 1], [], []>} : vector<8x128xf32>, vector<128x512xf32>, vector<8x512xf32> -> vector<8x512xf32>
    %164 = arith.addf %161, %163 : vector<8x512xf32>
    %165 = vector.extract_strided_slice %164 {offsets = [0, 0], sizes = [8, 384], strides = [1, 1]} : vector<8x512xf32> to vector<8x384xf32>
    %cst_68 = arith.constant 5.000000e-01 : f32
    %166 = vector.broadcast %cst_68 : f32 to vector<8x384xf32>
    %167 = arith.mulf %166, %165 : vector<8x384xf32>
    %168 = math.tanh %167 : vector<8x384xf32>
    %cst_69 = arith.constant 5.000000e-01 : f32
    %169 = vector.broadcast %cst_69 : f32 to vector<8x384xf32>
    %170 = arith.mulf %169, %168 : vector<8x384xf32>
    %cst_70 = arith.constant 5.000000e-01 : f32
    %171 = vector.broadcast %cst_70 : f32 to vector<8x384xf32>
    %172 = arith.addf %170, %171 : vector<8x384xf32>
    %173 = vector.extract_strided_slice %172 {offsets = [0, 0], sizes = [8, 128], strides = [1, 1]} : vector<8x384xf32> to vector<8x128xf32>
    %174 = vector.extract_strided_slice %172 {offsets = [0, 128], sizes = [8, 128], strides = [1, 1]} : vector<8x384xf32> to vector<8x128xf32>
    %175 = vector.extract_strided_slice %172 {offsets = [0, 256], sizes = [8, 128], strides = [1, 1]} : vector<8x384xf32> to vector<8x128xf32>
    %176 = vector.extract_strided_slice %164 {offsets = [0, 384], sizes = [8, 128], strides = [1, 1]} : vector<8x512xf32> to vector<8x128xf32>
    %177 = math.tanh %176 : vector<8x128xf32>
    %178 = arith.mulf %174, %151 : vector<8x128xf32>
    %179 = arith.mulf %173, %177 : vector<8x128xf32>
    %180 = arith.addf %178, %179 : vector<8x128xf32>
    %181 = math.tanh %180 : vector<8x128xf32>
    %182 = arith.mulf %175, %181 : vector<8x128xf32>
    %183 = arith.index_cast %c5_i32 : i32 to index
    %c0_71 = arith.constant 0 : index
    %c0_72 = arith.constant 0 : index
    %184 = vector.load %arg8[%183, %c0_71, %c0_72] : memref<8x8x128xf32, #tpu.memory_space<vmem>>, vector<1x8x128xf32>
    %185 = vector.shape_cast %184 : vector<1x8x128xf32> to vector<8x128xf32>
    %186 = vector.shape_cast %182 : vector<8x128xf32> to vector<1x8x128xf32>
    tpu.vector_store %arg8[%183, %c0_71, %c0_72], %186 {strides = array<i32>} : memref<8x8x128xf32, #tpu.memory_space<vmem>>, vector<1x8x128xf32>,
    %c6_i32 = arith.constant 6 : i32
    %c8_i32_73 = arith.constant 8 : i32
    %187 = arith.muli %c6_i32, %c8_i32_73 : i32
    %188 = tpu.assume_multiple %187, 8 : i32
    %189 = arith.index_cast %188 : i32 to index
    %c0_74 = arith.constant 0 : index
    %190 = vector.load %arg11[%189, %c0_74] : memref<64x512xf32, #tpu.memory_space<vmem>>, vector<8x512xf32>
    %c0_75 = arith.constant 0 : index
    %c0_76 = arith.constant 0 : index
    %191 = vector.load %arg5[%c0_75, %c0_76] : memref<128x512xf32, #tpu.memory_space<vmem>>, vector<128x512xf32>
    %cst_77 = arith.constant dense<0.000000e+00> : vector<8x512xf32>
    %192 = tpu.matmul %182, %191, %cst_77 {dimension_numbers = #tpu.dot_dimension_numbers<[1], [0], [0], [1], [0, 0, 1, 1], [], []>} : vector<8x128xf32>, vector<128x512xf32>, vector<8x512xf32> -> vector<8x512xf32>
    %193 = arith.addf %190, %192 : vector<8x512xf32>
    %194 = vector.extract_strided_slice %193 {offsets = [0, 0], sizes = [8, 384], strides = [1, 1]} : vector<8x512xf32> to vector<8x384xf32>
    %cst_78 = arith.constant 5.000000e-01 : f32
    %195 = vector.broadcast %cst_78 : f32 to vector<8x384xf32>
    %196 = arith.mulf %195, %194 : vector<8x384xf32>
    %197 = math.tanh %196 : vector<8x384xf32>
    %cst_79 = arith.constant 5.000000e-01 : f32
    %198 = vector.broadcast %cst_79 : f32 to vector<8x384xf32>
    %199 = arith.mulf %198, %197 : vector<8x384xf32>
    %cst_80 = arith.constant 5.000000e-01 : f32
    %200 = vector.broadcast %cst_80 : f32 to vector<8x384xf32>
    %201 = arith.addf %199, %200 : vector<8x384xf32>
    %202 = vector.extract_strided_slice %201 {offsets = [0, 0], sizes = [8, 128], strides = [1, 1]} : vector<8x384xf32> to vector<8x128xf32>
    %203 = vector.extract_strided_slice %201 {offsets = [0, 128], sizes = [8, 128], strides = [1, 1]} : vector<8x384xf32> to vector<8x128xf32>
    %204 = vector.extract_strided_slice %201 {offsets = [0, 256], sizes = [8, 128], strides = [1, 1]} : vector<8x384xf32> to vector<8x128xf32>
    %205 = vector.extract_strided_slice %193 {offsets = [0, 384], sizes = [8, 128], strides = [1, 1]} : vector<8x512xf32> to vector<8x128xf32>
    %206 = math.tanh %205 : vector<8x128xf32>
    %207 = arith.mulf %203, %180 : vector<8x128xf32>
    %208 = arith.mulf %202, %206 : vector<8x128xf32>
    %209 = arith.addf %207, %208 : vector<8x128xf32>
    %210 = math.tanh %209 : vector<8x128xf32>
    %211 = arith.mulf %204, %210 : vector<8x128xf32>
    %212 = arith.index_cast %c6_i32 : i32 to index
    %c0_81 = arith.constant 0 : index
    %c0_82 = arith.constant 0 : index
    %213 = vector.load %arg8[%212, %c0_81, %c0_82] : memref<8x8x128xf32, #tpu.memory_space<vmem>>, vector<1x8x128xf32>
    %214 = vector.shape_cast %213 : vector<1x8x128xf32> to vector<8x128xf32>
    %215 = vector.shape_cast %211 : vector<8x128xf32> to vector<1x8x128xf32>
    tpu.vector_store %arg8[%212, %c0_81, %c0_82], %215 {strides = array<i32>} : memref<8x8x128xf32, #tpu.memory_space<vmem>>, vector<1x8x128xf32>,
    %c7_i32 = arith.constant 7 : i32
    %c8_i32_83 = arith.constant 8 : i32
    %216 = arith.muli %c7_i32, %c8_i32_83 : i32
    %217 = tpu.assume_multiple %216, 8 : i32
    %218 = arith.index_cast %217 : i32 to index
    %c0_84 = arith.constant 0 : index
    %219 = vector.load %arg11[%218, %c0_84] : memref<64x512xf32, #tpu.memory_space<vmem>>, vector<8x512xf32>
    %c0_85 = arith.constant 0 : index
    %c0_86 = arith.constant 0 : index
    %220 = vector.load %arg5[%c0_85, %c0_86] : memref<128x512xf32, #tpu.memory_space<vmem>>, vector<128x512xf32>
    %cst_87 = arith.constant dense<0.000000e+00> : vector<8x512xf32>
    %221 = tpu.matmul %211, %220, %cst_87 {dimension_numbers = #tpu.dot_dimension_numbers<[1], [0], [0], [1], [0, 0, 1, 1], [], []>} : vector<8x128xf32>, vector<128x512xf32>, vector<8x512xf32> -> vector<8x512xf32>
    %222 = arith.addf %219, %221 : vector<8x512xf32>
    %223 = vector.extract_strided_slice %222 {offsets = [0, 0], sizes = [8, 384], strides = [1, 1]} : vector<8x512xf32> to vector<8x384xf32>
    %cst_88 = arith.constant 5.000000e-01 : f32
    %224 = vector.broadcast %cst_88 : f32 to vector<8x384xf32>
    %225 = arith.mulf %224, %223 : vector<8x384xf32>
    %226 = math.tanh %225 : vector<8x384xf32>
    %cst_89 = arith.constant 5.000000e-01 : f32
    %227 = vector.broadcast %cst_89 : f32 to vector<8x384xf32>
    %228 = arith.mulf %227, %226 : vector<8x384xf32>
    %cst_90 = arith.constant 5.000000e-01 : f32
    %229 = vector.broadcast %cst_90 : f32 to vector<8x384xf32>
    %230 = arith.addf %228, %229 : vector<8x384xf32>
    %231 = vector.extract_strided_slice %230 {offsets = [0, 0], sizes = [8, 128], strides = [1, 1]} : vector<8x384xf32> to vector<8x128xf32>
    %232 = vector.extract_strided_slice %230 {offsets = [0, 128], sizes = [8, 128], strides = [1, 1]} : vector<8x384xf32> to vector<8x128xf32>
    %233 = vector.extract_strided_slice %230 {offsets = [0, 256], sizes = [8, 128], strides = [1, 1]} : vector<8x384xf32> to vector<8x128xf32>
    %234 = vector.extract_strided_slice %222 {offsets = [0, 384], sizes = [8, 128], strides = [1, 1]} : vector<8x512xf32> to vector<8x128xf32>
    %235 = math.tanh %234 : vector<8x128xf32>
    %236 = arith.mulf %232, %209 : vector<8x128xf32>
    %237 = arith.mulf %231, %235 : vector<8x128xf32>
    %238 = arith.addf %236, %237 : vector<8x128xf32>
    %239 = math.tanh %238 : vector<8x128xf32>
    %240 = arith.mulf %233, %239 : vector<8x128xf32>
    %241 = arith.index_cast %c7_i32 : i32 to index
    %c0_91 = arith.constant 0 : index
    %c0_92 = arith.constant 0 : index
    %242 = vector.load %arg8[%241, %c0_91, %c0_92] : memref<8x8x128xf32, #tpu.memory_space<vmem>>, vector<1x8x128xf32>
    %243 = vector.shape_cast %242 : vector<1x8x128xf32> to vector<8x128xf32>
    %244 = vector.shape_cast %240 : vector<8x128xf32> to vector<1x8x128xf32>
    tpu.vector_store %arg8[%241, %c0_91, %c0_92], %244 {strides = array<i32>} : memref<8x8x128xf32, #tpu.memory_space<vmem>>, vector<1x8x128xf32>,
    %c8_i32_93 = arith.constant 8 : i32
    %c0_94 = arith.constant 0 : index
    %c0_95 = arith.constant 0 : index
    %245 = vector.load %arg9[%c0_94, %c0_95] : memref<8x128xf32, #tpu.memory_space<vmem>>, vector<8x128xf32>
    tpu.vector_store %arg9[%c0_94, %c0_95], %240 {strides = array<i32>} : memref<8x128xf32, #tpu.memory_space<vmem>>, vector<8x128xf32>,
    %c0_96 = arith.constant 0 : index
    %c0_97 = arith.constant 0 : index
    %246 = vector.load %arg10[%c0_96, %c0_97] : memref<8x128xf32, #tpu.memory_space<vmem>>, vector<8x128xf32>
    tpu.vector_store %arg10[%c0_96, %c0_97], %238 {strides = array<i32>} : memref<8x128xf32, #tpu.memory_space<vmem>>, vector<8x128xf32>,
    return
  }
  func.func @transform_0(%arg0: i32, %arg1: i32) -> (i32, i32, i32) {
    %c0_i32 = arith.constant 0 : i32
    %c0_i32_0 = arith.constant 0 : i32
    return %arg1, %arg0, %c0_i32 : i32, i32, i32
  }
  func.func @transform_1(%arg0: i32, %arg1: i32) -> (i32, i32) {
    %c0_i32 = arith.constant 0 : i32
    %c0_i32_0 = arith.constant 0 : i32
    %c0_i32_1 = arith.constant 0 : i32
    return %c0_i32, %c0_i32_0 : i32, i32
  }
  func.func @transform_2(%arg0: i32, %arg1: i32) -> (i32, i32) {
    %c0_i32 = arith.constant 0 : i32
    %c0_i32_0 = arith.constant 0 : i32
    %c0_i32_1 = arith.constant 0 : i32
    return %c0_i32, %c0_i32_0 : i32, i32
  }
  func.func @transform_3(%arg0: i32, %arg1: i32) -> (i32, i32) {
    %c0_i32 = arith.constant 0 : i32
    %c0_i32_0 = arith.constant 0 : i32
    %c0_i32_1 = arith.constant 0 : i32
    return %c0_i32, %c0_i32_0 : i32, i32
  }
  func.func @transform_4(%arg0: i32, %arg1: i32) -> (i32, i32) {
    %c0_i32 = arith.constant 0 : i32
    %c0_i32_0 = arith.constant 0 : i32
    return %arg0, %c0_i32 : i32, i32
  }
  func.func @transform_5(%arg0: i32, %arg1: i32) -> (i32, i32) {
    %c0_i32 = arith.constant 0 : i32
    %c0_i32_0 = arith.constant 0 : i32
    return %arg0, %c0_i32 : i32, i32
  }
  func.func @transform_6(%arg0: i32, %arg1: i32) -> (i32, i32, i32) {
    %c0_i32 = arith.constant 0 : i32
    %c0_i32_0 = arith.constant 0 : i32
    return %arg1, %arg0, %c0_i32 : i32, i32, i32
  }
  func.func @transform_7(%arg0: i32, %arg1: i32) -> (i32, i32) {
    %c0_i32 = arith.constant 0 : i32
    %c0_i32_0 = arith.constant 0 : i32
    return %arg0, %c0_i32 : i32, i32
  }
  func.func @transform_8(%arg0: i32, %arg1: i32) -> (i32, i32) {
    %c0_i32 = arith.constant 0 : i32
    %c0_i32_0 = arith.constant 0 : i32
    return %arg0, %c0_i32 : i32, i32
  }
}

module attributes {stable_mosaic.version = 11 : i64} {
  func.func @_matmul_bias_kernel(%arg0: i32, %arg1: i32, %arg2: memref<64x128xf32, #tpu.memory_space<vmem>>, %arg3: memref<128x128xf32, #tpu.memory_space<vmem>>, %arg4: memref<1x128xf32, #tpu.memory_space<vmem>>, %arg5: memref<64x128xf32, #tpu.memory_space<vmem>>) attributes {dimension_semantics = [#tpu.dimension_semantics<parallel>, #tpu.dimension_semantics<parallel>], iteration_bounds = array<i64: 1, 1>, scalar_prefetch = 0 : i64, scratch_operands = 0 : i64, tpu.core_type = #tpu.core_type<tc>, window_params = [{transform_indices = @transform_0, window_bounds = array<i64: 64, 128>}, {transform_indices = @transform_1, window_bounds = array<i64: 128, 128>}, {transform_indices = @transform_2, window_bounds = array<i64: 1, 128>}, {transform_indices = @transform_3, window_bounds = array<i64: 64, 128>}]} {
    %c0 = arith.constant 0 : index
    %c0_0 = arith.constant 0 : index
    %0 = vector.load %arg2[%c0, %c0_0] : memref<64x128xf32, #tpu.memory_space<vmem>>, vector<64x128xf32>
    %c0_1 = arith.constant 0 : index
    %c0_2 = arith.constant 0 : index
    %1 = vector.load %arg3[%c0_1, %c0_2] : memref<128x128xf32, #tpu.memory_space<vmem>>, vector<128x128xf32>
    %cst = arith.constant dense<0.000000e+00> : vector<64x128xf32>
    %2 = tpu.matmul %0, %1, %cst {dimension_numbers = #tpu.dot_dimension_numbers<[1], [0], [0], [1], [0, 0, 1, 1], [], []>} : vector<64x128xf32>, vector<128x128xf32>, vector<64x128xf32> -> vector<64x128xf32>
    %c0_3 = arith.constant 0 : index
    %c0_4 = arith.constant 0 : index
    %3 = vector.load %arg4[%c0_3, %c0_4] : memref<1x128xf32, #tpu.memory_space<vmem>>, vector<1x128xf32>
    %4 = vector.broadcast %3 : vector<1x128xf32> to vector<64x128xf32>
    %5 = arith.addf %2, %4 : vector<64x128xf32>
    %c0_5 = arith.constant 0 : index
    %c0_6 = arith.constant 0 : index
    %6 = vector.load %arg5[%c0_5, %c0_6] : memref<64x128xf32, #tpu.memory_space<vmem>>, vector<64x128xf32>
    tpu.vector_store %arg5[%c0_5, %c0_6], %5 {strides = array<i32>} : memref<64x128xf32, #tpu.memory_space<vmem>>, vector<64x128xf32>,
    return
  }
  func.func @transform_0(%arg0: i32, %arg1: i32) -> (i32, i32) {
    %c0_i32 = arith.constant 0 : i32
    %c0_i32_0 = arith.constant 0 : i32
    return %arg0, %c0_i32 : i32, i32
  }
  func.func @transform_1(%arg0: i32, %arg1: i32) -> (i32, i32) {
    %c0_i32 = arith.constant 0 : i32
    %c0_i32_0 = arith.constant 0 : i32
    return %c0_i32, %arg1 : i32, i32
  }
  func.func @transform_2(%arg0: i32, %arg1: i32) -> (i32, i32) {
    %c0_i32 = arith.constant 0 : i32
    %c0_i32_0 = arith.constant 0 : i32
    return %c0_i32, %arg1 : i32, i32
  }
  func.func @transform_3(%arg0: i32, %arg1: i32) -> (i32, i32) {
    %c0_i32 = arith.constant 0 : i32
    return %arg0, %arg1 : i32, i32
  }
}

module attributes {stable_mosaic.version = 11 : i64} {
  func.func @_lstm_layer_kernel(%arg0: i32, %arg1: i32, %arg2: memref<8x8x128xf32, #tpu.memory_space<vmem>>, %arg3: memref<128x512xf32, #tpu.memory_space<vmem>>, %arg4: memref<1x512xf32, #tpu.memory_space<vmem>>, %arg5: memref<128x512xf32, #tpu.memory_space<vmem>>, %arg6: memref<8x128xf32, #tpu.memory_space<vmem>>, %arg7: memref<8x128xf32, #tpu.memory_space<vmem>>, %arg8: memref<8x8x128xf32, #tpu.memory_space<vmem>>, %arg9: memref<8x128xf32, #tpu.memory_space<vmem>>, %arg10: memref<8x128xf32, #tpu.memory_space<vmem>>, %arg11: memref<64x512xf32, #tpu.memory_space<vmem>>) attributes {dimension_semantics = [#tpu.dimension_semantics<parallel>, #tpu.dimension_semantics<arbitrary>], iteration_bounds = array<i64: 1, 1>, scalar_prefetch = 0 : i64, scratch_operands = 1 : i64, tpu.core_type = #tpu.core_type<tc>, window_params = [{transform_indices = @transform_0, window_bounds = array<i64: 8, 8, 128>}, {pipeline_mode = #tpu.pipeline_mode<synchronous>, transform_indices = @transform_1, window_bounds = array<i64: 128, 512>}, {pipeline_mode = #tpu.pipeline_mode<synchronous>, transform_indices = @transform_2, window_bounds = array<i64: 1, 512>}, {pipeline_mode = #tpu.pipeline_mode<synchronous>, transform_indices = @transform_3, window_bounds = array<i64: 128, 512>}, {transform_indices = @transform_4, window_bounds = array<i64: 8, 128>}, {transform_indices = @transform_5, window_bounds = array<i64: 8, 128>}, {transform_indices = @transform_6, window_bounds = array<i64: 8, 8, 128>}, {transform_indices = @transform_7, window_bounds = array<i64: 8, 128>}, {transform_indices = @transform_8, window_bounds = array<i64: 8, 128>}]} {
    %c0_i32 = arith.constant 0 : i32
    %0 = arith.cmpi eq, %arg1, %c0_i32 : i32
    %1 = arith.extui %0 : i1 to i32
    %c0_i32_0 = arith.constant 0 : i32
    %2 = arith.cmpi ne, %1, %c0_i32_0 : i32
    scf.if %2 {
      %c0_98 = arith.constant 0 : index
      %c0_99 = arith.constant 0 : index
      %247 = vector.load %arg6[%c0_98, %c0_99] : memref<8x128xf32, #tpu.memory_space<vmem>>, vector<8x128xf32>
      %c0_100 = arith.constant 0 : index
      %c0_101 = arith.constant 0 : index
      %248 = vector.load %arg9[%c0_100, %c0_101] : memref<8x128xf32, #tpu.memory_space<vmem>>, vector<8x128xf32>
      tpu.vector_store %arg9[%c0_100, %c0_101], %247 {strides = array<i32>} : memref<8x128xf32, #tpu.memory_space<vmem>>, vector<8x128xf32>,
      %c0_102 = arith.constant 0 : index
      %c0_103 = arith.constant 0 : index
      %249 = vector.load %arg7[%c0_102, %c0_103] : memref<8x128xf32, #tpu.memory_space<vmem>>, vector<8x128xf32>
      %c0_104 = arith.constant 0 : index
      %c0_105 = arith.constant 0 : index
      %250 = vector.load %arg10[%c0_104, %c0_105] : memref<8x128xf32, #tpu.memory_space<vmem>>, vector<8x128xf32>
      tpu.vector_store %arg10[%c0_104, %c0_105], %249 {strides = array<i32>} : memref<8x128xf32, #tpu.memory_space<vmem>>, vector<8x128xf32>,
    } else {
    }
    %c0 = arith.constant 0 : index
    %c0_1 = arith.constant 0 : index
    %c0_2 = arith.constant 0 : index
    %3 = vector.load %arg2[%c0, %c0_1, %c0_2] : memref<8x8x128xf32, #tpu.memory_space<vmem>>, vector<8x8x128xf32>
    %4 = vector.shape_cast %3 : vector<8x8x128xf32> to vector<64x128xf32>
    %c0_3 = arith.constant 0 : index
    %c0_4 = arith.constant 0 : index
    %5 = vector.load %arg3[%c0_3, %c0_4] : memref<128x512xf32, #tpu.memory_space<vmem>>, vector<128x512xf32>
    %cst = arith.constant dense<0.000000e+00> : vector<64x512xf32>
    %6 = tpu.matmul %4, %5, %cst {dimension_numbers = #tpu.dot_dimension_numbers<[1], [0], [0], [1], [0, 0, 1, 1], [], []>} : vector<64x128xf32>, vector<128x512xf32>, vector<64x512xf32> -> vector<64x512xf32>
    %c0_5 = arith.constant 0 : index
    %c0_6 = arith.constant 0 : index
    %7 = vector.load %arg4[%c0_5, %c0_6] : memref<1x512xf32, #tpu.memory_space<vmem>>, vector<1x512xf32>
    %8 = vector.broadcast %7 : vector<1x512xf32> to vector<64x512xf32>
    %9 = arith.addf %6, %8 : vector<64x512xf32>
    %c0_7 = arith.constant 0 : index
    %c0_8 = arith.constant 0 : index
    %10 = vector.load %arg11[%c0_7, %c0_8] : memref<64x512xf32, #tpu.memory_space<vmem>>, vector<64x512xf32>
    tpu.vector_store %arg11[%c0_7, %c0_8], %9 {strides = array<i32>} : memref<64x512xf32, #tpu.memory_space<vmem>>, vector<64x512xf32>,
    %c0_9 = arith.constant 0 : index
    %c0_10 = arith.constant 0 : index
    %11 = vector.load %arg9[%c0_9, %c0_10] : memref<8x128xf32, #tpu.memory_space<vmem>>, vector<8x128xf32>
    %c0_11 = arith.constant 0 : index
    %c0_12 = arith.constant 0 : index
    %12 = vector.load %arg10[%c0_11, %c0_12] : memref<8x128xf32, #tpu.memory_space<vmem>>, vector<8x128xf32>
    %c0_i32_13 = arith.constant 0 : i32
    %c8_i32 = arith.constant 8 : i32
    %13 = arith.muli %c0_i32_13, %c8_i32 : i32
    %14 = tpu.assume_multiple %13, 8 : i32
    %15 = arith.index_cast %14 : i32 to index
    %c0_14 = arith.constant 0 : index
    %16 = vector.load %arg11[%15, %c0_14] : memref<64x512xf32, #tpu.memory_space<vmem>>, vector<8x512xf32>
    %c0_15 = arith.constant 0 : index
    %c0_16 = arith.constant 0 : index
    %17 = vector.load %arg5[%c0_15, %c0_16] : memref<128x512xf32, #tpu.memory_space<vmem>>, vector<128x512xf32>
    %cst_17 = arith.constant dense<0.000000e+00> : vector<8x512xf32>
    %18 = tpu.matmul %11, %17, %cst_17 {dimension_numbers = #tpu.dot_dimension_numbers<[1], [0], [0], [1], [0, 0, 1, 1], [], []>} : vector<8x128xf32>, vector<128x512xf32>, vector<8x512xf32> -> vector<8x512xf32>
    %19 = arith.addf %16, %18 : vector<8x512xf32>
    %20 = vector.extract_strided_slice %19 {offsets = [0, 0], sizes = [8, 384], strides = [1, 1]} : vector<8x512xf32> to vector<8x384xf32>
    %cst_18 = arith.constant 5.000000e-01 : f32
    %21 = vector.broadcast %cst_18 : f32 to vector<8x384xf32>
    %22 = arith.mulf %21, %20 : vector<8x384xf32>
    %23 = math.tanh %22 : vector<8x384xf32>
    %cst_19 = arith.constant 5.000000e-01 : f32
    %24 = vector.broadcast %cst_19 : f32 to vector<8x384xf32>
    %25 = arith.mulf %24, %23 : vector<8x384xf32>
    %cst_20 = arith.constant 5.000000e-01 : f32
    %26 = vector.broadcast %cst_20 : f32 to vector<8x384xf32>
    %27 = arith.addf %25, %26 : vector<8x384xf32>
    %28 = vector.extract_strided_slice %27 {offsets = [0, 0], sizes = [8, 128], strides = [1, 1]} : vector<8x384xf32> to vector<8x128xf32>
    %29 = vector.extract_strided_slice %27 {offsets = [0, 128], sizes = [8, 128], strides = [1, 1]} : vector<8x384xf32> to vector<8x128xf32>
    %30 = vector.extract_strided_slice %27 {offsets = [0, 256], sizes = [8, 128], strides = [1, 1]} : vector<8x384xf32> to vector<8x128xf32>
    %31 = vector.extract_strided_slice %19 {offsets = [0, 384], sizes = [8, 128], strides = [1, 1]} : vector<8x512xf32> to vector<8x128xf32>
    %32 = math.tanh %31 : vector<8x128xf32>
    %33 = arith.mulf %29, %12 : vector<8x128xf32>
    %34 = arith.mulf %28, %32 : vector<8x128xf32>
    %35 = arith.addf %33, %34 : vector<8x128xf32>
    %36 = math.tanh %35 : vector<8x128xf32>
    %37 = arith.mulf %30, %36 : vector<8x128xf32>
    %38 = arith.index_cast %c0_i32_13 : i32 to index
    %c0_21 = arith.constant 0 : index
    %c0_22 = arith.constant 0 : index
    %39 = vector.load %arg8[%38, %c0_21, %c0_22] : memref<8x8x128xf32, #tpu.memory_space<vmem>>, vector<1x8x128xf32>
    %40 = vector.shape_cast %39 : vector<1x8x128xf32> to vector<8x128xf32>
    %41 = vector.shape_cast %37 : vector<8x128xf32> to vector<1x8x128xf32>
    tpu.vector_store %arg8[%38, %c0_21, %c0_22], %41 {strides = array<i32>} : memref<8x8x128xf32, #tpu.memory_space<vmem>>, vector<1x8x128xf32>,
    %c1_i32 = arith.constant 1 : i32
    %c8_i32_23 = arith.constant 8 : i32
    %42 = arith.muli %c1_i32, %c8_i32_23 : i32
    %43 = tpu.assume_multiple %42, 8 : i32
    %44 = arith.index_cast %43 : i32 to index
    %c0_24 = arith.constant 0 : index
    %45 = vector.load %arg11[%44, %c0_24] : memref<64x512xf32, #tpu.memory_space<vmem>>, vector<8x512xf32>
    %c0_25 = arith.constant 0 : index
    %c0_26 = arith.constant 0 : index
    %46 = vector.load %arg5[%c0_25, %c0_26] : memref<128x512xf32, #tpu.memory_space<vmem>>, vector<128x512xf32>
    %cst_27 = arith.constant dense<0.000000e+00> : vector<8x512xf32>
    %47 = tpu.matmul %37, %46, %cst_27 {dimension_numbers = #tpu.dot_dimension_numbers<[1], [0], [0], [1], [0, 0, 1, 1], [], []>} : vector<8x128xf32>, vector<128x512xf32>, vector<8x512xf32> -> vector<8x512xf32>
    %48 = arith.addf %45, %47 : vector<8x512xf32>
    %49 = vector.extract_strided_slice %48 {offsets = [0, 0], sizes = [8, 384], strides = [1, 1]} : vector<8x512xf32> to vector<8x384xf32>
    %cst_28 = arith.constant 5.000000e-01 : f32
    %50 = vector.broadcast %cst_28 : f32 to vector<8x384xf32>
    %51 = arith.mulf %50, %49 : vector<8x384xf32>
    %52 = math.tanh %51 : vector<8x384xf32>
    %cst_29 = arith.constant 5.000000e-01 : f32
    %53 = vector.broadcast %cst_29 : f32 to vector<8x384xf32>
    %54 = arith.mulf %53, %52 : vector<8x384xf32>
    %cst_30 = arith.constant 5.000000e-01 : f32
    %55 = vector.broadcast %cst_30 : f32 to vector<8x384xf32>
    %56 = arith.addf %54, %55 : vector<8x384xf32>
    %57 = vector.extract_strided_slice %56 {offsets = [0, 0], sizes = [8, 128], strides = [1, 1]} : vector<8x384xf32> to vector<8x128xf32>
    %58 = vector.extract_strided_slice %56 {offsets = [0, 128], sizes = [8, 128], strides = [1, 1]} : vector<8x384xf32> to vector<8x128xf32>
    %59 = vector.extract_strided_slice %56 {offsets = [0, 256], sizes = [8, 128], strides = [1, 1]} : vector<8x384xf32> to vector<8x128xf32>
    %60 = vector.extract_strided_slice %48 {offsets = [0, 384], sizes = [8, 128], strides = [1, 1]} : vector<8x512xf32> to vector<8x128xf32>
    %61 = math.tanh %60 : vector<8x128xf32>
    %62 = arith.mulf %58, %35 : vector<8x128xf32>
    %63 = arith.mulf %57, %61 : vector<8x128xf32>
    %64 = arith.addf %62, %63 : vector<8x128xf32>
    %65 = math.tanh %64 : vector<8x128xf32>
    %66 = arith.mulf %59, %65 : vector<8x128xf32>
    %67 = arith.index_cast %c1_i32 : i32 to index
    %c0_31 = arith.constant 0 : index
    %c0_32 = arith.constant 0 : index
    %68 = vector.load %arg8[%67, %c0_31, %c0_32] : memref<8x8x128xf32, #tpu.memory_space<vmem>>, vector<1x8x128xf32>
    %69 = vector.shape_cast %68 : vector<1x8x128xf32> to vector<8x128xf32>
    %70 = vector.shape_cast %66 : vector<8x128xf32> to vector<1x8x128xf32>
    tpu.vector_store %arg8[%67, %c0_31, %c0_32], %70 {strides = array<i32>} : memref<8x8x128xf32, #tpu.memory_space<vmem>>, vector<1x8x128xf32>,
    %c2_i32 = arith.constant 2 : i32
    %c8_i32_33 = arith.constant 8 : i32
    %71 = arith.muli %c2_i32, %c8_i32_33 : i32
    %72 = tpu.assume_multiple %71, 8 : i32
    %73 = arith.index_cast %72 : i32 to index
    %c0_34 = arith.constant 0 : index
    %74 = vector.load %arg11[%73, %c0_34] : memref<64x512xf32, #tpu.memory_space<vmem>>, vector<8x512xf32>
    %c0_35 = arith.constant 0 : index
    %c0_36 = arith.constant 0 : index
    %75 = vector.load %arg5[%c0_35, %c0_36] : memref<128x512xf32, #tpu.memory_space<vmem>>, vector<128x512xf32>
    %cst_37 = arith.constant dense<0.000000e+00> : vector<8x512xf32>
    %76 = tpu.matmul %66, %75, %cst_37 {dimension_numbers = #tpu.dot_dimension_numbers<[1], [0], [0], [1], [0, 0, 1, 1], [], []>} : vector<8x128xf32>, vector<128x512xf32>, vector<8x512xf32> -> vector<8x512xf32>
    %77 = arith.addf %74, %76 : vector<8x512xf32>
    %78 = vector.extract_strided_slice %77 {offsets = [0, 0], sizes = [8, 384], strides = [1, 1]} : vector<8x512xf32> to vector<8x384xf32>
    %cst_38 = arith.constant 5.000000e-01 : f32
    %79 = vector.broadcast %cst_38 : f32 to vector<8x384xf32>
    %80 = arith.mulf %79, %78 : vector<8x384xf32>
    %81 = math.tanh %80 : vector<8x384xf32>
    %cst_39 = arith.constant 5.000000e-01 : f32
    %82 = vector.broadcast %cst_39 : f32 to vector<8x384xf32>
    %83 = arith.mulf %82, %81 : vector<8x384xf32>
    %cst_40 = arith.constant 5.000000e-01 : f32
    %84 = vector.broadcast %cst_40 : f32 to vector<8x384xf32>
    %85 = arith.addf %83, %84 : vector<8x384xf32>
    %86 = vector.extract_strided_slice %85 {offsets = [0, 0], sizes = [8, 128], strides = [1, 1]} : vector<8x384xf32> to vector<8x128xf32>
    %87 = vector.extract_strided_slice %85 {offsets = [0, 128], sizes = [8, 128], strides = [1, 1]} : vector<8x384xf32> to vector<8x128xf32>
    %88 = vector.extract_strided_slice %85 {offsets = [0, 256], sizes = [8, 128], strides = [1, 1]} : vector<8x384xf32> to vector<8x128xf32>
    %89 = vector.extract_strided_slice %77 {offsets = [0, 384], sizes = [8, 128], strides = [1, 1]} : vector<8x512xf32> to vector<8x128xf32>
    %90 = math.tanh %89 : vector<8x128xf32>
    %91 = arith.mulf %87, %64 : vector<8x128xf32>
    %92 = arith.mulf %86, %90 : vector<8x128xf32>
    %93 = arith.addf %91, %92 : vector<8x128xf32>
    %94 = math.tanh %93 : vector<8x128xf32>
    %95 = arith.mulf %88, %94 : vector<8x128xf32>
    %96 = arith.index_cast %c2_i32 : i32 to index
    %c0_41 = arith.constant 0 : index
    %c0_42 = arith.constant 0 : index
    %97 = vector.load %arg8[%96, %c0_41, %c0_42] : memref<8x8x128xf32, #tpu.memory_space<vmem>>, vector<1x8x128xf32>
    %98 = vector.shape_cast %97 : vector<1x8x128xf32> to vector<8x128xf32>
    %99 = vector.shape_cast %95 : vector<8x128xf32> to vector<1x8x128xf32>
    tpu.vector_store %arg8[%96, %c0_41, %c0_42], %99 {strides = array<i32>} : memref<8x8x128xf32, #tpu.memory_space<vmem>>, vector<1x8x128xf32>,
    %c3_i32 = arith.constant 3 : i32
    %c8_i32_43 = arith.constant 8 : i32
    %100 = arith.muli %c3_i32, %c8_i32_43 : i32
    %101 = tpu.assume_multiple %100, 8 : i32
    %102 = arith.index_cast %101 : i32 to index
    %c0_44 = arith.constant 0 : index
    %103 = vector.load %arg11[%102, %c0_44] : memref<64x512xf32, #tpu.memory_space<vmem>>, vector<8x512xf32>
    %c0_45 = arith.constant 0 : index
    %c0_46 = arith.constant 0 : index
    %104 = vector.load %arg5[%c0_45, %c0_46] : memref<128x512xf32, #tpu.memory_space<vmem>>, vector<128x512xf32>
    %cst_47 = arith.constant dense<0.000000e+00> : vector<8x512xf32>
    %105 = tpu.matmul %95, %104, %cst_47 {dimension_numbers = #tpu.dot_dimension_numbers<[1], [0], [0], [1], [0, 0, 1, 1], [], []>} : vector<8x128xf32>, vector<128x512xf32>, vector<8x512xf32> -> vector<8x512xf32>
    %106 = arith.addf %103, %105 : vector<8x512xf32>
    %107 = vector.extract_strided_slice %106 {offsets = [0, 0], sizes = [8, 384], strides = [1, 1]} : vector<8x512xf32> to vector<8x384xf32>
    %cst_48 = arith.constant 5.000000e-01 : f32
    %108 = vector.broadcast %cst_48 : f32 to vector<8x384xf32>
    %109 = arith.mulf %108, %107 : vector<8x384xf32>
    %110 = math.tanh %109 : vector<8x384xf32>
    %cst_49 = arith.constant 5.000000e-01 : f32
    %111 = vector.broadcast %cst_49 : f32 to vector<8x384xf32>
    %112 = arith.mulf %111, %110 : vector<8x384xf32>
    %cst_50 = arith.constant 5.000000e-01 : f32
    %113 = vector.broadcast %cst_50 : f32 to vector<8x384xf32>
    %114 = arith.addf %112, %113 : vector<8x384xf32>
    %115 = vector.extract_strided_slice %114 {offsets = [0, 0], sizes = [8, 128], strides = [1, 1]} : vector<8x384xf32> to vector<8x128xf32>
    %116 = vector.extract_strided_slice %114 {offsets = [0, 128], sizes = [8, 128], strides = [1, 1]} : vector<8x384xf32> to vector<8x128xf32>
    %117 = vector.extract_strided_slice %114 {offsets = [0, 256], sizes = [8, 128], strides = [1, 1]} : vector<8x384xf32> to vector<8x128xf32>
    %118 = vector.extract_strided_slice %106 {offsets = [0, 384], sizes = [8, 128], strides = [1, 1]} : vector<8x512xf32> to vector<8x128xf32>
    %119 = math.tanh %118 : vector<8x128xf32>
    %120 = arith.mulf %116, %93 : vector<8x128xf32>
    %121 = arith.mulf %115, %119 : vector<8x128xf32>
    %122 = arith.addf %120, %121 : vector<8x128xf32>
    %123 = math.tanh %122 : vector<8x128xf32>
    %124 = arith.mulf %117, %123 : vector<8x128xf32>
    %125 = arith.index_cast %c3_i32 : i32 to index
    %c0_51 = arith.constant 0 : index
    %c0_52 = arith.constant 0 : index
    %126 = vector.load %arg8[%125, %c0_51, %c0_52] : memref<8x8x128xf32, #tpu.memory_space<vmem>>, vector<1x8x128xf32>
    %127 = vector.shape_cast %126 : vector<1x8x128xf32> to vector<8x128xf32>
    %128 = vector.shape_cast %124 : vector<8x128xf32> to vector<1x8x128xf32>
    tpu.vector_store %arg8[%125, %c0_51, %c0_52], %128 {strides = array<i32>} : memref<8x8x128xf32, #tpu.memory_space<vmem>>, vector<1x8x128xf32>,
    %c4_i32 = arith.constant 4 : i32
    %c8_i32_53 = arith.constant 8 : i32
    %129 = arith.muli %c4_i32, %c8_i32_53 : i32
    %130 = tpu.assume_multiple %129, 8 : i32
    %131 = arith.index_cast %130 : i32 to index
    %c0_54 = arith.constant 0 : index
    %132 = vector.load %arg11[%131, %c0_54] : memref<64x512xf32, #tpu.memory_space<vmem>>, vector<8x512xf32>
    %c0_55 = arith.constant 0 : index
    %c0_56 = arith.constant 0 : index
    %133 = vector.load %arg5[%c0_55, %c0_56] : memref<128x512xf32, #tpu.memory_space<vmem>>, vector<128x512xf32>
    %cst_57 = arith.constant dense<0.000000e+00> : vector<8x512xf32>
    %134 = tpu.matmul %124, %133, %cst_57 {dimension_numbers = #tpu.dot_dimension_numbers<[1], [0], [0], [1], [0, 0, 1, 1], [], []>} : vector<8x128xf32>, vector<128x512xf32>, vector<8x512xf32> -> vector<8x512xf32>
    %135 = arith.addf %132, %134 : vector<8x512xf32>
    %136 = vector.extract_strided_slice %135 {offsets = [0, 0], sizes = [8, 384], strides = [1, 1]} : vector<8x512xf32> to vector<8x384xf32>
    %cst_58 = arith.constant 5.000000e-01 : f32
    %137 = vector.broadcast %cst_58 : f32 to vector<8x384xf32>
    %138 = arith.mulf %137, %136 : vector<8x384xf32>
    %139 = math.tanh %138 : vector<8x384xf32>
    %cst_59 = arith.constant 5.000000e-01 : f32
    %140 = vector.broadcast %cst_59 : f32 to vector<8x384xf32>
    %141 = arith.mulf %140, %139 : vector<8x384xf32>
    %cst_60 = arith.constant 5.000000e-01 : f32
    %142 = vector.broadcast %cst_60 : f32 to vector<8x384xf32>
    %143 = arith.addf %141, %142 : vector<8x384xf32>
    %144 = vector.extract_strided_slice %143 {offsets = [0, 0], sizes = [8, 128], strides = [1, 1]} : vector<8x384xf32> to vector<8x128xf32>
    %145 = vector.extract_strided_slice %143 {offsets = [0, 128], sizes = [8, 128], strides = [1, 1]} : vector<8x384xf32> to vector<8x128xf32>
    %146 = vector.extract_strided_slice %143 {offsets = [0, 256], sizes = [8, 128], strides = [1, 1]} : vector<8x384xf32> to vector<8x128xf32>
    %147 = vector.extract_strided_slice %135 {offsets = [0, 384], sizes = [8, 128], strides = [1, 1]} : vector<8x512xf32> to vector<8x128xf32>
    %148 = math.tanh %147 : vector<8x128xf32>
    %149 = arith.mulf %145, %122 : vector<8x128xf32>
    %150 = arith.mulf %144, %148 : vector<8x128xf32>
    %151 = arith.addf %149, %150 : vector<8x128xf32>
    %152 = math.tanh %151 : vector<8x128xf32>
    %153 = arith.mulf %146, %152 : vector<8x128xf32>
    %154 = arith.index_cast %c4_i32 : i32 to index
    %c0_61 = arith.constant 0 : index
    %c0_62 = arith.constant 0 : index
    %155 = vector.load %arg8[%154, %c0_61, %c0_62] : memref<8x8x128xf32, #tpu.memory_space<vmem>>, vector<1x8x128xf32>
    %156 = vector.shape_cast %155 : vector<1x8x128xf32> to vector<8x128xf32>
    %157 = vector.shape_cast %153 : vector<8x128xf32> to vector<1x8x128xf32>
    tpu.vector_store %arg8[%154, %c0_61, %c0_62], %157 {strides = array<i32>} : memref<8x8x128xf32, #tpu.memory_space<vmem>>, vector<1x8x128xf32>,
    %c5_i32 = arith.constant 5 : i32
    %c8_i32_63 = arith.constant 8 : i32
    %158 = arith.muli %c5_i32, %c8_i32_63 : i32
    %159 = tpu.assume_multiple %158, 8 : i32
    %160 = arith.index_cast %159 : i32 to index
    %c0_64 = arith.constant 0 : index
    %161 = vector.load %arg11[%160, %c0_64] : memref<64x512xf32, #tpu.memory_space<vmem>>, vector<8x512xf32>
    %c0_65 = arith.constant 0 : index
    %c0_66 = arith.constant 0 : index
    %162 = vector.load %arg5[%c0_65, %c0_66] : memref<128x512xf32, #tpu.memory_space<vmem>>, vector<128x512xf32>
    %cst_67 = arith.constant dense<0.000000e+00> : vector<8x512xf32>
    %163 = tpu.matmul %153, %162, %cst_67 {dimension_numbers = #tpu.dot_dimension_numbers<[1], [0], [0], [1], [0, 0, 1, 1], [], []>} : vector<8x128xf32>, vector<128x512xf32>, vector<8x512xf32> -> vector<8x512xf32>
    %164 = arith.addf %161, %163 : vector<8x512xf32>
    %165 = vector.extract_strided_slice %164 {offsets = [0, 0], sizes = [8, 384], strides = [1, 1]} : vector<8x512xf32> to vector<8x384xf32>
    %cst_68 = arith.constant 5.000000e-01 : f32
    %166 = vector.broadcast %cst_68 : f32 to vector<8x384xf32>
    %167 = arith.mulf %166, %165 : vector<8x384xf32>
    %168 = math.tanh %167 : vector<8x384xf32>
    %cst_69 = arith.constant 5.000000e-01 : f32
    %169 = vector.broadcast %cst_69 : f32 to vector<8x384xf32>
    %170 = arith.mulf %169, %168 : vector<8x384xf32>
    %cst_70 = arith.constant 5.000000e-01 : f32
    %171 = vector.broadcast %cst_70 : f32 to vector<8x384xf32>
    %172 = arith.addf %170, %171 : vector<8x384xf32>
    %173 = vector.extract_strided_slice %172 {offsets = [0, 0], sizes = [8, 128], strides = [1, 1]} : vector<8x384xf32> to vector<8x128xf32>
    %174 = vector.extract_strided_slice %172 {offsets = [0, 128], sizes = [8, 128], strides = [1, 1]} : vector<8x384xf32> to vector<8x128xf32>
    %175 = vector.extract_strided_slice %172 {offsets = [0, 256], sizes = [8, 128], strides = [1, 1]} : vector<8x384xf32> to vector<8x128xf32>
    %176 = vector.extract_strided_slice %164 {offsets = [0, 384], sizes = [8, 128], strides = [1, 1]} : vector<8x512xf32> to vector<8x128xf32>
    %177 = math.tanh %176 : vector<8x128xf32>
    %178 = arith.mulf %174, %151 : vector<8x128xf32>
    %179 = arith.mulf %173, %177 : vector<8x128xf32>
    %180 = arith.addf %178, %179 : vector<8x128xf32>
    %181 = math.tanh %180 : vector<8x128xf32>
    %182 = arith.mulf %175, %181 : vector<8x128xf32>
    %183 = arith.index_cast %c5_i32 : i32 to index
    %c0_71 = arith.constant 0 : index
    %c0_72 = arith.constant 0 : index
    %184 = vector.load %arg8[%183, %c0_71, %c0_72] : memref<8x8x128xf32, #tpu.memory_space<vmem>>, vector<1x8x128xf32>
    %185 = vector.shape_cast %184 : vector<1x8x128xf32> to vector<8x128xf32>
    %186 = vector.shape_cast %182 : vector<8x128xf32> to vector<1x8x128xf32>
    tpu.vector_store %arg8[%183, %c0_71, %c0_72], %186 {strides = array<i32>} : memref<8x8x128xf32, #tpu.memory_space<vmem>>, vector<1x8x128xf32>,
    %c6_i32 = arith.constant 6 : i32
    %c8_i32_73 = arith.constant 8 : i32
    %187 = arith.muli %c6_i32, %c8_i32_73 : i32
    %188 = tpu.assume_multiple %187, 8 : i32
    %189 = arith.index_cast %188 : i32 to index
    %c0_74 = arith.constant 0 : index
    %190 = vector.load %arg11[%189, %c0_74] : memref<64x512xf32, #tpu.memory_space<vmem>>, vector<8x512xf32>
    %c0_75 = arith.constant 0 : index
    %c0_76 = arith.constant 0 : index
    %191 = vector.load %arg5[%c0_75, %c0_76] : memref<128x512xf32, #tpu.memory_space<vmem>>, vector<128x512xf32>
    %cst_77 = arith.constant dense<0.000000e+00> : vector<8x512xf32>
    %192 = tpu.matmul %182, %191, %cst_77 {dimension_numbers = #tpu.dot_dimension_numbers<[1], [0], [0], [1], [0, 0, 1, 1], [], []>} : vector<8x128xf32>, vector<128x512xf32>, vector<8x512xf32> -> vector<8x512xf32>
    %193 = arith.addf %190, %192 : vector<8x512xf32>
    %194 = vector.extract_strided_slice %193 {offsets = [0, 0], sizes = [8, 384], strides = [1, 1]} : vector<8x512xf32> to vector<8x384xf32>
    %cst_78 = arith.constant 5.000000e-01 : f32
    %195 = vector.broadcast %cst_78 : f32 to vector<8x384xf32>
    %196 = arith.mulf %195, %194 : vector<8x384xf32>
    %197 = math.tanh %196 : vector<8x384xf32>
    %cst_79 = arith.constant 5.000000e-01 : f32
    %198 = vector.broadcast %cst_79 : f32 to vector<8x384xf32>
    %199 = arith.mulf %198, %197 : vector<8x384xf32>
    %cst_80 = arith.constant 5.000000e-01 : f32
    %200 = vector.broadcast %cst_80 : f32 to vector<8x384xf32>
    %201 = arith.addf %199, %200 : vector<8x384xf32>
    %202 = vector.extract_strided_slice %201 {offsets = [0, 0], sizes = [8, 128], strides = [1, 1]} : vector<8x384xf32> to vector<8x128xf32>
    %203 = vector.extract_strided_slice %201 {offsets = [0, 128], sizes = [8, 128], strides = [1, 1]} : vector<8x384xf32> to vector<8x128xf32>
    %204 = vector.extract_strided_slice %201 {offsets = [0, 256], sizes = [8, 128], strides = [1, 1]} : vector<8x384xf32> to vector<8x128xf32>
    %205 = vector.extract_strided_slice %193 {offsets = [0, 384], sizes = [8, 128], strides = [1, 1]} : vector<8x512xf32> to vector<8x128xf32>
    %206 = math.tanh %205 : vector<8x128xf32>
    %207 = arith.mulf %203, %180 : vector<8x128xf32>
    %208 = arith.mulf %202, %206 : vector<8x128xf32>
    %209 = arith.addf %207, %208 : vector<8x128xf32>
    %210 = math.tanh %209 : vector<8x128xf32>
    %211 = arith.mulf %204, %210 : vector<8x128xf32>
    %212 = arith.index_cast %c6_i32 : i32 to index
    %c0_81 = arith.constant 0 : index
    %c0_82 = arith.constant 0 : index
    %213 = vector.load %arg8[%212, %c0_81, %c0_82] : memref<8x8x128xf32, #tpu.memory_space<vmem>>, vector<1x8x128xf32>
    %214 = vector.shape_cast %213 : vector<1x8x128xf32> to vector<8x128xf32>
    %215 = vector.shape_cast %211 : vector<8x128xf32> to vector<1x8x128xf32>
    tpu.vector_store %arg8[%212, %c0_81, %c0_82], %215 {strides = array<i32>} : memref<8x8x128xf32, #tpu.memory_space<vmem>>, vector<1x8x128xf32>,
    %c7_i32 = arith.constant 7 : i32
    %c8_i32_83 = arith.constant 8 : i32
    %216 = arith.muli %c7_i32, %c8_i32_83 : i32
    %217 = tpu.assume_multiple %216, 8 : i32
    %218 = arith.index_cast %217 : i32 to index
    %c0_84 = arith.constant 0 : index
    %219 = vector.load %arg11[%218, %c0_84] : memref<64x512xf32, #tpu.memory_space<vmem>>, vector<8x512xf32>
    %c0_85 = arith.constant 0 : index
    %c0_86 = arith.constant 0 : index
    %220 = vector.load %arg5[%c0_85, %c0_86] : memref<128x512xf32, #tpu.memory_space<vmem>>, vector<128x512xf32>
    %cst_87 = arith.constant dense<0.000000e+00> : vector<8x512xf32>
    %221 = tpu.matmul %211, %220, %cst_87 {dimension_numbers = #tpu.dot_dimension_numbers<[1], [0], [0], [1], [0, 0, 1, 1], [], []>} : vector<8x128xf32>, vector<128x512xf32>, vector<8x512xf32> -> vector<8x512xf32>
    %222 = arith.addf %219, %221 : vector<8x512xf32>
    %223 = vector.extract_strided_slice %222 {offsets = [0, 0], sizes = [8, 384], strides = [1, 1]} : vector<8x512xf32> to vector<8x384xf32>
    %cst_88 = arith.constant 5.000000e-01 : f32
    %224 = vector.broadcast %cst_88 : f32 to vector<8x384xf32>
    %225 = arith.mulf %224, %223 : vector<8x384xf32>
    %226 = math.tanh %225 : vector<8x384xf32>
    %cst_89 = arith.constant 5.000000e-01 : f32
    %227 = vector.broadcast %cst_89 : f32 to vector<8x384xf32>
    %228 = arith.mulf %227, %226 : vector<8x384xf32>
    %cst_90 = arith.constant 5.000000e-01 : f32
    %229 = vector.broadcast %cst_90 : f32 to vector<8x384xf32>
    %230 = arith.addf %228, %229 : vector<8x384xf32>
    %231 = vector.extract_strided_slice %230 {offsets = [0, 0], sizes = [8, 128], strides = [1, 1]} : vector<8x384xf32> to vector<8x128xf32>
    %232 = vector.extract_strided_slice %230 {offsets = [0, 128], sizes = [8, 128], strides = [1, 1]} : vector<8x384xf32> to vector<8x128xf32>
    %233 = vector.extract_strided_slice %230 {offsets = [0, 256], sizes = [8, 128], strides = [1, 1]} : vector<8x384xf32> to vector<8x128xf32>
    %234 = vector.extract_strided_slice %222 {offsets = [0, 384], sizes = [8, 128], strides = [1, 1]} : vector<8x512xf32> to vector<8x128xf32>
    %235 = math.tanh %234 : vector<8x128xf32>
    %236 = arith.mulf %232, %209 : vector<8x128xf32>
    %237 = arith.mulf %231, %235 : vector<8x128xf32>
    %238 = arith.addf %236, %237 : vector<8x128xf32>
    %239 = math.tanh %238 : vector<8x128xf32>
    %240 = arith.mulf %233, %239 : vector<8x128xf32>
    %241 = arith.index_cast %c7_i32 : i32 to index
    %c0_91 = arith.constant 0 : index
    %c0_92 = arith.constant 0 : index
    %242 = vector.load %arg8[%241, %c0_91, %c0_92] : memref<8x8x128xf32, #tpu.memory_space<vmem>>, vector<1x8x128xf32>
    %243 = vector.shape_cast %242 : vector<1x8x128xf32> to vector<8x128xf32>
    %244 = vector.shape_cast %240 : vector<8x128xf32> to vector<1x8x128xf32>
    tpu.vector_store %arg8[%241, %c0_91, %c0_92], %244 {strides = array<i32>} : memref<8x8x128xf32, #tpu.memory_space<vmem>>, vector<1x8x128xf32>,
    %c8_i32_93 = arith.constant 8 : i32
    %c0_94 = arith.constant 0 : index
    %c0_95 = arith.constant 0 : index
    %245 = vector.load %arg9[%c0_94, %c0_95] : memref<8x128xf32, #tpu.memory_space<vmem>>, vector<8x128xf32>
    tpu.vector_store %arg9[%c0_94, %c0_95], %240 {strides = array<i32>} : memref<8x128xf32, #tpu.memory_space<vmem>>, vector<8x128xf32>,
    %c0_96 = arith.constant 0 : index
    %c0_97 = arith.constant 0 : index
    %246 = vector.load %arg10[%c0_96, %c0_97] : memref<8x128xf32, #tpu.memory_space<vmem>>, vector<8x128xf32>
    tpu.vector_store %arg10[%c0_96, %c0_97], %238 {strides = array<i32>} : memref<8x128xf32, #tpu.memory_space<vmem>>, vector<8x128xf32>,
    return
  }
  func.func @transform_0(%arg0: i32, %arg1: i32) -> (i32, i32, i32) {
    %c0_i32 = arith.constant 0 : i32
    %c0_i32_0 = arith.constant 0 : i32
    return %arg1, %arg0, %c0_i32 : i32, i32, i32
  }
  func.func @transform_1(%arg0: i32, %arg1: i32) -> (i32, i32) {
    %c0_i32 = arith.constant 0 : i32
    %c0_i32_0 = arith.constant 0 : i32
    %c0_i32_1 = arith.constant 0 : i32
    return %c0_i32, %c0_i32_0 : i32, i32
  }
  func.func @transform_2(%arg0: i32, %arg1: i32) -> (i32, i32) {
    %c0_i32 = arith.constant 0 : i32
    %c0_i32_0 = arith.constant 0 : i32
    %c0_i32_1 = arith.constant 0 : i32
    return %c0_i32, %c0_i32_0 : i32, i32
  }
  func.func @transform_3(%arg0: i32, %arg1: i32) -> (i32, i32) {
    %c0_i32 = arith.constant 0 : i32
    %c0_i32_0 = arith.constant 0 : i32
    %c0_i32_1 = arith.constant 0 : i32
    return %c0_i32, %c0_i32_0 : i32, i32
  }
  func.func @transform_4(%arg0: i32, %arg1: i32) -> (i32, i32) {
    %c0_i32 = arith.constant 0 : i32
    %c0_i32_0 = arith.constant 0 : i32
    return %arg0, %c0_i32 : i32, i32
  }
  func.func @transform_5(%arg0: i32, %arg1: i32) -> (i32, i32) {
    %c0_i32 = arith.constant 0 : i32
    %c0_i32_0 = arith.constant 0 : i32
    return %arg0, %c0_i32 : i32, i32
  }
  func.func @transform_6(%arg0: i32, %arg1: i32) -> (i32, i32, i32) {
    %c0_i32 = arith.constant 0 : i32
    %c0_i32_0 = arith.constant 0 : i32
    return %arg1, %arg0, %c0_i32 : i32, i32, i32
  }
  func.func @transform_7(%arg0: i32, %arg1: i32) -> (i32, i32) {
    %c0_i32 = arith.constant 0 : i32
    %c0_i32_0 = arith.constant 0 : i32
    return %arg0, %c0_i32 : i32, i32
  }
  func.func @transform_8(%arg0: i32, %arg1: i32) -> (i32, i32) {
    %c0_i32 = arith.constant 0 : i32
    %c0_i32_0 = arith.constant 0 : i32
    return %arg0, %c0_i32 : i32, i32
  }
}

</mosaic_0001>

<bundles_post_ra>
// kernel: char_lstm_forward.5
= control target key start
LH: loop header
LB: loop body
LE: loop exit
PB: predicated region body
PF: predicated region fallthrough
CT: control target
= control target key end

     0   :  { %s382_s1 = inlined_call_operand.vmem [shape: f32[128,128], index: 1, kind: input, shape index: {}]   ;;  %s383_s0 = inlined_call_operand.vmem [shape: f32[64,128], index: 0, kind: input, shape index: {}]   ;;  %s384_s2 = inlined_call_operand.vmem [shape: f32[1,128], index: 2, kind: input, shape index: {}]   ;;  %s385_s3 = inlined_call_operand.vmem [shape: f32[64,128], index: 3, kind: output, shape index: {}]  }
   0x1   :  { %v37_v0 = vld [vmem:[%s382_s1 + $0x78] sm:$0xff]  ;;  %v36_v1 = vld [vmem:[%s382_s1 + $0x70] sm:$0xff]  ;;  %v35_v2 = vld [vmem:[%s382_s1 + $0x68] sm:$0xff] }
   0x2   :  { %187 = vmatprep.subr.mxu0 %v37_v0  ;;  %231 = vmatprep.subr.mxu1 %v37_v0  ;;  %v34_v3 = vld [vmem:[%s382_s1 + $0x60] sm:$0xff]  ;;  %v33_v4 = vld [vmem:[%s382_s1 + $0x58] sm:$0xff]  ;;  %v32_v5 = vld [vmem:[%s382_s1 + $0x50] sm:$0xff] }
   0x3   :  { %188 = vmatpush3.msra.mxu0 %v37_v0  ;;  %247 = vmatpush3.msra.mxu1 %v37_v0  ;;  %v31_v6 = vld [vmem:[%s382_s1 + $0x48] sm:$0xff]  ;;  %v30_v7 = vld [vmem:[%s382_s1 + $0x40] sm:$0xff]  ;;  %v29_v8 = vld [vmem:[%s382_s1 + $0x38] sm:$0xff] }
   0x4   :  { %189 = vmatprep.subr.mxu0 %v36_v1  ;;  %232 = vmatprep.subr.mxu1 %v36_v1  ;;  %v28_v9 = vld [vmem:[%s382_s1 + $0x30] sm:$0xff]  ;;  %v27_v10 = vld [vmem:[%s382_s1 + $0x28] sm:$0xff]  ;;  %v26_v11 = vld [vmem:[%s382_s1 + $0x20] sm:$0xff] }
   0x5   :  { %190 = vmatpush3.msra.mxu0 %v36_v1  ;;  %248 = vmatpush3.msra.mxu1 %v36_v1  ;;  %v25_v12 = vld [vmem:[%s382_s1 + $0x18] sm:$0xff]  ;;  %v24_v13 = vld [vmem:[%s382_s1 + $0x10] sm:$0xff]  ;;  %v23_v14 = vld [vmem:[%s382_s1 + $0x8] sm:$0xff] }
   0x6   :  { %191 = vmatprep.subr.mxu0 %v35_v2  ;;  %233 = vmatprep.subr.mxu1 %v35_v2  ;;  %v22_v15 = vld [vmem:[%s382_s1] sm:$0xff]  ;;  %v15_v18 = vld [vmem:[%s383_s0 + $0x8] sm:$0xff]  ;;  %v16_v20 = vld [vmem:[%s383_s0 + $0x10] sm:$0xff] }
   0x7   :  { %192 = vmatpush3.msra.mxu0 %v35_v2  ;;  %249 = vmatpush3.msra.mxu1 %v35_v2  ;;  %v14_v16 = vld [vmem:[%s383_s0] sm:$0xff]  ;;  %v19_v19 = vld [vmem:[%s383_s0 + $0x28] sm:$0xff]  ;;  %v20_v21 = vld [vmem:[%s383_s0 + $0x30] sm:$0xff] }
   0x8   :  { %193 = vmatprep.subr.mxu0 %v34_v3  ;;  %234 = vmatprep.subr.mxu1 %v34_v3  ;;  %v18_v17 = vld [vmem:[%s383_s0 + $0x20] sm:$0xff]  ;;  %v17_v22 = vld [vmem:[%s383_s0 + $0x18] sm:$0xff] }
   0x9   :  { %194 = vmatpush3.msra.mxu0 %v34_v3  ;;  %250 = vmatpush3.msra.mxu1 %v34_v3  ;;  %v21_v23 = vld [vmem:[%s383_s0 + $0x38] sm:$0xff]  ;;  %v162_v24 = vld [vmem:[%s384_s2] ss:$0 sm:$0xff] }
   0xa   :  { %195 = vmatprep.subr.mxu0 %v33_v4  ;;  %235 = vmatprep.subr.mxu1 %v33_v4 }
   0xb   :  { %196 = vmatpush3.msra.mxu0 %v33_v4  ;;  %251 = vmatpush3.msra.mxu1 %v33_v4 }
   0xc   :  { %197 = vmatprep.subr.mxu0 %v32_v5  ;;  %236 = vmatprep.subr.mxu1 %v32_v5 }
   0xd   :  { %198 = vmatpush3.msra.mxu0 %v32_v5  ;;  %252 = vmatpush3.msra.mxu1 %v32_v5 }
   0xe   :  { %199 = vmatprep.subr.mxu0 %v31_v6  ;;  %237 = vmatprep.subr.mxu1 %v31_v6 }
   0xf   :  { %200 = vmatpush3.msra.mxu0 %v31_v6  ;;  %253 = vmatpush3.msra.mxu1 %v31_v6 }
  0x10   :  { %201 = vmatprep.subr.mxu0 %v30_v7  ;;  %238 = vmatprep.subr.mxu1 %v30_v7 }
  0x11   :  { %202 = vmatpush3.msra.mxu0 %v30_v7  ;;  %254 = vmatpush3.msra.mxu1 %v30_v7 }
  0x12   :  { %203 = vmatprep.subr.mxu0 %v29_v8  ;;  %239 = vmatprep.subr.mxu1 %v29_v8 }
  0x13   :  { %204 = vmatpush3.msra.mxu0 %v29_v8  ;;  %255 = vmatpush3.msra.mxu1 %v29_v8 }
  0x14   :  { %205 = vmatprep.subr.mxu0 %v28_v9  ;;  %240 = vmatprep.subr.mxu1 %v28_v9 }
  0x15   :  { %206 = vmatpush3.msra.mxu0 %v28_v9  ;;  %256 = vmatpush3.msra.mxu1 %v28_v9 }
  0x16   :  { %207 = vmatprep.subr.mxu0 %v27_v10  ;;  %241 = vmatprep.subr.mxu1 %v27_v10 }
  0x17   :  { %208 = vmatpush3.msra.mxu0 %v27_v10  ;;  %257 = vmatpush3.msra.mxu1 %v27_v10 }
  0x18   :  { %209 = vmatprep.subr.mxu0 %v26_v11  ;;  %242 = vmatprep.subr.mxu1 %v26_v11 }
  0x19   :  { %210 = vmatpush3.msra.mxu0 %v26_v11  ;;  %258 = vmatpush3.msra.mxu1 %v26_v11 }
  0x1a   :  { %211 = vmatprep.subr.mxu0 %v25_v12  ;;  %243 = vmatprep.subr.mxu1 %v25_v12 }
  0x1b   :  { %212 = vmatpush3.msra.mxu0 %v25_v12  ;;  %259 = vmatpush3.msra.mxu1 %v25_v12 }
  0x1c   :  { %213 = vmatprep.subr.mxu0 %v24_v13  ;;  %244 = vmatprep.subr.mxu1 %v24_v13 }
  0x1d   :  { %214 = vmatpush3.msra.mxu0 %v24_v13  ;;  %260 = vmatpush3.msra.mxu1 %v24_v13 }
  0x1e   :  { %215 = vmatprep.subr.mxu0 %v23_v14  ;;  %245 = vmatprep.subr.mxu1 %v23_v14 }
  0x1f   :  { %216 = vmatpush3.msra.mxu0 %v23_v14  ;;  %261 = vmatpush3.msra.mxu1 %v23_v14 }
  0x20   :  { %217 = vmatprep.subr.mxu0 %v22_v15  ;;  %246 = vmatprep.subr.mxu1 %v22_v15 }
  0x21   :  { %218 = vmatpush3.msra.mxu0 %v22_v15  ;;  %262 = vmatpush3.msra.mxu1 %v22_v15 }
  0x22   :  { %219 = vmatprep.mubr.f32.mxu0 %v14_v16  ;;  %225 = vmatprep.mubr.f32.mxu1 %v18_v17 }
  0x23   :  { %220 = vmatmul.mubr.f32.vlgmr.msra.gmra.mxu0 %v15_v18  ;;  %226 = vmatmul.mubr.f32.vlgmr.msra.gmra.mxu1 %v19_v19 }
  0x24   :  { %222 = vmatprep.mubr.f32.mxu0 %v16_v20  ;;  %228 = vmatprep.mubr.f32.mxu1 %v20_v21 }
  0x27   :  { %223 = vmatmul.mubr.f32.gmra.mxu0 %v17_v22  ;;  %229 = vmatmul.mubr.f32.gmra.mxu1 %v21_v23 }
  0xe3   :  { %v221_v25 = vpop.f32.mrf.mxu0  ;;  %v227_v26 = vpop.f32.mrf.mxu1 }
  0xe4   :  { %v117_v27 = vadd.f32 %v221_v25, %v162_v24  ;;  %v137_v28 = vadd.f32 %v227_v26, %v162_v24 }
  0xe5   :  { %v111_v29 = vpop.f32.mrf.mxu0  ;;  %v131_v30 = vpop.f32.mrf.mxu1 }
  0xe6   :  { %151 = vst [vmem:[%s385_s3 + $0x8] sm:$0xff] %v117_v27  ;;  %155 = vst [vmem:[%s385_s3 + $0x28] sm:$0xff] %v137_v28  ;;  %v112_v31 = vadd.f32 %v162_v24, %v111_v29  ;;  %v132_v32 = vadd.f32 %v162_v24, %v131_v30 }
  0xe7   :  { %v224_v33 = vpop.f32.mrf.mxu0  ;;  %v230_v34 = vpop.f32.mrf.mxu1 }
  0xe8   :  { %150 = vst [vmem:[%s385_s3] sm:$0xff] %v112_v31  ;;  %154 = vst [vmem:[%s385_s3 + $0x20] sm:$0xff] %v132_v32  ;;  %v127_v35 = vadd.f32 %v224_v33, %v162_v24  ;;  %v147_v36 = vadd.f32 %v230_v34, %v162_v24 }
  0xe9   :  { %v121_v37 = vpop.f32.mrf.mxu0  ;;  %v141_v38 = vpop.f32.mrf.mxu1 }
  0xea   :  { %153 = vst [vmem:[%s385_s3 + $0x18] sm:$0xff] %v127_v35  ;;  %157 = vst [vmem:[%s385_s3 + $0x38] sm:$0xff] %v147_v36  ;;  %v122_v39 = vadd.f32 %v162_v24, %v121_v37  ;;  %v142_v40 = vadd.f32 %v162_v24, %v141_v38 }
  0xec   :  { %152 = vst [vmem:[%s385_s3 + $0x10] sm:$0xff] %v122_v39  ;;  %156 = vst [vmem:[%s385_s3 + $0x30] sm:$0xff] %v142_v40 }

// kernel: char_lstm_forward.3
= control target key start
LH: loop header
LB: loop body
LE: loop exit
PB: predicated region body
PF: predicated region fallthrough
CT: control target
= control target key end

     0   :  { %14 = vsyncpa [#allocation4], 0  ;;  %s3465_s0 = inlined_call_operand.vmem [shape: f32[8,8,128], index: 0, kind: input, shape index: {}]   ;;  %s3466_s1 = inlined_call_operand.hbm [shape: f32[128,512], index: 1, kind: input, shape index: {}]   ;;  %s3467_s2 = inlined_call_operand.vmem [shape: f32[1,512], index: 2, kind: input, shape index: {}]   ;;  %s3468_s3 = inlined_call_operand.hbm [shape: f32[128,512], index: 3, kind: input, shape index: {}]   ;;  %s3469_s4 = inlined_call_operand.vmem [shape: f32[8,128], index: 4, kind: input, shape index: {}]   ;;  %s3470_s5 = inlined_call_operand.vmem [shape: f32[8,128], index: 5, kind: input, shape index: {}]   ;;  %s3471_s6 = inlined_call_operand.vmem [shape: f32[8,8,128], index: 6, kind: output, shape index: {0}]   ;;  %s3472_s7 = inlined_call_operand.vmem [shape: f32[8,128], index: 7, kind: output, shape index: {1}]   ;;  %s3473_s8 = inlined_call_operand.vmem [shape: f32[8,128], index: 8, kind: output, shape index: {2}]  }
   0x1   :  { %15 = vsyncpa [#allocation6], 0  ;;  %s2470_s27 = smov [#allocation3]  }
   0x2   :  { %s23_s28 = sshll.u32 %s2470_s27, 4  ;;  %s24_s28 = int_to_ptr.vmem [resolvable:$true] %s23_s28 }
   0x3   :  { %s2434_s29 = scalar_lea.vmem %s24_s28, 8192  ;;  %p2439_p1 = scmp.lt.s32.totalorder %s24_s28, %s24_s28 }
   0x4   :  { %p2435_p0 = scmp.ne.s32.totalorder %s24_s28, %s2434_s29  ;;  %p2440_p2 = scmp.lt.s32.totalorder %s2434_s29, %s2434_s29 }
   0x6   :  { %p2441_p3 = por %p2440_p2, %p2439_p1 }
   0x8   :  { %p2442_p4 = pnand %p2441_p3, %p2435_p0 }
   0xa   :  { %2445 = shalt.err (!%p2442_p4)
}
   0xb   :  { %s2471_s30 = smov 512   ;;  %s2472_s9 = smov 32  }
   0xc   :  { %29 = dma.hbm_to_vmem [thread:$0]  %s3466_s1, 8192, %s24_s28, [#allocation4], %s2471_s30, %s2471_s30, %s2472_s9  }
   0xd   :  { %s2473_s12 = smov [#allocation5]  }
   0xe   :  { %s37_s13 = sshll.u32 %s2473_s12, 4  ;;  %s38_s13 = int_to_ptr.vmem [resolvable:$true] %s37_s13 }
   0xf   :  { %s2454_s14 = scalar_lea.vmem %s38_s13, 8192  ;;  %p2459_p6 = scmp.lt.s32.totalorder %s38_s13, %s38_s13 }
  0x10   :  { %p2455_p5 = scmp.ne.s32.totalorder %s38_s13, %s2454_s14  ;;  %p2460_p7 = scmp.lt.s32.totalorder %s2454_s14, %s2454_s14 }
  0x12   :  { %p2461_p8 = por %p2460_p7, %p2459_p6 }
  0x14   :  { %p2462_p9 = pnand %p2461_p8, %p2455_p5 }
  0x16   :  { %2465 = shalt.err (!%p2462_p9)
}
  0x17   :  { %43 = dma.hbm_to_vmem [thread:$0]  %s3468_s3, 8192, %s38_s13, [#allocation6], %s2471_s30, %s2471_s30, %s2472_s9  }
  0x18   :  { %2466 = dma.done.wait [#allocation4], 8192  }
  0x19   :  { %2467 = vsyncadd [#allocation4], 4294959104 }
  0x1a   :  { %2468 = dma.done.wait [#allocation6], 8192  }
  0x1b   :  { %2469 = vsyncadd [#allocation6], 4294959104  ;;  %v3474_v0 = vmov 0.0   ;;  %v131_v1 = vld [vmem:[#allocation3 + $0x1e8] sm:$0xff]  ;;  %v133_v2 = vld [vmem:[#allocation3 + $0x1f8] sm:$0xff] }
  0x1c   :  { %220 = vmatprep.mubr.f32.mxu0 %v3474_v0  ;;  %333 = vmatprep.mubr.f32.mxu1 %v3474_v0  ;;  %v130_v3 = vld [vmem:[#allocation3 + $0x1e0] sm:$0xff]  ;;  %v132_v4 = vld [vmem:[#allocation3 + $0x1f0] sm:$0xff]  ;;  %v127_v5 = vld [vmem:[#allocation3 + $0x1c8] sm:$0xff] }
  0x1d   :  { %156 = vmatprep.subr.mxu0 %v131_v1  ;;  %269 = vmatprep.subr.mxu1 %v133_v2  ;;  %v129_v6 = vld [vmem:[#allocation3 + $0x1d8] sm:$0xff]  ;;  %v126_v7 = vld [vmem:[#allocation3 + $0x1c0] sm:$0xff]  ;;  %v128_v8 = vld [vmem:[#allocation3 + $0x1d0] sm:$0xff] }
  0x1e   :  { %157 = vmatpush1.msra.mxu0 %v130_v3  ;;  %270 = vmatpush1.msra.mxu1 %v132_v4  ;;  %v123_v9 = vld [vmem:[#allocation3 + $0x1a8] sm:$0xff]  ;;  %v125_v10 = vld [vmem:[#allocation3 + $0x1b8] sm:$0xff]  ;;  %v122_v11 = vld [vmem:[#allocation3 + $0x1a0] sm:$0xff] }
  0x1f   :  { %158 = vmatprep.subr.mxu0 %v127_v5  ;;  %271 = vmatprep.subr.mxu1 %v129_v6  ;;  %v124_v12 = vld [vmem:[#allocation3 + $0x1b0] sm:$0xff]  ;;  %v119_v13 = vld [vmem:[#allocation3 + $0x188] sm:$0xff]  ;;  %v121_v14 = vld [vmem:[#allocation3 + $0x198] sm:$0xff] }
  0x20   :  { %159 = vmatpush1.msra.mxu0 %v126_v7  ;;  %272 = vmatpush1.msra.mxu1 %v128_v8  ;;  %v118_v15 = vld [vmem:[#allocation3 + $0x180] sm:$0xff]  ;;  %v120_v16 = vld [vmem:[#allocation3 + $0x190] sm:$0xff]  ;;  %v115_v17 = vld [vmem:[#allocation3 + $0x168] sm:$0xff] }
  0x21   :  { %160 = vmatprep.subr.mxu0 %v123_v9  ;;  %273 = vmatprep.subr.mxu1 %v125_v10  ;;  %v117_v18 = vld [vmem:[#allocation3 + $0x178] sm:$0xff]  ;;  %v114_v19 = vld [vmem:[#allocation3 + $0x160] sm:$0xff]  ;;  %v116_v20 = vld [vmem:[#allocation3 + $0x170] sm:$0xff] }
  0x22   :  { %161 = vmatpush1.msra.mxu0 %v122_v11  ;;  %274 = vmatpush1.msra.mxu1 %v124_v12  ;;  %v111_v21 = vld [vmem:[#allocation3 + $0x148] sm:$0xff]  ;;  %v113_v22 = vld [vmem:[#allocation3 + $0x158] sm:$0xff]  ;;  %v110_v23 = vld [vmem:[#allocation3 + $0x140] sm:$0xff] }
  0x23   :  { %162 = vmatprep.subr.mxu0 %v119_v13  ;;  %275 = vmatprep.subr.mxu1 %v121_v14  ;;  %v112_v24 = vld [vmem:[#allocation3 + $0x150] sm:$0xff]  ;;  %v107_v25 = vld [vmem:[#allocation3 + $0x128] sm:$0xff]  ;;  %v109_v26 = vld [vmem:[#allocation3 + $0x138] sm:$0xff] }
  0x24   :  { %163 = vmatpush1.msra.mxu0 %v118_v15  ;;  %276 = vmatpush1.msra.mxu1 %v120_v16  ;;  %v106_v27 = vld [vmem:[#allocation3 + $0x120] sm:$0xff]  ;;  %v108_v28 = vld [vmem:[#allocation3 + $0x130] sm:$0xff]  ;;  %v103_v29 = vld [vmem:[#allocation3 + $0x108] sm:$0xff] }
  0x25   :  { %164 = vmatprep.subr.mxu0 %v115_v17  ;;  %277 = vmatprep.subr.mxu1 %v117_v18  ;;  %v105_v30 = vld [vmem:[#allocation3 + $0x118] sm:$0xff]  ;;  %v102_v31 = vld [vmem:[#allocation3 + $0x100] sm:$0xff]  ;;  %v104_v32 = vld [vmem:[#allocation3 + $0x110] sm:$0xff] }
  0x26   :  { %165 = vmatpush1.msra.mxu0 %v114_v19  ;;  %278 = vmatpush1.msra.mxu1 %v116_v20  ;;  %v99_v33 = vld [vmem:[#allocation3 + $0xe8] sm:$0xff]  ;;  %v101_v34 = vld [vmem:[#allocation3 + $0xf8] sm:$0xff]  ;;  %v98_v35 = vld [vmem:[#allocation3 + $0xe0] sm:$0xff] }
  0x27   :  { %166 = vmatprep.subr.mxu0 %v111_v21  ;;  %279 = vmatprep.subr.mxu1 %v113_v22  ;;  %v100_v36 = vld [vmem:[#allocation3 + $0xf0] sm:$0xff]  ;;  %v95_v37 = vld [vmem:[#allocation3 + $0xc8] sm:$0xff]  ;;  %v97_v38 = vld [vmem:[#allocation3 + $0xd8] sm:$0xff] }
  0x28   :  { %167 = vmatpush1.msra.mxu0 %v110_v23  ;;  %280 = vmatpush1.msra.mxu1 %v112_v24  ;;  %v94_v39 = vld [vmem:[#allocation3 + $0xc0] sm:$0xff]  ;;  %v96_v40 = vld [vmem:[#allocation3 + $0xd0] sm:$0xff]  ;;  %v91_v41 = vld [vmem:[#allocation3 + $0xa8] sm:$0xff] }
  0x29   :  { %168 = vmatprep.subr.mxu0 %v107_v25  ;;  %281 = vmatprep.subr.mxu1 %v109_v26  ;;  %v93_v42 = vld [vmem:[#allocation3 + $0xb8] sm:$0xff]  ;;  %v90_v43 = vld [vmem:[#allocation3 + $0xa0] sm:$0xff]  ;;  %v92_v44 = vld [vmem:[#allocation3 + $0xb0] sm:$0xff] }
  0x2a   :  { %169 = vmatpush1.msra.mxu0 %v106_v27  ;;  %282 = vmatpush1.msra.mxu1 %v108_v28  ;;  %v87_v45 = vld [vmem:[#allocation3 + $0x88] sm:$0xff]  ;;  %v89_v46 = vld [vmem:[#allocation3 + $0x98] sm:$0xff]  ;;  %v86_v47 = vld [vmem:[#allocation3 + $0x80] sm:$0xff] }
  0x2b   :  { %170 = vmatprep.subr.mxu0 %v103_v29  ;;  %283 = vmatprep.subr.mxu1 %v105_v30  ;;  %v88_v48 = vld [vmem:[#allocation3 + $0x90] sm:$0xff]  ;;  %v83_v49 = vld [vmem:[#allocation3 + $0x68] sm:$0xff]  ;;  %v85_v50 = vld [vmem:[#allocation3 + $0x78] sm:$0xff] }
  0x2c   :  { %171 = vmatpush1.msra.mxu0 %v102_v31  ;;  %284 = vmatpush1.msra.mxu1 %v104_v32  ;;  %v82_v51 = vld [vmem:[#allocation3 + $0x60] sm:$0xff]  ;;  %v84_v52 = vld [vmem:[#allocation3 + $0x70] sm:$0xff]  ;;  %v79_v53 = vld [vmem:[#allocation3 + $0x48] sm:$0xff] }
  0x2d   :  { %172 = vmatprep.subr.mxu0 %v99_v33  ;;  %285 = vmatprep.subr.mxu1 %v101_v34  ;;  %v81_v54 = vld [vmem:[#allocation3 + $0x58] sm:$0xff]  ;;  %v78_v55 = vld [vmem:[#allocation3 + $0x40] sm:$0xff]  ;;  %v80_v56 = vld [vmem:[#allocation3 + $0x50] sm:$0xff] }
  0x2e   :  { %173 = vmatpush1.msra.mxu0 %v98_v35  ;;  %286 = vmatpush1.msra.mxu1 %v100_v36  ;;  %v75_v57 = vld [vmem:[#allocation3 + $0x28] sm:$0xff]  ;;  %v77_v58 = vld [vmem:[#allocation3 + $0x38] sm:$0xff]  ;;  %v74_v59 = vld [vmem:[#allocation3 + $0x20] sm:$0xff] }
  0x2f   :  { %174 = vmatprep.subr.mxu0 %v95_v37  ;;  %287 = vmatprep.subr.mxu1 %v97_v38  ;;  %v76_v60 = vld [vmem:[#allocation3 + $0x30] sm:$0xff]  ;;  %v71_v61 = vld [vmem:[#allocation3 + $0x8] sm:$0xff]  ;;  %v73_v62 = vld [vmem:[#allocation3 + $0x18] sm:$0xff] }
  0x30   :  { %175 = vmatpush1.msra.mxu0 %v94_v39  ;;  %288 = vmatpush1.msra.mxu1 %v96_v40  ;;  %v70_v63 = vld [vmem:[#allocation3] sm:$0xff]  ;;  %v72_v1 = vld [vmem:[#allocation3 + $0x10] sm:$0xff]  ;;  %v2531_v3 = vld [vmem:[#allocation5 + $0x1e8] sm:$0xff] }
  0x31   :  { %176 = vmatprep.subr.mxu0 %v91_v41  ;;  %289 = vmatprep.subr.mxu1 %v93_v42  ;;  %v62_v2 = vld [vmem:[%s3465_s0] sm:$0xff]  ;;  %v2533_v4 = vld [vmem:[#allocation5 + $0x1f8] sm:$0xff]  ;;  %v2537_v6 = vld [vmem:[#allocation5 + $0x1f0] sm:$0xff] }
  0x32   :  { %177 = vmatpush1.msra.mxu0 %v90_v43  ;;  %290 = vmatpush1.msra.mxu1 %v92_v44  ;;  %v2535_v5 = vld [vmem:[#allocation5 + $0x1e0] sm:$0xff]  ;;  %v2539_v7 = vld [vmem:[#allocation5 + $0x1c8] sm:$0xff]  ;;  %v2541_v8 = vld [vmem:[#allocation5 + $0x1d8] sm:$0xff] }
  0x33   :  { %178 = vmatprep.subr.mxu0 %v87_v45  ;;  %291 = vmatprep.subr.mxu1 %v89_v46  ;;  %v2547_v9 = vld [vmem:[#allocation5 + $0x1c0] sm:$0xff]  ;;  %v2549_v10 = vld [vmem:[#allocation5 + $0x1d0] sm:$0xff]  ;;  %v63_v11 = vld [vmem:[%s3465_s0 + $0x8] sm:$0xff] }
  0x34   :  { %179 = vmatpush1.msra.mxu0 %v86_v47  ;;  %292 = vmatpush1.msra.mxu1 %v88_v48  ;;  %v2558_v12 = vld [vmem:[#allocation5 + $0x1a8] sm:$0xff]  ;;  %v2560_v13 = vld [vmem:[#allocation5 + $0x1b8] sm:$0xff]  ;;  %v2564_v14 = vld [vmem:[#allocation5 + $0x1a0] sm:$0xff] }
  0x35   :  { %180 = vmatprep.subr.mxu0 %v83_v49  ;;  %293 = vmatprep.subr.mxu1 %v85_v50  ;;  %v2566_v15 = vld [vmem:[#allocation5 + $0x1b0] sm:$0xff]  ;;  %v2568_v16 = vld [vmem:[#allocation5 + $0x188] sm:$0xff]  ;;  %v2570_v17 = vld [vmem:[#allocation5 + $0x198] sm:$0xff] }
  0x36   :  { %181 = vmatpush1.msra.mxu0 %v82_v51  ;;  %294 = vmatpush1.msra.mxu1 %v84_v52  ;;  %v2576_v18 = vld [vmem:[#allocation5 + $0x180] sm:$0xff]  ;;  %v2578_v19 = vld [vmem:[#allocation5 + $0x190] sm:$0xff]  ;;  %v2587_v21 = vld [vmem:[#allocation5 + $0x168] sm:$0xff] }
  0x37   :  { %182 = vmatprep.subr.mxu0 %v79_v53  ;;  %295 = vmatprep.subr.mxu1 %v81_v54  ;;  %v64_v20 = vld [vmem:[%s3465_s0 + $0x10] sm:$0xff]  ;;  %v2589_v22 = vld [vmem:[#allocation5 + $0x178] sm:$0xff]  ;;  %v2593_v23 = vld [vmem:[#allocation5 + $0x160] sm:$0xff] }
  0x38   :  { %183 = vmatpush1.msra.mxu0 %v78_v55  ;;  %296 = vmatpush1.msra.mxu1 %v80_v56  ;;  %v2595_v24 = vld [vmem:[#allocation5 + $0x170] sm:$0xff]  ;;  %v2597_v25 = vld [vmem:[#allocation5 + $0x148] sm:$0xff]  ;;  %v2599_v26 = vld [vmem:[#allocation5 + $0x158] sm:$0xff] }
  0x39   :  { %184 = vmatprep.subr.mxu0 %v75_v57  ;;  %297 = vmatprep.subr.mxu1 %v77_v58  ;;  %v2605_v27 = vld [vmem:[#allocation5 + $0x140] sm:$0xff]  ;;  %v2607_v28 = vld [vmem:[#allocation5 + $0x150] sm:$0xff]  ;;  %v65_v29 = vld [vmem:[%s3465_s0 + $0x18] sm:$0xff] }
  0x3a   :  { %185 = vmatpush1.msra.mxu0 %v74_v59  ;;  %298 = vmatpush1.msra.mxu1 %v76_v60  ;;  %v2616_v30 = vld [vmem:[#allocation5 + $0x128] sm:$0xff]  ;;  %v2618_v31 = vld [vmem:[#allocation5 + $0x138] sm:$0xff]  ;;  %v2622_v32 = vld [vmem:[#allocation5 + $0x120] sm:$0xff] }
  0x3b   :  { %186 = vmatprep.subr.mxu0 %v71_v61  ;;  %299 = vmatprep.subr.mxu1 %v73_v62  ;;  %v2624_v33 = vld [vmem:[#allocation5 + $0x130] sm:$0xff]  ;;  %v2626_v34 = vld [vmem:[#allocation5 + $0x108] sm:$0xff]  ;;  %v2628_v35 = vld [vmem:[#allocation5 + $0x118] sm:$0xff] }
  0x3c   :  { %187 = vmatpush1.msra.mxu0 %v70_v63  ;;  %300 = vmatpush1.msra.mxu1 %v72_v1  ;;  %v2634_v36 = vld [vmem:[#allocation5 + $0x100] sm:$0xff]  ;;  %v2636_v37 = vld [vmem:[#allocation5 + $0x110] sm:$0xff]  ;;  %v2645_v39 = vld [vmem:[#allocation5 + $0xe8] sm:$0xff] }
  0x3d   :  { %221 = vmatmul.mubr.f32.vlgmr.msra.gmra.mxu0 %v62_v2  ;;  %334 = vmatmul.mubr.f32.vlgmr.msra.gmra.mxu1 %v62_v2  ;;  %v66_v38 = vld [vmem:[%s3465_s0 + $0x20] sm:$0xff]  ;;  %v2647_v40 = vld [vmem:[#allocation5 + $0xf8] sm:$0xff]  ;;  %v2653_v42 = vld [vmem:[#allocation5 + $0xf0] sm:$0xff] }
  0x3e   :  { %487 = vmatprep.subr.mxu0 %v2531_v3  ;;  %558 = vmatprep.subr.mxu1 %v2533_v4  ;;  %v2651_v41 = vld [vmem:[#allocation5 + $0xe0] sm:$0xff]  ;;  %v2655_v43 = vld [vmem:[#allocation5 + $0xc8] sm:$0xff]  ;;  %v2657_v44 = vld [vmem:[#allocation5 + $0xd8] sm:$0xff] }
  0x3f   :  { %488 = vmatpush1.msra.mxu0 %v2535_v5  ;;  %559 = vmatpush1.msra.mxu1 %v2537_v6  ;;  %v2663_v45 = vld [vmem:[#allocation5 + $0xc0] sm:$0xff]  ;;  %v2665_v46 = vld [vmem:[#allocation5 + $0xd0] sm:$0xff]  ;;  %v67_v47 = vld [vmem:[%s3465_s0 + $0x28] sm:$0xff] }
  0x40   :  { %489 = vmatprep.subr.mxu0 %v2539_v7  ;;  %560 = vmatprep.subr.mxu1 %v2541_v8  ;;  %v2674_v48 = vld [vmem:[#allocation5 + $0xa8] sm:$0xff]  ;;  %v2676_v49 = vld [vmem:[#allocation5 + $0xb8] sm:$0xff]  ;;  %v2680_v50 = vld [vmem:[#allocation5 + $0xa0] sm:$0xff] }
  0x41   :  { %226 = vmatprep.mubr.f32.mxu0 %v3474_v0  ;;  %339 = vmatprep.mubr.f32.mxu1 %v3474_v0  ;;  %v2682_v51 = vld [vmem:[#allocation5 + $0xb0] sm:$0xff]  ;;  %v2684_v52 = vld [vmem:[#allocation5 + $0x88] sm:$0xff]  ;;  %v2686_v53 = vld [vmem:[#allocation5 + $0x98] sm:$0xff] }
  0x42   :  { %490 = vmatpush1.msra.mxu0 %v2547_v9  ;;  %561 = vmatpush1.msra.mxu1 %v2549_v10  ;;  %3545 = vst [vmem:[#allocation9_spill] sm:$0xff] %v2682_v51  ;;  %3546 = vst [vmem:[#allocation10_spill] sm:$0xff] %v2684_v52  ;;  %v2692_v54 = vld [vmem:[#allocation5 + $0x80] sm:$0xff]  ;;  %v2694_v55 = vld [vmem:[#allocation5 + $0x90] sm:$0xff] }
  0x43   :  { %227 = vmatmul.mubr.f32.gmra.mxu0 %v63_v11  ;;  %340 = vmatmul.mubr.f32.gmra.mxu1 %v63_v11  ;;  %3547 = vst [vmem:[#allocation11_spill] sm:$0xff] %v2686_v53  ;;  %3548 = vst [vmem:[#allocation12_spill] sm:$0xff] %v2692_v54  ;;  %v68_v56 = vld [vmem:[%s3465_s0 + $0x30] sm:$0xff]  ;;  %v2703_v57 = vld [vmem:[#allocation5 + $0x68] sm:$0xff] }
  0x44   :  { %491 = vmatprep.subr.mxu0 %v2558_v12  ;;  %562 = vmatprep.subr.mxu1 %v2560_v13  ;;  %3549 = vst [vmem:[#allocation13_spill] sm:$0xff] %v2694_v55  ;;  %3550 = vst [vmem:[#allocation14_spill] sm:$0xff] %v2703_v57  ;;  %v2705_v58 = vld [vmem:[#allocation5 + $0x78] sm:$0xff]  ;;  %v2709_v59 = vld [vmem:[#allocation5 + $0x60] sm:$0xff] }
  0x45   :  { %492 = vmatpush1.msra.mxu0 %v2564_v14  ;;  %563 = vmatpush1.msra.mxu1 %v2566_v15  ;;  %3551 = vst [vmem:[#allocation15_spill] sm:$0xff] %v2705_v58  ;;  %3552 = vst [vmem:[#allocation16_spill] sm:$0xff] %v2709_v59  ;;  %v2711_v60 = vld [vmem:[#allocation5 + $0x70] sm:$0xff]  ;;  %v2713_v61 = vld [vmem:[#allocation5 + $0x48] sm:$0xff] }
  0x46   :  { %493 = vmatprep.subr.mxu0 %v2568_v16  ;;  %564 = vmatprep.subr.mxu1 %v2570_v17  ;;  %3553 = vst [vmem:[#allocation17_spill] sm:$0xff] %v2711_v60  ;;  %3554 = vst [vmem:[#allocation18_spill] sm:$0xff] %v2713_v61  ;;  %v2715_v62 = vld [vmem:[#allocation5 + $0x58] sm:$0xff]  ;;  %v2721_v63 = vld [vmem:[#allocation5 + $0x40] sm:$0xff] }
  0x47   :  { %232 = vmatprep.mubr.f32.mxu0 %v3474_v0  ;;  %345 = vmatprep.mubr.f32.mxu1 %v3474_v0  ;;  %3555 = vst [vmem:[#allocation19_spill] sm:$0xff] %v2715_v62  ;;  %3556 = vst [vmem:[#allocation20_spill] sm:$0xff] %v2721_v63  ;;  %v2723_v1 = vld [vmem:[#allocation5 + $0x50] sm:$0xff]  ;;  %v69_v2 = vld [vmem:[%s3465_s0 + $0x38] sm:$0xff] }
  0x48   :  { %494 = vmatpush1.msra.mxu0 %v2576_v18  ;;  %565 = vmatpush1.msra.mxu1 %v2578_v19  ;;  %3557 = vst [vmem:[#allocation21_spill] sm:$0xff] %v2723_v1  ;;  %v2732_v11 = vld [vmem:[#allocation5 + $0x28] sm:$0xff] }
  0x49   :  { %233 = vmatmul.mubr.f32.gmra.mxu0 %v64_v20  ;;  %346 = vmatmul.mubr.f32.gmra.mxu1 %v64_v20  ;;  %3558 = vst [vmem:[#allocation22_spill] sm:$0xff] %v2732_v11  ;;  %v2734_v20 = vld [vmem:[#allocation5 + $0x38] sm:$0xff] }
  0x4a   :  { %495 = vmatprep.subr.mxu0 %v2587_v21  ;;  %566 = vmatprep.subr.mxu1 %v2589_v22  ;;  %3559 = vst [vmem:[#allocation23_spill] sm:$0xff] %v2734_v20 }
  0x4b   :  { %496 = vmatpush1.msra.mxu0 %v2593_v23  ;;  %567 = vmatpush1.msra.mxu1 %v2595_v24 }
  0x4c   :  { %497 = vmatprep.subr.mxu0 %v2597_v25  ;;  %568 = vmatprep.subr.mxu1 %v2599_v26 }
  0x4d   :  { %238 = vmatprep.mubr.f32.mxu0 %v3474_v0  ;;  %351 = vmatprep.mubr.f32.mxu1 %v3474_v0 }
  0x4e   :  { %498 = vmatpush1.msra.mxu0 %v2605_v27  ;;  %569 = vmatpush1.msra.mxu1 %v2607_v28 }
  0x4f   :  { %239 = vmatmul.mubr.f32.gmra.mxu0 %v65_v29  ;;  %352 = vmatmul.mubr.f32.gmra.mxu1 %v65_v29  ;;  %v2738_v29 = vld [vmem:[#allocation5 + $0x20] sm:$0xff] }
  0x50   :  { %499 = vmatprep.subr.mxu0 %v2616_v30  ;;  %570 = vmatprep.subr.mxu1 %v2618_v31  ;;  %3560 = vst [vmem:[#allocation24_spill] sm:$0xff] %v2738_v29 }
  0x51   :  { %500 = vmatpush1.msra.mxu0 %v2622_v32  ;;  %571 = vmatpush1.msra.mxu1 %v2624_v33 }
  0x52   :  { %501 = vmatprep.subr.mxu0 %v2626_v34  ;;  %572 = vmatprep.subr.mxu1 %v2628_v35 }
  0x53   :  { %244 = vmatprep.mubr.f32.mxu0 %v3474_v0  ;;  %357 = vmatprep.mubr.f32.mxu1 %v3474_v0 }
  0x54   :  { %502 = vmatpush1.msra.mxu0 %v2634_v36  ;;  %573 = vmatpush1.msra.mxu1 %v2636_v37 }
  0x55   :  { %245 = vmatmul.mubr.f32.gmra.mxu0 %v66_v38  ;;  %358 = vmatmul.mubr.f32.gmra.mxu1 %v66_v38  ;;  %v2740_v38 = vld [vmem:[#allocation5 + $0x30] sm:$0xff] }
  0x56   :  { %503 = vmatprep.subr.mxu0 %v2645_v39  ;;  %574 = vmatprep.subr.mxu1 %v2647_v40  ;;  %3561 = vst [vmem:[#allocation25_spill] sm:$0xff] %v2740_v38 }
  0x57   :  { %504 = vmatpush1.msra.mxu0 %v2651_v41  ;;  %575 = vmatpush1.msra.mxu1 %v2653_v42 }
  0x58   :  { %505 = vmatprep.subr.mxu0 %v2655_v43  ;;  %576 = vmatprep.subr.mxu1 %v2657_v44 }
  0x59   :  { %250 = vmatprep.mubr.f32.mxu0 %v3474_v0  ;;  %363 = vmatprep.mubr.f32.mxu1 %v3474_v0 }
  0x5a   :  { %506 = vmatpush1.msra.mxu0 %v2663_v45  ;;  %577 = vmatpush1.msra.mxu1 %v2665_v46 }
  0x5b   :  { %251 = vmatmul.mubr.f32.gmra.mxu0 %v67_v47  ;;  %364 = vmatmul.mubr.f32.gmra.mxu1 %v67_v47  ;;  %v2742_v47 = vld [vmem:[#allocation5 + $0x8] sm:$0xff] }
  0x5c   :  { %507 = vmatprep.subr.mxu0 %v2674_v48  ;;  %578 = vmatprep.subr.mxu1 %v2676_v49  ;;  %3562 = vst [vmem:[#allocation26_spill] sm:$0xff] %v2742_v47 }
  0x5d   :  { %508 = vmatpush1.msra.mxu0 %v2680_v50  ;;  %579 = vmatpush1.msra.mxu1 %v2682_v51 }
  0x5e   :  { %509 = vmatprep.subr.mxu0 %v2684_v52  ;;  %580 = vmatprep.subr.mxu1 %v2686_v53 }
  0x5f   :  { %256 = vmatprep.mubr.f32.mxu0 %v3474_v0  ;;  %369 = vmatprep.mubr.f32.mxu1 %v3474_v0 }
  0x60   :  { %510 = vmatpush1.msra.mxu0 %v2692_v54  ;;  %581 = vmatpush1.msra.mxu1 %v2694_v55 }
  0x61   :  { %257 = vmatmul.mubr.f32.gmra.mxu0 %v68_v56  ;;  %370 = vmatmul.mubr.f32.gmra.mxu1 %v68_v56  ;;  %v2744_v56 = vld [vmem:[#allocation5 + $0x18] sm:$0xff] }
  0x62   :  { %511 = vmatprep.subr.mxu0 %v2703_v57  ;;  %582 = vmatprep.subr.mxu1 %v2705_v58  ;;  %3563 = vst [vmem:[#allocation27_spill] sm:$0xff] %v2744_v56 }
  0x63   :  { %512 = vmatpush1.msra.mxu0 %v2709_v59  ;;  %583 = vmatpush1.msra.mxu1 %v2711_v60 }
  0x64   :  { %513 = vmatprep.subr.mxu0 %v2713_v61  ;;  %584 = vmatprep.subr.mxu1 %v2715_v62 }
  0x65   :  { %262 = vmatprep.mubr.f32.mxu0 %v3474_v0  ;;  %375 = vmatprep.mubr.f32.mxu1 %v3474_v0  ;;  %v2748_v0 = vld [vmem:[#allocation5] sm:$0xff] }
  0x66   :  { %514 = vmatpush1.msra.mxu0 %v2721_v63  ;;  %585 = vmatpush1.msra.mxu1 %v2723_v1  ;;  %3564 = vst [vmem:[#allocation28_spill] sm:$0xff] %v2748_v0  ;;  %v2752_v1 = vld [vmem:[#allocation5 + $0x10] sm:$0xff] }
  0x67   :  { %263 = vmatmul.mubr.f32.gmra.mxu0 %v69_v2  ;;  %376 = vmatmul.mubr.f32.gmra.mxu1 %v69_v2  ;;  %3565 = vst [vmem:[#allocation29_spill] sm:$0xff] %v2752_v1  ;;  %v58_v2 = vld [vmem:[%s3469_s4] sm:$0xff] }
  0x68   :  { %515 = vmatprep.subr.mxu0 %v2732_v11  ;;  %586 = vmatprep.subr.mxu1 %v2734_v20  ;;  %v3566_v11 = vmov 0.0  }
  0x69   :  { %516 = vmatpush1.msra.mxu0 %v2738_v29  ;;  %587 = vmatpush1.msra.mxu1 %v2740_v38 }
  0x6a   :  { %517 = vmatprep.subr.mxu0 %v2742_v47  ;;  %588 = vmatprep.subr.mxu1 %v2744_v56 }
  0x6b   :  { %518 = vmatpush1.msra.mxu0 %v2748_v0  ;;  %551 = vmatprep.mubr.f32.mxu0 %v3566_v11 }
  0x6c   :  { %589 = vmatpush1.msra.mxu1 %v2752_v1  ;;  %622 = vmatprep.mubr.f32.mxu1 %v3566_v11 }
  0x6d   :  { %552 = vmatmul.mubr.f32.vlgmr.msra.gmra.mxu0 %v58_v2  ;;  %623 = vmatmul.mubr.f32.vlgmr.msra.gmra.mxu1 %v58_v2  ;;  %v3567_v2 = vld [vmem:[#allocation21_spill] sm:$0xff] }
  0x6e   :  { %723 = vmatprep.subr.mxu0 %v2531_v3  ;;  %794 = vmatprep.subr.mxu1 %v2533_v4 }
  0x6f   :  { %724 = vmatpush1.msra.mxu0 %v2535_v5  ;;  %795 = vmatpush1.msra.mxu1 %v2537_v6 }
  0x70   :  { %725 = vmatprep.subr.mxu0 %v2539_v7  ;;  %796 = vmatprep.subr.mxu1 %v2541_v8 }
  0x71   :  { %726 = vmatpush1.msra.mxu0 %v2547_v9  ;;  %797 = vmatpush1.msra.mxu1 %v2549_v10 }
  0x72   :  { %727 = vmatprep.subr.mxu0 %v2558_v12  ;;  %798 = vmatprep.subr.mxu1 %v2560_v13 }
  0x73   :  { %728 = vmatpush1.msra.mxu0 %v2564_v14  ;;  %799 = vmatpush1.msra.mxu1 %v2566_v15 }
  0x74   :  { %729 = vmatprep.subr.mxu0 %v2568_v16  ;;  %800 = vmatprep.subr.mxu1 %v2570_v17 }
  0x75   :  { %730 = vmatpush1.msra.mxu0 %v2576_v18  ;;  %801 = vmatpush1.msra.mxu1 %v2578_v19 }
  0x76   :  { %731 = vmatprep.subr.mxu0 %v2587_v21  ;;  %802 = vmatprep.subr.mxu1 %v2589_v22 }
  0x77   :  { %732 = vmatpush1.msra.mxu0 %v2593_v23  ;;  %803 = vmatpush1.msra.mxu1 %v2595_v24 }
  0x78   :  { %733 = vmatprep.subr.mxu0 %v2597_v25  ;;  %804 = vmatprep.subr.mxu1 %v2599_v26 }
  0x79   :  { %734 = vmatpush1.msra.mxu0 %v2605_v27  ;;  %805 = vmatpush1.msra.mxu1 %v2607_v28 }
  0x7a   :  { %735 = vmatprep.subr.mxu0 %v2616_v30  ;;  %806 = vmatprep.subr.mxu1 %v2618_v31 }
  0x7b   :  { %736 = vmatpush1.msra.mxu0 %v2622_v32  ;;  %807 = vmatpush1.msra.mxu1 %v2624_v33 }
  0x7c   :  { %737 = vmatprep.subr.mxu0 %v2626_v34  ;;  %808 = vmatprep.subr.mxu1 %v2628_v35 }
  0x7d   :  { %738 = vmatpush1.msra.mxu0 %v2634_v36  ;;  %809 = vmatpush1.msra.mxu1 %v2636_v37 }
  0x7e   :  { %739 = vmatprep.subr.mxu0 %v2645_v39  ;;  %810 = vmatprep.subr.mxu1 %v2647_v40 }
  0x7f   :  { %740 = vmatpush1.msra.mxu0 %v2651_v41  ;;  %811 = vmatpush1.msra.mxu1 %v2653_v42 }
  0x80   :  { %741 = vmatprep.subr.mxu0 %v2655_v43  ;;  %812 = vmatprep.subr.mxu1 %v2657_v44 }
  0x81   :  { %742 = vmatpush1.msra.mxu0 %v2663_v45  ;;  %813 = vmatpush1.msra.mxu1 %v2665_v46 }
  0x82   :  { %743 = vmatprep.subr.mxu0 %v2674_v48  ;;  %814 = vmatprep.subr.mxu1 %v2676_v49 }
  0x83   :  { %744 = vmatpush1.msra.mxu0 %v2680_v50  ;;  %815 = vmatpush1.msra.mxu1 %v2682_v51 }
  0x84   :  { %745 = vmatprep.subr.mxu0 %v2684_v52  ;;  %816 = vmatprep.subr.mxu1 %v2686_v53  ;;  %v3568_v53 = vld [vmem:[#allocation22_spill] sm:$0xff] }
  0x85   :  { %746 = vmatpush1.msra.mxu0 %v2692_v54  ;;  %817 = vmatpush1.msra.mxu1 %v2694_v55 }
  0x86   :  { %747 = vmatprep.subr.mxu0 %v2703_v57  ;;  %818 = vmatprep.subr.mxu1 %v2705_v58 }
  0x87   :  { %748 = vmatpush1.msra.mxu0 %v2709_v59  ;;  %819 = vmatpush1.msra.mxu1 %v2711_v60 }
  0x88   :  { %749 = vmatprep.subr.mxu0 %v2713_v61  ;;  %820 = vmatprep.subr.mxu1 %v2715_v62 }
  0x89   :  { %750 = vmatpush1.msra.mxu0 %v2721_v63  ;;  %821 = vmatpush1.msra.mxu1 %v3567_v2 }
  0x8a   :  { %751 = vmatprep.subr.mxu0 %v3568_v53  ;;  %822 = vmatprep.subr.mxu1 %v2734_v20  ;;  %v136_v20 = vlaneseq }
  0x8b   :  { %752 = vmatpush1.msra.mxu0 %v2738_v29  ;;  %823 = vmatpush1.msra.mxu1 %v2740_v38 }
  0x8c   :  { %753 = vmatprep.subr.mxu0 %v2742_v47  ;;  %824 = vmatprep.subr.mxu1 %v2744_v56  ;;  %v137_v29 = vshrl.u32 %v136_v20, 7 }
  0x8d   :  { %754 = vmatpush1.msra.mxu0 %v2748_v0  ;;  %787 = vmatprep.mubr.f32.mxu0 %v3566_v11  ;;  %v134_v0 = vld [vmem:[%s3467_s2] sm:$0xf] }
  0x8e   :  { %825 = vmatpush1.msra.mxu1 %v2752_v1  ;;  %858 = vmatprep.mubr.f32.mxu1 %v3566_v11  ;;  %v138_v47 = vsub.s32 0, %v137_v29  ;;  %v146_v56 = vsub.s32 2, %v137_v29  ;;  %v142_v11 = vsub.s32 1, %v137_v29 }
  0x8f   :  { %960 = vmatprep.subr.mxu0 %v2531_v3  ;;  %1031 = vmatprep.subr.mxu1 %v2533_v4  ;;  %v150_v3 = vsub.s32 3, %v137_v29 }
  0x90   :  { %v139_v63 = vrot.slane %v134_v0, %v138_v47  ;;  %v2842_v4 = vrot.slane %v134_v0, %v146_v56  ;;  %v143_v61 = vrot.slane %v134_v0, %v142_v11 }
  0x91   :  { %v2844_v60 = vrot.slane %v134_v0, %v150_v3 }
  0xfd   :  { %v2831_v53 = vpop.f32.mrf.mxu0  ;;  %v2833_v38 = vpop.f32.mrf.mxu1 }
  0xff   :  { %v2838_v2 = vpop.f32.mrf.mxu0  ;;  %v2840_v1 = vpop.f32.mrf.mxu1 }
 0x103   :  { %v228_v20 = vpop.f32.mrf.mxu0  ;;  %v341_v62 = vpop.f32.mrf.mxu1 }
 0x104   :  { %v2846_v59 = vadd.f32 %v228_v20, %v139_v63  ;;  %v2849_v58 = vadd.f32 %v341_v62, %v2842_v4 }
 0x105   :  { %v230_v57 = vpop.f32.mrf.mxu0  ;;  %v343_v55 = vpop.f32.mrf.mxu1 }
 0x106   :  { %3569 = vst [vmem:[#allocation30_spill] sm:$0xff] %v2846_v59  ;;  %3570 = vst [vmem:[#allocation31_spill] sm:$0xff] %v2849_v58  ;;  %v2851_v54 = vadd.f32 %v230_v57, %v143_v61  ;;  %v2854_v52 = vadd.f32 %v343_v55, %v2844_v60 }
 0x108   :  { %3571 = vst [vmem:[#allocation32_spill] sm:$0xff] %v2851_v54  ;;  %3572 = vst [vmem:[#allocation33_spill] sm:$0xff] %v2854_v52 }
 0x109   :  { %v234_v29 = vpop.f32.mrf.mxu0  ;;  %v347_v47 = vpop.f32.mrf.mxu1 }
 0x10a   :  { %v2856_v56 = vadd.f32 %v234_v29, %v139_v63  ;;  %v2859_v11 = vadd.f32 %v347_v47, %v2842_v4 }
 0x10b   :  { %v236_v0 = vpop.f32.mrf.mxu0  ;;  %v349_v3 = vpop.f32.mrf.mxu1 }
 0x10c   :  { %3573 = vst [vmem:[#allocation34_spill] sm:$0xff] %v2856_v56  ;;  %3574 = vst [vmem:[#allocation35_spill] sm:$0xff] %v2859_v11  ;;  %v2861_v20 = vadd.f32 %v236_v0, %v143_v61  ;;  %v2864_v62 = vadd.f32 %v349_v3, %v2844_v60 }
 0x10e   :  { %3575 = vst [vmem:[#allocation36_spill] sm:$0xff] %v2861_v20  ;;  %3576 = vst [vmem:[#allocation37_spill] sm:$0xff] %v2864_v62 }
 0x10f   :  { %v240_v58 = vpop.f32.mrf.mxu0  ;;  %v353_v57 = vpop.f32.mrf.mxu1 }
 0x110   :  { %v2866_v54 = vadd.f32 %v240_v58, %v139_v63  ;;  %v2869_v55 = vadd.f32 %v353_v57, %v2842_v4 }
 0x111   :  { %v242_v52 = vpop.f32.mrf.mxu0  ;;  %v355_v29 = vpop.f32.mrf.mxu1 }
 0x112   :  { %3577 = vst [vmem:[#allocation38_spill] sm:$0xff] %v2866_v54  ;;  %3578 = vst [vmem:[#allocation39_spill] sm:$0xff] %v2869_v55  ;;  %v2871_v56 = vadd.f32 %v242_v52, %v143_v61  ;;  %v2874_v47 = vadd.f32 %v355_v29, %v2844_v60 }
 0x114   :  { %3579 = vst [vmem:[#allocation40_spill] sm:$0xff] %v2871_v56  ;;  %3580 = vst [vmem:[#allocation41_spill] sm:$0xff] %v2874_v47 }
 0x115   :  { %v246_v11 = vpop.f32.mrf.mxu0  ;;  %v359_v0 = vpop.f32.mrf.mxu1 }
 0x116   :  { %v2876_v20 = vadd.f32 %v246_v11, %v139_v63  ;;  %v2879_v3 = vadd.f32 %v359_v0, %v2842_v4 }
 0x117   :  { %v248_v62 = vpop.f32.mrf.mxu0  ;;  %v361_v58 = vpop.f32.mrf.mxu1 }
 0x118   :  { %3581 = vst [vmem:[#allocation42_spill] sm:$0xff] %v2876_v20  ;;  %3582 = vst [vmem:[#allocation43_spill] sm:$0xff] %v2879_v3  ;;  %v2881_v54 = vadd.f32 %v248_v62, %v143_v61  ;;  %v2884_v57 = vadd.f32 %v361_v58, %v2844_v60 }
 0x11a   :  { %3583 = vst [vmem:[#allocation44_spill] sm:$0xff] %v2881_v54  ;;  %3584 = vst [vmem:[#allocation45_spill] sm:$0xff] %v2884_v57 }
 0x11b   :  { %v252_v55 = vpop.f32.mrf.mxu0  ;;  %v365_v52 = vpop.f32.mrf.mxu1 }
 0x11c   :  { %v2886_v56 = vadd.f32 %v252_v55, %v139_v63  ;;  %v2889_v29 = vadd.f32 %v365_v52, %v2842_v4 }
 0x11d   :  { %v254_v47 = vpop.f32.mrf.mxu0  ;;  %v367_v11 = vpop.f32.mrf.mxu1 }
 0x11e   :  { %3585 = vst [vmem:[#allocation46_spill] sm:$0xff] %v2886_v56  ;;  %3586 = vst [vmem:[#allocation47_spill] sm:$0xff] %v2889_v29  ;;  %v2891_v20 = vadd.f32 %v254_v47, %v143_v61  ;;  %v2894_v0 = vadd.f32 %v367_v11, %v2844_v60 }
 0x120   :  { %3587 = vst [vmem:[#allocation48_spill] sm:$0xff] %v2891_v20  ;;  %3588 = vst [vmem:[#allocation49_spill] sm:$0xff] %v2894_v0 }
 0x121   :  { %v258_v3 = vpop.f32.mrf.mxu0  ;;  %v371_v62 = vpop.f32.mrf.mxu1 }
 0x122   :  { %v2896_v54 = vadd.f32 %v258_v3, %v139_v63  ;;  %v2899_v58 = vadd.f32 %v371_v62, %v2842_v4 }
 0x123   :  { %v260_v57 = vpop.f32.mrf.mxu0  ;;  %v373_v55 = vpop.f32.mrf.mxu1 }
 0x124   :  { %3589 = vst [vmem:[#allocation50_spill] sm:$0xff] %v2896_v54  ;;  %3590 = vst [vmem:[#allocation51_spill] sm:$0xff] %v2899_v58  ;;  %v2901_v56 = vadd.f32 %v260_v57, %v143_v61  ;;  %v2904_v52 = vadd.f32 %v373_v55, %v2844_v60  ;;  %v223_v57 = vadd.f32 %v2831_v53, %v139_v63 }
 0x125   :  { %v225_v55 = vadd.f32 %v2838_v2, %v143_v61 }
 0x126   :  { %3591 = vst [vmem:[#allocation52_spill] sm:$0xff] %v2901_v56  ;;  %3592 = vst [vmem:[#allocation53_spill] sm:$0xff] %v2904_v52 }
 0x127   :  { %v264_v29 = vpop.f32.mrf.mxu0  ;;  %v377_v47 = vpop.f32.mrf.mxu1 }
 0x128   :  { %v2906_v20 = vadd.f32 %v264_v29, %v139_v63  ;;  %v2909_v11 = vadd.f32 %v377_v47, %v2842_v4  ;;  %v338_v47 = vadd.f32 %v2840_v1, %v2844_v60 }
 0x129   :  { %v266_v0 = vpop.f32.mrf.mxu0  ;;  %v379_v3 = vpop.f32.mrf.mxu1 }
 0x12a   :  { %3593 = vst [vmem:[#allocation54_spill] sm:$0xff] %v2906_v20  ;;  %3594 = vst [vmem:[#allocation55_spill] sm:$0xff] %v2909_v11  ;;  %v2911_v54 = vadd.f32 %v266_v0, %v143_v61  ;;  %v2914_v62 = vadd.f32 %v379_v3, %v2844_v60  ;;  %v336_v3 = vadd.f32 %v2833_v38, %v2842_v4  ;;  %v60_v60 = vld [vmem:[%s3470_s5] sm:$0xff] }
 0x12c   :  { %3595 = vst [vmem:[#allocation56_spill] sm:$0xff] %v2911_v54  ;;  %3596 = vst [vmem:[#allocation57_spill] sm:$0xff] %v2914_v62  ;;  %v3186_v54 = vld [vmem:[#allocation5 + $0x18] sm:$0xff] }
 0x12d   :  { %v553_v58 = vpop.f32.mrf.mxu0  ;;  %v624_v56 = vpop.f32.mrf.mxu1 }
 0x12e   :  { %v629_v52 = vadd.f32 %v553_v58, %v223_v57  ;;  %v631_v53 = vadd.f32 %v624_v56, %v336_v3 }
 0x12f   :  { %v555_v59 = vpop.f32.mrf.mxu0  ;;  %v626_v51 = vpop.f32.mrf.mxu1 }
 0x130   :  { %v633_v29 = vmul.f32 0.5, %v629_v52  ;;  %v630_v20 = vadd.f32 %v555_v59, %v225_v55  ;;  %v632_v11 = vadd.f32 %v626_v51, %v338_v47  ;;  %v635_v63 = vmul.f32 0.5, %v631_v53 }
 0x132   :  { %2346 = vtanh.f32 %v633_v29  ;;  %v634_v0 = vmul.f32 0.5, %v630_v20 }
 0x134   :  { %2348 = vtanh.f32 %v634_v0 }
 0x135   :  { %2350 = vtanh.f32 %v632_v11 }
 0x136   :  { %2352 = vtanh.f32 %v635_v63 }
 0x13f   :  { %v2347_v62 = vpop.eup %2346 }
 0x140   :  { %v639_v61 = vmul.f32 0.5, %v2347_v62 }
 0x141   :  { %v2349_v2 = vpop.eup %2348 }
 0x142   :  { %v642_v58 = vadd.f32 0.5, %v639_v61  ;;  %v640_v59 = vmul.f32 0.5, %v2349_v2  ;;  %v2351_v20 = vpop.eup %2350 }
 0x143   :  { %v2353_v38 = vpop.eup %2352 }
 0x144   :  { %v643_v1 = vadd.f32 0.5, %v640_v59  ;;  %v647_v51 = vmul.f32 %v2351_v20, %v642_v58  ;;  %v641_v4 = vmul.f32 0.5, %v2353_v38  ;;  %v3014_v20 = vld [vmem:[#allocation5 + $0x1e0] sm:$0xff] }
 0x145   :  { %v3026_v38 = vld [vmem:[#allocation5 + $0x1c0] sm:$0xff] }
 0x146   :  { %v646_v52 = vmul.f32 %v643_v1, %v60_v60  ;;  %v644_v56 = vadd.f32 0.5, %v641_v4  ;;  %v3008_v60 = vld [vmem:[#allocation5 + $0x1e8] sm:$0xff]  ;;  %v3010_v1 = vld [vmem:[#allocation5 + $0x1f8] sm:$0xff]  ;;  %v3028_v4 = vld [vmem:[#allocation5 + $0x1d0] sm:$0xff] }
 0x148   :  { %v2925_v57 = vadd.f32 %v647_v51, %v646_v52  ;;  %v3016_v52 = vld [vmem:[#allocation5 + $0x1f0] sm:$0xff]  ;;  %v3020_v51 = vld [vmem:[#allocation5 + $0x1c8] sm:$0xff] }
 0x14a   :  { %2354 = vtanh.f32 %v2925_v57 }
 0x157   :  { %v2355_v11 = vpop.eup %2354 }
 0x158   :  { %v650_v62 = vmul.f32 %v2355_v11, %v644_v56  ;;  %v3032_v56 = vld [vmem:[#allocation5 + $0x1a8] sm:$0xff]  ;;  %v3034_v11 = vld [vmem:[#allocation5 + $0x1b8] sm:$0xff] }
 0x15a   :  { %651 = vst [vmem:[%s3471_s6] sm:$0xff] %v650_v62  ;;  %788 = vmatmul.mubr.f32.vlgmr.msra.gmra.mxu0 %v650_v62  ;;  %859 = vmatmul.mubr.f32.vlgmr.msra.gmra.mxu1 %v650_v62  ;;  %v3038_v62 = vld [vmem:[#allocation5 + $0x1a0] sm:$0xff] }
 0x15b   :  { %961 = vmatpush1.msra.mxu0 %v2535_v5  ;;  %1032 = vmatpush1.msra.mxu1 %v2537_v6  ;;  %v3597_v5 = vld [vmem:[#allocation9_spill] sm:$0xff]  ;;  %v3598_v6 = vld [vmem:[#allocation10_spill] sm:$0xff] }
 0x15c   :  { %962 = vmatprep.subr.mxu0 %v2539_v7  ;;  %1033 = vmatprep.subr.mxu1 %v2541_v8  ;;  %v3599_v7 = vld [vmem:[#allocation11_spill] sm:$0xff]  ;;  %v3600_v8 = vld [vmem:[#allocation12_spill] sm:$0xff]  ;;  %3623 = vst [vmem:[#allocation9_spill] sm:$0xff] %v3008_v60  ;;  %3624 = vst [vmem:[#allocation10_spill] sm:$0xff] %v3010_v1 }
 0x15d   :  { %963 = vmatpush1.msra.mxu0 %v2547_v9  ;;  %1034 = vmatpush1.msra.mxu1 %v2549_v10  ;;  %v3601_v9 = vld [vmem:[#allocation13_spill] sm:$0xff]  ;;  %v3602_v10 = vld [vmem:[#allocation14_spill] sm:$0xff] }
 0x15e   :  { %964 = vmatprep.subr.mxu0 %v2558_v12  ;;  %1035 = vmatprep.subr.mxu1 %v2560_v13  ;;  %v3603_v12 = vld [vmem:[#allocation15_spill] sm:$0xff]  ;;  %v3604_v13 = vld [vmem:[#allocation16_spill] sm:$0xff] }
 0x15f   :  { %965 = vmatpush1.msra.mxu0 %v2564_v14  ;;  %1036 = vmatpush1.msra.mxu1 %v2566_v15  ;;  %v3605_v14 = vld [vmem:[#allocation17_spill] sm:$0xff]  ;;  %v3606_v15 = vld [vmem:[#allocation18_spill] sm:$0xff] }
 0x160   :  { %966 = vmatprep.subr.mxu0 %v2568_v16  ;;  %1037 = vmatprep.subr.mxu1 %v2570_v17  ;;  %v3607_v16 = vld [vmem:[#allocation19_spill] sm:$0xff]  ;;  %v3608_v17 = vld [vmem:[#allocation20_spill] sm:$0xff] }
 0x161   :  { %967 = vmatpush1.msra.mxu0 %v2576_v18  ;;  %1038 = vmatpush1.msra.mxu1 %v2578_v19  ;;  %v3609_v18 = vld [vmem:[#allocation21_spill] sm:$0xff]  ;;  %v3610_v19 = vld [vmem:[#allocation22_spill] sm:$0xff] }
 0x162   :  { %968 = vmatprep.subr.mxu0 %v2587_v21  ;;  %1039 = vmatprep.subr.mxu1 %v2589_v22  ;;  %v3611_v21 = vld [vmem:[#allocation23_spill] sm:$0xff]  ;;  %v3612_v22 = vld [vmem:[#allocation24_spill] sm:$0xff] }
 0x163   :  { %969 = vmatpush1.msra.mxu0 %v2593_v23  ;;  %1040 = vmatpush1.msra.mxu1 %v2595_v24  ;;  %v3613_v23 = vld [vmem:[#allocation25_spill] sm:$0xff]  ;;  %v3614_v24 = vld [vmem:[#allocation26_spill] sm:$0xff] }
 0x164   :  { %970 = vmatprep.subr.mxu0 %v2597_v25  ;;  %1041 = vmatprep.subr.mxu1 %v2599_v26  ;;  %v3615_v25 = vld [vmem:[#allocation27_spill] sm:$0xff]  ;;  %v3616_v26 = vld [vmem:[#allocation28_spill] sm:$0xff] }
 0x165   :  { %971 = vmatpush1.msra.mxu0 %v2605_v27  ;;  %1042 = vmatpush1.msra.mxu1 %v2607_v28  ;;  %v3617_v27 = vmov 0.0   ;;  %v3618_v28 = vld [vmem:[#allocation29_spill] sm:$0xff]  ;;  %3641 = vst [vmem:[#allocation27_spill] sm:$0xff] %v3186_v54 }
 0x166   :  { %972 = vmatprep.subr.mxu0 %v2616_v30  ;;  %1043 = vmatprep.subr.mxu1 %v2618_v31 }
 0x167   :  { %973 = vmatpush1.msra.mxu0 %v2622_v32  ;;  %1044 = vmatpush1.msra.mxu1 %v2624_v33  ;;  %v3619_v32 = vld [vmem:[#allocation30_spill] sm:$0xff] }
 0x168   :  { %974 = vmatprep.subr.mxu0 %v2626_v34  ;;  %1045 = vmatprep.subr.mxu1 %v2628_v35 }
 0x169   :  { %975 = vmatpush1.msra.mxu0 %v2634_v36  ;;  %1046 = vmatpush1.msra.mxu1 %v2636_v37  ;;  %v3620_v37 = vld [vmem:[#allocation32_spill] sm:$0xff] }
 0x16a   :  { %976 = vmatprep.subr.mxu0 %v2645_v39  ;;  %1047 = vmatprep.subr.mxu1 %v2647_v40 }
 0x16b   :  { %977 = vmatpush1.msra.mxu0 %v2651_v41  ;;  %1048 = vmatpush1.msra.mxu1 %v2653_v42  ;;  %v3621_v41 = vld [vmem:[#allocation33_spill] sm:$0xff] }
 0x16c   :  { %978 = vmatprep.subr.mxu0 %v2655_v43  ;;  %1049 = vmatprep.subr.mxu1 %v2657_v44  ;;  %v3622_v43 = vld [vmem:[#allocation31_spill] sm:$0xff] }
 0x16d   :  { %979 = vmatpush1.msra.mxu0 %v2663_v45  ;;  %1050 = vmatpush1.msra.mxu1 %v2665_v46 }
 0x16e   :  { %980 = vmatprep.subr.mxu0 %v2674_v48  ;;  %1051 = vmatprep.subr.mxu1 %v2676_v49 }
 0x16f   :  { %981 = vmatpush1.msra.mxu0 %v2680_v50  ;;  %1052 = vmatpush1.msra.mxu1 %v3597_v5  ;;  %v3040_v5 = vld [vmem:[#allocation5 + $0x1b0] sm:$0xff] }
 0x170   :  { %982 = vmatprep.subr.mxu0 %v3598_v6  ;;  %1053 = vmatprep.subr.mxu1 %v3599_v7  ;;  %v3044_v6 = vld [vmem:[#allocation5 + $0x188] sm:$0xff]  ;;  %v3046_v7 = vld [vmem:[#allocation5 + $0x198] sm:$0xff] }
 0x171   :  { %983 = vmatpush1.msra.mxu0 %v3600_v8  ;;  %1054 = vmatpush1.msra.mxu1 %v3601_v9  ;;  %v3050_v8 = vld [vmem:[#allocation5 + $0x180] sm:$0xff]  ;;  %v3052_v9 = vld [vmem:[#allocation5 + $0x190] sm:$0xff] }
 0x172   :  { %984 = vmatprep.subr.mxu0 %v3602_v10  ;;  %1055 = vmatprep.subr.mxu1 %v3603_v12  ;;  %v3056_v10 = vld [vmem:[#allocation5 + $0x168] sm:$0xff]  ;;  %v3058_v12 = vld [vmem:[#allocation5 + $0x178] sm:$0xff] }
 0x173   :  { %985 = vmatpush1.msra.mxu0 %v3604_v13  ;;  %1056 = vmatpush1.msra.mxu1 %v3605_v14  ;;  %v3062_v13 = vld [vmem:[#allocation5 + $0x160] sm:$0xff]  ;;  %v3064_v14 = vld [vmem:[#allocation5 + $0x170] sm:$0xff] }
 0x174   :  { %986 = vmatprep.subr.mxu0 %v3606_v15  ;;  %1057 = vmatprep.subr.mxu1 %v3607_v16  ;;  %v3068_v15 = vld [vmem:[#allocation5 + $0x148] sm:$0xff]  ;;  %v3070_v16 = vld [vmem:[#allocation5 + $0x158] sm:$0xff] }
 0x175   :  { %987 = vmatpush1.msra.mxu0 %v3608_v17  ;;  %1058 = vmatpush1.msra.mxu1 %v3609_v18  ;;  %v3074_v17 = vld [vmem:[#allocation5 + $0x140] sm:$0xff]  ;;  %v3076_v18 = vld [vmem:[#allocation5 + $0x150] sm:$0xff] }
 0x176   :  { %988 = vmatprep.subr.mxu0 %v3610_v19  ;;  %1059 = vmatprep.subr.mxu1 %v3611_v21  ;;  %v3080_v19 = vld [vmem:[#allocation5 + $0x128] sm:$0xff]  ;;  %v3082_v21 = vld [vmem:[#allocation5 + $0x138] sm:$0xff] }
 0x177   :  { %989 = vmatpush1.msra.mxu0 %v3612_v22  ;;  %1060 = vmatpush1.msra.mxu1 %v3613_v23  ;;  %v3086_v22 = vld [vmem:[#allocation5 + $0x120] sm:$0xff]  ;;  %v3088_v23 = vld [vmem:[#allocation5 + $0x130] sm:$0xff] }
 0x178   :  { %990 = vmatprep.subr.mxu0 %v3614_v24  ;;  %1061 = vmatprep.subr.mxu1 %v3615_v25  ;;  %v3092_v24 = vld [vmem:[#allocation5 + $0x108] sm:$0xff]  ;;  %v3094_v25 = vld [vmem:[#allocation5 + $0x118] sm:$0xff] }
 0x179   :  { %991 = vmatpush1.msra.mxu0 %v3616_v26  ;;  %1024 = vmatprep.mubr.f32.mxu0 %v3617_v27  ;;  %v3096_v26 = vld [vmem:[#allocation5 + $0x100] sm:$0xff] }
 0x17a   :  { %1062 = vmatpush1.msra.mxu1 %v3618_v28  ;;  %1095 = vmatprep.mubr.f32.mxu1 %v3617_v27  ;;  %v3100_v28 = vld [vmem:[#allocation5 + $0x110] sm:$0xff] }
 0x17b   :  { %1197 = vmatprep.subr.mxu0 %v3008_v60  ;;  %1268 = vmatprep.subr.mxu1 %v3010_v1 }
 0x21a   :  { %v789_v30 = vpop.f32.mrf.mxu0  ;;  %v860_v31 = vpop.f32.mrf.mxu1 }
 0x21b   :  { %v865_v33 = vadd.f32 %v789_v30, %v3619_v32  ;;  %v867_v44 = vadd.f32 %v860_v31, %v3622_v43  ;;  %v3102_v30 = vld [vmem:[#allocation5 + $0xe8] sm:$0xff]  ;;  %v3104_v31 = vld [vmem:[#allocation5 + $0xf8] sm:$0xff]  ;;  %v3108_v32 = vld [vmem:[#allocation5 + $0xe0] sm:$0xff] }
 0x21c   :  { %v791_v34 = vpop.f32.mrf.mxu0  ;;  %v862_v35 = vpop.f32.mrf.mxu1  ;;  %v3136_v43 = vld [vmem:[#allocation5 + $0x88] sm:$0xff] }
 0x21d   :  { %v869_v36 = vmul.f32 0.5, %v865_v33  ;;  %v866_v39 = vadd.f32 %v791_v34, %v3620_v37  ;;  %v868_v42 = vadd.f32 %v862_v35, %v3621_v41  ;;  %v871_v45 = vmul.f32 0.5, %v867_v44  ;;  %v3110_v33 = vld [vmem:[#allocation5 + $0xf0] sm:$0xff]  ;;  %v3112_v34 = vld [vmem:[#allocation5 + $0xc8] sm:$0xff]  ;;  %v3116_v35 = vld [vmem:[#allocation5 + $0xd8] sm:$0xff] }
 0x21e   :  { %v3120_v37 = vld [vmem:[#allocation5 + $0xd0] sm:$0xff]  ;;  %v3130_v41 = vld [vmem:[#allocation5 + $0xa0] sm:$0xff]  ;;  %v3138_v44 = vld [vmem:[#allocation5 + $0x98] sm:$0xff] }
 0x21f   :  { %2356 = vtanh.f32 %v869_v36  ;;  %v870_v40 = vmul.f32 0.5, %v866_v39  ;;  %v3118_v36 = vld [vmem:[#allocation5 + $0xc0] sm:$0xff]  ;;  %v3124_v39 = vld [vmem:[#allocation5 + $0xa8] sm:$0xff]  ;;  %3625 = vst [vmem:[#allocation11_spill] sm:$0xff] %v3138_v44 }
 0x221   :  { %2358 = vtanh.f32 %v870_v40  ;;  %v3126_v40 = vld [vmem:[#allocation5 + $0xb8] sm:$0xff] }
 0x222   :  { %2360 = vtanh.f32 %v868_v42  ;;  %v3132_v42 = vld [vmem:[#allocation5 + $0xb0] sm:$0xff] }
 0x223   :  { %2362 = vtanh.f32 %v871_v45  ;;  %v3142_v45 = vld [vmem:[#allocation5 + $0x80] sm:$0xff] }
 0x224   :  { %3626 = vst [vmem:[#allocation12_spill] sm:$0xff] %v3142_v45 }
 0x22c   :  { %v2357_v46 = vpop.eup %2356 }
 0x22d   :  { %v875_v48 = vmul.f32 0.5, %v2357_v46  ;;  %v3144_v46 = vld [vmem:[#allocation5 + $0x90] sm:$0xff] }
 0x22e   :  { %v2359_v49 = vpop.eup %2358  ;;  %3627 = vst [vmem:[#allocation13_spill] sm:$0xff] %v3144_v46 }
 0x22f   :  { %v878_v50 = vadd.f32 0.5, %v875_v48  ;;  %v876_v55 = vmul.f32 0.5, %v2359_v49  ;;  %v2361_v29 = vpop.eup %2360  ;;  %v3148_v48 = vld [vmem:[#allocation5 + $0x68] sm:$0xff]  ;;  %v3150_v49 = vld [vmem:[#allocation5 + $0x78] sm:$0xff] }
 0x230   :  { %v2363_v63 = vpop.eup %2362  ;;  %3628 = vst [vmem:[#allocation14_spill] sm:$0xff] %v3148_v48  ;;  %3629 = vst [vmem:[#allocation15_spill] sm:$0xff] %v3150_v49 }
 0x231   :  { %v879_v47 = vadd.f32 0.5, %v876_v55  ;;  %v883_v0 = vmul.f32 %v2361_v29, %v878_v50  ;;  %v877_v61 = vmul.f32 0.5, %v2363_v63  ;;  %v3154_v50 = vld [vmem:[#allocation5 + $0x60] sm:$0xff]  ;;  %v3156_v55 = vld [vmem:[#allocation5 + $0x70] sm:$0xff]  ;;  %v3160_v29 = vld [vmem:[#allocation5 + $0x48] sm:$0xff] }
 0x232   :  { %3630 = vst [vmem:[#allocation16_spill] sm:$0xff] %v3154_v50  ;;  %3631 = vst [vmem:[#allocation17_spill] sm:$0xff] %v3156_v55  ;;  %v3172_v63 = vld [vmem:[#allocation5 + $0x28] sm:$0xff] }
 0x233   :  { %v882_v3 = vmul.f32 %v879_v47, %v2925_v57  ;;  %v880_v2 = vadd.f32 0.5, %v877_v61  ;;  %v3022_v57 = vld [vmem:[#allocation5 + $0x1d8] sm:$0xff]  ;;  %3632 = vst [vmem:[#allocation18_spill] sm:$0xff] %v3160_v29  ;;  %3636 = vst [vmem:[#allocation22_spill] sm:$0xff] %v3172_v63 }
 0x234   :  { %v3162_v47 = vld [vmem:[#allocation5 + $0x58] sm:$0xff] }
 0x235   :  { %v3000_v53 = vadd.f32 %v883_v0, %v882_v3  ;;  %3633 = vst [vmem:[#allocation19_spill] sm:$0xff] %v3162_v47  ;;  %v3166_v0 = vld [vmem:[#allocation5 + $0x40] sm:$0xff]  ;;  %v3168_v3 = vld [vmem:[#allocation5 + $0x50] sm:$0xff]  ;;  %v3174_v61 = vld [vmem:[#allocation5 + $0x38] sm:$0xff] }
 0x236   :  { %3634 = vst [vmem:[#allocation20_spill] sm:$0xff] %v3166_v0  ;;  %3635 = vst [vmem:[#allocation21_spill] sm:$0xff] %v3168_v3 }
 0x237   :  { %2364 = vtanh.f32 %v3000_v53  ;;  %3637 = vst [vmem:[#allocation23_spill] sm:$0xff] %v3174_v61 }
 0x244   :  { %v2365_v58 = vpop.eup %2364 }
 0x245   :  { %v886_v59 = vmul.f32 %v2365_v58, %v880_v2  ;;  %v3178_v2 = vld [vmem:[#allocation5 + $0x20] sm:$0xff]  ;;  %v3180_v58 = vld [vmem:[#allocation5 + $0x30] sm:$0xff] }
 0x246   :  { %3638 = vst [vmem:[#allocation24_spill] sm:$0xff] %v3178_v2  ;;  %3639 = vst [vmem:[#allocation25_spill] sm:$0xff] %v3180_v58 }
 0x247   :  { %2334 = vst [vmem:[%s3471_s6 + $0x8] sm:$0xff] %v886_v59  ;;  %1025 = vmatmul.mubr.f32.vlgmr.msra.gmra.mxu0 %v886_v59  ;;  %1096 = vmatmul.mubr.f32.vlgmr.msra.gmra.mxu1 %v886_v59  ;;  %v3184_v59 = vld [vmem:[#allocation5 + $0x8] sm:$0xff] }
 0x248   :  { %1261 = vmatprep.mubr.f32.mxu0 %v3617_v27  ;;  %1332 = vmatprep.mubr.f32.mxu1 %v3617_v27  ;;  %3640 = vst [vmem:[#allocation26_spill] sm:$0xff] %v3184_v59  ;;  %v3190_v27 = vld [vmem:[#allocation5] sm:$0xff] }
 0x249   :  { %1198 = vmatpush1.msra.mxu0 %v3014_v20  ;;  %1269 = vmatpush1.msra.mxu1 %v3016_v52  ;;  %3642 = vst [vmem:[#allocation28_spill] sm:$0xff] %v3190_v27 }
 0x24a   :  { %1199 = vmatprep.subr.mxu0 %v3020_v51  ;;  %1270 = vmatprep.subr.mxu1 %v3022_v57 }
 0x24b   :  { %1200 = vmatpush1.msra.mxu0 %v3026_v38  ;;  %1271 = vmatpush1.msra.mxu1 %v3028_v4 }
 0x24c   :  { %1201 = vmatprep.subr.mxu0 %v3032_v56  ;;  %1272 = vmatprep.subr.mxu1 %v3034_v11 }
 0x24d   :  { %1202 = vmatpush1.msra.mxu0 %v3038_v62  ;;  %1273 = vmatpush1.msra.mxu1 %v3040_v5 }
 0x24e   :  { %1203 = vmatprep.subr.mxu0 %v3044_v6  ;;  %1274 = vmatprep.subr.mxu1 %v3046_v7 }
 0x24f   :  { %1204 = vmatpush1.msra.mxu0 %v3050_v8  ;;  %1275 = vmatpush1.msra.mxu1 %v3052_v9 }
 0x250   :  { %1205 = vmatprep.subr.mxu0 %v3056_v10  ;;  %1276 = vmatprep.subr.mxu1 %v3058_v12 }
 0x251   :  { %1206 = vmatpush1.msra.mxu0 %v3062_v13  ;;  %1277 = vmatpush1.msra.mxu1 %v3064_v14 }
 0x252   :  { %1207 = vmatprep.subr.mxu0 %v3068_v15  ;;  %1278 = vmatprep.subr.mxu1 %v3070_v16 }
 0x253   :  { %1208 = vmatpush1.msra.mxu0 %v3074_v17  ;;  %1279 = vmatpush1.msra.mxu1 %v3076_v18 }
 0x254   :  { %1209 = vmatprep.subr.mxu0 %v3080_v19  ;;  %1280 = vmatprep.subr.mxu1 %v3082_v21 }
 0x255   :  { %1210 = vmatpush1.msra.mxu0 %v3086_v22  ;;  %1281 = vmatpush1.msra.mxu1 %v3088_v23 }
 0x256   :  { %1211 = vmatprep.subr.mxu0 %v3092_v24  ;;  %1282 = vmatprep.subr.mxu1 %v3094_v25 }
 0x257   :  { %1212 = vmatpush1.msra.mxu0 %v3096_v26  ;;  %1283 = vmatpush1.msra.mxu1 %v3100_v28 }
 0x258   :  { %1213 = vmatprep.subr.mxu0 %v3102_v30  ;;  %1284 = vmatprep.subr.mxu1 %v3104_v31 }
 0x259   :  { %1214 = vmatpush1.msra.mxu0 %v3108_v32  ;;  %1285 = vmatpush1.msra.mxu1 %v3110_v33 }
 0x25a   :  { %1215 = vmatprep.subr.mxu0 %v3112_v34  ;;  %1286 = vmatprep.subr.mxu1 %v3116_v35 }
 0x25b   :  { %1216 = vmatpush1.msra.mxu0 %v3118_v36  ;;  %1287 = vmatpush1.msra.mxu1 %v3120_v37 }
 0x25c   :  { %1217 = vmatprep.subr.mxu0 %v3124_v39  ;;  %1288 = vmatprep.subr.mxu1 %v3126_v40 }
 0x25d   :  { %1218 = vmatpush1.msra.mxu0 %v3130_v41  ;;  %1289 = vmatpush1.msra.mxu1 %v3132_v42 }
 0x25e   :  { %1219 = vmatprep.subr.mxu0 %v3136_v43  ;;  %1290 = vmatprep.subr.mxu1 %v3138_v44 }
 0x25f   :  { %1220 = vmatpush1.msra.mxu0 %v3142_v45  ;;  %1291 = vmatpush1.msra.mxu1 %v3144_v46 }
 0x260   :  { %1221 = vmatprep.subr.mxu0 %v3148_v48  ;;  %1292 = vmatprep.subr.mxu1 %v3150_v49 }
 0x261   :  { %1222 = vmatpush1.msra.mxu0 %v3154_v50  ;;  %1293 = vmatpush1.msra.mxu1 %v3156_v55 }
 0x262   :  { %1223 = vmatprep.subr.mxu0 %v3160_v29  ;;  %1294 = vmatprep.subr.mxu1 %v3162_v47  ;;  %v3192_v29 = vld [vmem:[#allocation5 + $0x10] sm:$0xff] }
 0x263   :  { %1224 = vmatpush1.msra.mxu0 %v3166_v0  ;;  %1295 = vmatpush1.msra.mxu1 %v3168_v3  ;;  %3643 = vst [vmem:[#allocation29_spill] sm:$0xff] %v3192_v29  ;;  %v3644_v3 = vld [vmem:[#allocation34_spill] sm:$0xff] }
 0x264   :  { %1225 = vmatprep.subr.mxu0 %v3172_v63  ;;  %1296 = vmatprep.subr.mxu1 %v3174_v61 }
 0x265   :  { %1226 = vmatpush1.msra.mxu0 %v3178_v2  ;;  %1297 = vmatpush1.msra.mxu1 %v3180_v58  ;;  %v3645_v58 = vld [vmem:[#allocation36_spill] sm:$0xff] }
 0x266   :  { %1227 = vmatprep.subr.mxu0 %v3184_v59  ;;  %1298 = vmatprep.subr.mxu1 %v3186_v54  ;;  %v3646_v54 = vld [vmem:[#allocation37_spill] sm:$0xff] }
 0x267   :  { %1228 = vmatpush1.msra.mxu0 %v3190_v27  ;;  %1299 = vmatpush1.msra.mxu1 %v3192_v29  ;;  %v3647_v29 = vld [vmem:[#allocation35_spill] sm:$0xff] }
 0x268   :  { %1434 = vmatprep.subr.mxu0 %v3008_v60  ;;  %1505 = vmatprep.subr.mxu1 %v3010_v1 }
 0x307   :  { %v1026_v61 = vpop.f32.mrf.mxu0  ;;  %v1097_v63 = vpop.f32.mrf.mxu1 }
 0x308   :  { %v1102_v0 = vadd.f32 %v1026_v61, %v3644_v3  ;;  %v1104_v27 = vadd.f32 %v1097_v63, %v3647_v29  ;;  %v3655_v63 = vld [vmem:[#allocation18_spill] sm:$0xff] }
 0x309   :  { %v1028_v47 = vpop.f32.mrf.mxu0  ;;  %v1099_v2 = vpop.f32.mrf.mxu1 }
 0x30a   :  { %v1106_v55 = vmul.f32 0.5, %v1102_v0  ;;  %v1103_v50 = vadd.f32 %v1028_v47, %v3645_v58  ;;  %v1105_v49 = vadd.f32 %v1099_v2, %v3646_v54  ;;  %v1108_v60 = vmul.f32 0.5, %v1104_v27  ;;  %v3656_v2 = vld [vmem:[#allocation19_spill] sm:$0xff]  ;;  %v3657_v58 = vld [vmem:[#allocation20_spill] sm:$0xff] }
 0x30c   :  { %2366 = vtanh.f32 %v1106_v55  ;;  %v1107_v59 = vmul.f32 0.5, %v1103_v50 }
 0x30e   :  { %2368 = vtanh.f32 %v1107_v59  ;;  %v3658_v59 = vld [vmem:[#allocation21_spill] sm:$0xff] }
 0x30f   :  { %2370 = vtanh.f32 %v1105_v49 }
 0x310   :  { %2372 = vtanh.f32 %v1108_v60  ;;  %v3649_v60 = vld [vmem:[#allocation12_spill] sm:$0xff] }
 0x319   :  { %v2367_v48 = vpop.eup %2366 }
 0x31a   :  { %v1112_v1 = vmul.f32 0.5, %v2367_v48  ;;  %v3654_v48 = vld [vmem:[#allocation17_spill] sm:$0xff] }
 0x31b   :  { %v2369_v46 = vpop.eup %2368 }
 0x31c   :  { %v1115_v45 = vadd.f32 0.5, %v1112_v1  ;;  %v1113_v3 = vmul.f32 0.5, %v2369_v46  ;;  %v2371_v61 = vpop.eup %2370  ;;  %v3650_v1 = vld [vmem:[#allocation13_spill] sm:$0xff]  ;;  %v3653_v46 = vld [vmem:[#allocation16_spill] sm:$0xff] }
 0x31d   :  { %v2373_v54 = vpop.eup %2372 }
 0x31e   :  { %v1116_v44 = vadd.f32 0.5, %v1113_v3  ;;  %v1120_v0 = vmul.f32 %v2371_v61, %v1115_v45  ;;  %v1114_v49 = vmul.f32 0.5, %v2373_v54  ;;  %v3652_v45 = vld [vmem:[#allocation15_spill] sm:$0xff]  ;;  %v3659_v3 = vld [vmem:[#allocation22_spill] sm:$0xff] }
 0x31f   :  { %v3660_v61 = vld [vmem:[#allocation23_spill] sm:$0xff]  ;;  %v3663_v54 = vld [vmem:[#allocation26_spill] sm:$0xff] }
 0x320   :  { %v1119_v47 = vmul.f32 %v1116_v44, %v3000_v53  ;;  %v1117_v50 = vadd.f32 0.5, %v1114_v49  ;;  %v3648_v53 = vld [vmem:[#allocation11_spill] sm:$0xff]  ;;  %v3651_v44 = vld [vmem:[#allocation14_spill] sm:$0xff] }
 0x321   :  { %v3664_v49 = vld [vmem:[#allocation27_spill] sm:$0xff] }
 0x322   :  { %v3207_v55 = vadd.f32 %v1120_v0, %v1119_v47  ;;  %v3661_v0 = vld [vmem:[#allocation24_spill] sm:$0xff]  ;;  %v3662_v47 = vld [vmem:[#allocation25_spill] sm:$0xff] }
 0x324   :  { %2374 = vtanh.f32 %v3207_v55 }
 0x331   :  { %v2375_v29 = vpop.eup %2374 }
 0x332   :  { %v1123_v27 = vmul.f32 %v2375_v29, %v1117_v50  ;;  %v3665_v50 = vld [vmem:[#allocation28_spill] sm:$0xff]  ;;  %v3666_v29 = vmov 0.0  }
 0x334   :  { %2335 = vst [vmem:[%s3471_s6 + $0x10] sm:$0xff] %v1123_v27  ;;  %1262 = vmatmul.mubr.f32.vlgmr.msra.gmra.mxu0 %v1123_v27  ;;  %1333 = vmatmul.mubr.f32.vlgmr.msra.gmra.mxu1 %v1123_v27  ;;  %v3667_v27 = vld [vmem:[#allocation29_spill] sm:$0xff] }
 0x335   :  { %1435 = vmatpush1.msra.mxu0 %v3014_v20  ;;  %1506 = vmatpush1.msra.mxu1 %v3016_v52 }
 0x336   :  { %1436 = vmatprep.subr.mxu0 %v3020_v51  ;;  %1507 = vmatprep.subr.mxu1 %v3022_v57 }
 0x337   :  { %1437 = vmatpush1.msra.mxu0 %v3026_v38  ;;  %1508 = vmatpush1.msra.mxu1 %v3028_v4 }
 0x338   :  { %1438 = vmatprep.subr.mxu0 %v3032_v56  ;;  %1509 = vmatprep.subr.mxu1 %v3034_v11 }
 0x339   :  { %1439 = vmatpush1.msra.mxu0 %v3038_v62  ;;  %1510 = vmatpush1.msra.mxu1 %v3040_v5 }
 0x33a   :  { %1440 = vmatprep.subr.mxu0 %v3044_v6  ;;  %1511 = vmatprep.subr.mxu1 %v3046_v7 }
 0x33b   :  { %1441 = vmatpush1.msra.mxu0 %v3050_v8  ;;  %1512 = vmatpush1.msra.mxu1 %v3052_v9 }
 0x33c   :  { %1442 = vmatprep.subr.mxu0 %v3056_v10  ;;  %1513 = vmatprep.subr.mxu1 %v3058_v12 }
 0x33d   :  { %1443 = vmatpush1.msra.mxu0 %v3062_v13  ;;  %1514 = vmatpush1.msra.mxu1 %v3064_v14 }
 0x33e   :  { %1444 = vmatprep.subr.mxu0 %v3068_v15  ;;  %1515 = vmatprep.subr.mxu1 %v3070_v16 }
 0x33f   :  { %1445 = vmatpush1.msra.mxu0 %v3074_v17  ;;  %1516 = vmatpush1.msra.mxu1 %v3076_v18 }
 0x340   :  { %1446 = vmatprep.subr.mxu0 %v3080_v19  ;;  %1517 = vmatprep.subr.mxu1 %v3082_v21 }
 0x341   :  { %1447 = vmatpush1.msra.mxu0 %v3086_v22  ;;  %1518 = vmatpush1.msra.mxu1 %v3088_v23 }
 0x342   :  { %1448 = vmatprep.subr.mxu0 %v3092_v24  ;;  %1519 = vmatprep.subr.mxu1 %v3094_v25 }
 0x343   :  { %1449 = vmatpush1.msra.mxu0 %v3096_v26  ;;  %1520 = vmatpush1.msra.mxu1 %v3100_v28 }
 0x344   :  { %1450 = vmatprep.subr.mxu0 %v3102_v30  ;;  %1521 = vmatprep.subr.mxu1 %v3104_v31 }
 0x345   :  { %1451 = vmatpush1.msra.mxu0 %v3108_v32  ;;  %1522 = vmatpush1.msra.mxu1 %v3110_v33 }
 0x346   :  { %1452 = vmatprep.subr.mxu0 %v3112_v34  ;;  %1523 = vmatprep.subr.mxu1 %v3116_v35 }
 0x347   :  { %1453 = vmatpush1.msra.mxu0 %v3118_v36  ;;  %1524 = vmatpush1.msra.mxu1 %v3120_v37 }
 0x348   :  { %1454 = vmatprep.subr.mxu0 %v3124_v39  ;;  %1525 = vmatprep.subr.mxu1 %v3126_v40 }
 0x349   :  { %1455 = vmatpush1.msra.mxu0 %v3130_v41  ;;  %1526 = vmatpush1.msra.mxu1 %v3132_v42 }
 0x34a   :  { %1456 = vmatprep.subr.mxu0 %v3136_v43  ;;  %1527 = vmatprep.subr.mxu1 %v3648_v53 }
 0x34b   :  { %1457 = vmatpush1.msra.mxu0 %v3649_v60  ;;  %1528 = vmatpush1.msra.mxu1 %v3650_v1 }
 0x34c   :  { %1458 = vmatprep.subr.mxu0 %v3651_v44  ;;  %1529 = vmatprep.subr.mxu1 %v3652_v45 }
 0x34d   :  { %1459 = vmatpush1.msra.mxu0 %v3653_v46  ;;  %1530 = vmatpush1.msra.mxu1 %v3654_v48  ;;  %v3672_v46 = vld [vmem:[#allocation41_spill] sm:$0xff] }
 0x34e   :  { %1460 = vmatprep.subr.mxu0 %v3655_v63  ;;  %1531 = vmatprep.subr.mxu1 %v3656_v2 }
 0x34f   :  { %1461 = vmatpush1.msra.mxu0 %v3657_v58  ;;  %1532 = vmatpush1.msra.mxu1 %v3658_v59  ;;  %v3668_v59 = vld [vmem:[#allocation9_spill] sm:$0xff]  ;;  %v3670_v58 = vld [vmem:[#allocation38_spill] sm:$0xff] }
 0x350   :  { %1462 = vmatprep.subr.mxu0 %v3659_v3  ;;  %1533 = vmatprep.subr.mxu1 %v3660_v61  ;;  %v3669_v3 = vld [vmem:[#allocation10_spill] sm:$0xff] }
 0x351   :  { %1463 = vmatpush1.msra.mxu0 %v3661_v0  ;;  %1534 = vmatpush1.msra.mxu1 %v3662_v47 }
 0x352   :  { %1464 = vmatprep.subr.mxu0 %v3663_v54  ;;  %1535 = vmatprep.subr.mxu1 %v3664_v49  ;;  %v3671_v49 = vld [vmem:[#allocation40_spill] sm:$0xff] }
 0x353   :  { %1465 = vmatpush1.msra.mxu0 %v3665_v50  ;;  %1498 = vmatprep.mubr.f32.mxu0 %v3666_v29 }
 0x354   :  { %1536 = vmatpush1.msra.mxu1 %v3667_v27  ;;  %1569 = vmatprep.mubr.f32.mxu1 %v3666_v29  ;;  %v3673_v27 = vld [vmem:[#allocation39_spill] sm:$0xff] }
 0x355   :  { %1671 = vmatprep.subr.mxu0 %v3668_v59  ;;  %1742 = vmatprep.subr.mxu1 %v3669_v3 }
 0x3f4   :  { %v1263_v61 = vpop.f32.mrf.mxu0  ;;  %v1334_v0 = vpop.f32.mrf.mxu1 }
 0x3f5   :  { %v1339_v47 = vadd.f32 %v1263_v61, %v3670_v58  ;;  %v1341_v29 = vadd.f32 %v1334_v0, %v3673_v27  ;;  %v3684_v27 = vld [vmem:[#allocation21_spill] sm:$0xff] }
 0x3f6   :  { %v1265_v2 = vpop.f32.mrf.mxu0  ;;  %v1336_v54 = vpop.f32.mrf.mxu1 }
 0x3f7   :  { %v1343_v63 = vmul.f32 0.5, %v1339_v47  ;;  %v1340_v48 = vadd.f32 %v1265_v2, %v3671_v49  ;;  %v1342_v45 = vadd.f32 %v1336_v54, %v3672_v46  ;;  %v1345_v59 = vmul.f32 0.5, %v1341_v29  ;;  %v3681_v49 = vld [vmem:[#allocation18_spill] sm:$0xff]  ;;  %v3683_v29 = vld [vmem:[#allocation20_spill] sm:$0xff] }
 0x3f9   :  { %2376 = vtanh.f32 %v1343_v63  ;;  %v1344_v50 = vmul.f32 0.5, %v1340_v48 }
 0x3fb   :  { %2378 = vtanh.f32 %v1344_v50  ;;  %v3682_v50 = vld [vmem:[#allocation19_spill] sm:$0xff] }
 0x3fc   :  { %2380 = vtanh.f32 %v1342_v45 }
 0x3fd   :  { %2382 = vtanh.f32 %v1345_v59  ;;  %v3679_v59 = vld [vmem:[#allocation16_spill] sm:$0xff] }
 0x406   :  { %v2377_v44 = vpop.eup %2376 }
 0x407   :  { %v1349_v3 = vmul.f32 0.5, %v2377_v44  ;;  %v3678_v44 = vld [vmem:[#allocation15_spill] sm:$0xff] }
 0x408   :  { %v2379_v1 = vpop.eup %2378 }
 0x409   :  { %v1352_v60 = vadd.f32 0.5, %v1349_v3  ;;  %v1350_v58 = vmul.f32 0.5, %v2379_v1  ;;  %v2381_v61 = vpop.eup %2380  ;;  %v3677_v1 = vld [vmem:[#allocation14_spill] sm:$0xff]  ;;  %v3680_v3 = vld [vmem:[#allocation17_spill] sm:$0xff] }
 0x40a   :  { %v2383_v46 = vpop.eup %2382 }
 0x40b   :  { %v1353_v53 = vadd.f32 0.5, %v1350_v58  ;;  %v1357_v47 = vmul.f32 %v2381_v61, %v1352_v60  ;;  %v1351_v45 = vmul.f32 0.5, %v2383_v46  ;;  %v3676_v60 = vld [vmem:[#allocation13_spill] sm:$0xff]  ;;  %v3685_v58 = vld [vmem:[#allocation22_spill] sm:$0xff]  ;;  %v3686_v61 = vld [vmem:[#allocation23_spill] sm:$0xff] }
 0x40c   :  { %v3689_v46 = vld [vmem:[#allocation26_spill] sm:$0xff] }
 0x40d   :  { %v1356_v2 = vmul.f32 %v1353_v53, %v3207_v55  ;;  %v1354_v48 = vadd.f32 0.5, %v1351_v45  ;;  %v3674_v55 = vld [vmem:[#allocation11_spill] sm:$0xff]  ;;  %v3675_v53 = vld [vmem:[#allocation12_spill] sm:$0xff] }
 0x40e   :  { %v3690_v45 = vld [vmem:[#allocation27_spill] sm:$0xff] }
 0x40f   :  { %v3284_v63 = vadd.f32 %v1357_v47, %v1356_v2  ;;  %v3687_v47 = vld [vmem:[#allocation24_spill] sm:$0xff]  ;;  %v3688_v2 = vld [vmem:[#allocation25_spill] sm:$0xff] }
 0x411   :  { %2384 = vtanh.f32 %v3284_v63 }
 0x41e   :  { %v2385_v0 = vpop.eup %2384 }
 0x41f   :  { %v1360_v54 = vmul.f32 %v2385_v0, %v1354_v48  ;;  %v3691_v48 = vld [vmem:[#allocation28_spill] sm:$0xff]  ;;  %v3692_v0 = vmov 0.0  }
 0x421   :  { %2336 = vst [vmem:[%s3471_s6 + $0x18] sm:$0xff] %v1360_v54  ;;  %1499 = vmatmul.mubr.f32.vlgmr.msra.gmra.mxu0 %v1360_v54  ;;  %1570 = vmatmul.mubr.f32.vlgmr.msra.gmra.mxu1 %v1360_v54  ;;  %v3693_v54 = vld [vmem:[#allocation29_spill] sm:$0xff] }
 0x422   :  { %1672 = vmatpush1.msra.mxu0 %v3014_v20  ;;  %1743 = vmatpush1.msra.mxu1 %v3016_v52 }
 0x423   :  { %1673 = vmatprep.subr.mxu0 %v3020_v51  ;;  %1744 = vmatprep.subr.mxu1 %v3022_v57 }
 0x424   :  { %1674 = vmatpush1.msra.mxu0 %v3026_v38  ;;  %1745 = vmatpush1.msra.mxu1 %v3028_v4 }
 0x425   :  { %1675 = vmatprep.subr.mxu0 %v3032_v56  ;;  %1746 = vmatprep.subr.mxu1 %v3034_v11 }
 0x426   :  { %1676 = vmatpush1.msra.mxu0 %v3038_v62  ;;  %1747 = vmatpush1.msra.mxu1 %v3040_v5 }
 0x427   :  { %1677 = vmatprep.subr.mxu0 %v3044_v6  ;;  %1748 = vmatprep.subr.mxu1 %v3046_v7 }
 0x428   :  { %1678 = vmatpush1.msra.mxu0 %v3050_v8  ;;  %1749 = vmatpush1.msra.mxu1 %v3052_v9 }
 0x429   :  { %1679 = vmatprep.subr.mxu0 %v3056_v10  ;;  %1750 = vmatprep.subr.mxu1 %v3058_v12 }
 0x42a   :  { %1680 = vmatpush1.msra.mxu0 %v3062_v13  ;;  %1751 = vmatpush1.msra.mxu1 %v3064_v14 }
 0x42b   :  { %1681 = vmatprep.subr.mxu0 %v3068_v15  ;;  %1752 = vmatprep.subr.mxu1 %v3070_v16 }
 0x42c   :  { %1682 = vmatpush1.msra.mxu0 %v3074_v17  ;;  %1753 = vmatpush1.msra.mxu1 %v3076_v18 }
 0x42d   :  { %1683 = vmatprep.subr.mxu0 %v3080_v19  ;;  %1754 = vmatprep.subr.mxu1 %v3082_v21 }
 0x42e   :  { %1684 = vmatpush1.msra.mxu0 %v3086_v22  ;;  %1755 = vmatpush1.msra.mxu1 %v3088_v23 }
 0x42f   :  { %1685 = vmatprep.subr.mxu0 %v3092_v24  ;;  %1756 = vmatprep.subr.mxu1 %v3094_v25 }
 0x430   :  { %1686 = vmatpush1.msra.mxu0 %v3096_v26  ;;  %1757 = vmatpush1.msra.mxu1 %v3100_v28 }
 0x431   :  { %1687 = vmatprep.subr.mxu0 %v3102_v30  ;;  %1758 = vmatprep.subr.mxu1 %v3104_v31 }
 0x432   :  { %1688 = vmatpush1.msra.mxu0 %v3108_v32  ;;  %1759 = vmatpush1.msra.mxu1 %v3110_v33 }
 0x433   :  { %1689 = vmatprep.subr.mxu0 %v3112_v34  ;;  %1760 = vmatprep.subr.mxu1 %v3116_v35 }
 0x434   :  { %1690 = vmatpush1.msra.mxu0 %v3118_v36  ;;  %1761 = vmatpush1.msra.mxu1 %v3120_v37 }
 0x435   :  { %1691 = vmatprep.subr.mxu0 %v3124_v39  ;;  %1762 = vmatprep.subr.mxu1 %v3126_v40 }
 0x436   :  { %1692 = vmatpush1.msra.mxu0 %v3130_v41  ;;  %1763 = vmatpush1.msra.mxu1 %v3132_v42 }
 0x437   :  { %1693 = vmatprep.subr.mxu0 %v3136_v43  ;;  %1764 = vmatprep.subr.mxu1 %v3674_v55 }
 0x438   :  { %1694 = vmatpush1.msra.mxu0 %v3675_v53  ;;  %1765 = vmatpush1.msra.mxu1 %v3676_v60 }
 0x439   :  { %1695 = vmatprep.subr.mxu0 %v3677_v1  ;;  %1766 = vmatprep.subr.mxu1 %v3678_v44 }
 0x43a   :  { %1696 = vmatpush1.msra.mxu0 %v3679_v59  ;;  %1767 = vmatpush1.msra.mxu1 %v3680_v3  ;;  %v3698_v59 = vld [vmem:[#allocation45_spill] sm:$0xff] }
 0x43b   :  { %1697 = vmatprep.subr.mxu0 %v3681_v49  ;;  %1768 = vmatprep.subr.mxu1 %v3682_v50 }
 0x43c   :  { %1698 = vmatpush1.msra.mxu0 %v3683_v29  ;;  %1769 = vmatpush1.msra.mxu1 %v3684_v27  ;;  %v3694_v27 = vld [vmem:[#allocation9_spill] sm:$0xff]  ;;  %v3696_v29 = vld [vmem:[#allocation42_spill] sm:$0xff] }
 0x43d   :  { %1699 = vmatprep.subr.mxu0 %v3685_v58  ;;  %1770 = vmatprep.subr.mxu1 %v3686_v61  ;;  %v3695_v58 = vld [vmem:[#allocation10_spill] sm:$0xff] }
 0x43e   :  { %1700 = vmatpush1.msra.mxu0 %v3687_v47  ;;  %1771 = vmatpush1.msra.mxu1 %v3688_v2 }
 0x43f   :  { %1701 = vmatprep.subr.mxu0 %v3689_v46  ;;  %1772 = vmatprep.subr.mxu1 %v3690_v45  ;;  %v3697_v45 = vld [vmem:[#allocation44_spill] sm:$0xff] }
 0x440   :  { %1702 = vmatpush1.msra.mxu0 %v3691_v48  ;;  %1735 = vmatprep.mubr.f32.mxu0 %v3692_v0 }
 0x441   :  { %1773 = vmatpush1.msra.mxu1 %v3693_v54  ;;  %1806 = vmatprep.mubr.f32.mxu1 %v3692_v0  ;;  %v3699_v54 = vld [vmem:[#allocation43_spill] sm:$0xff] }
 0x442   :  { %1908 = vmatprep.subr.mxu0 %v3694_v27  ;;  %1979 = vmatprep.subr.mxu1 %v3695_v58 }
 0x4e1   :  { %v1500_v61 = vpop.f32.mrf.mxu0  ;;  %v1571_v47 = vpop.f32.mrf.mxu1 }
 0x4e2   :  { %v1576_v2 = vadd.f32 %v1500_v61, %v3696_v29  ;;  %v1578_v0 = vadd.f32 %v1571_v47, %v3699_v54  ;;  %v2144_v54 = vld [vmem:[#allocation5 + $0x1f8] sm:$0xff] }
 0x4e3   :  { %v1502_v50 = vpop.f32.mrf.mxu0  ;;  %v1573_v46 = vpop.f32.mrf.mxu1 }
 0x4e4   :  { %v1580_v49 = vmul.f32 0.5, %v1576_v2  ;;  %v1577_v3 = vadd.f32 %v1502_v50, %v3697_v45  ;;  %v1579_v44 = vadd.f32 %v1573_v46, %v3698_v59  ;;  %v1582_v27 = vmul.f32 0.5, %v1578_v0  ;;  %v2142_v0 = vld [vmem:[#allocation5 + $0x1e8] sm:$0xff] }
 0x4e6   :  { %2386 = vtanh.f32 %v1580_v49  ;;  %v1581_v48 = vmul.f32 0.5, %v1577_v3 }
 0x4e8   :  { %2388 = vtanh.f32 %v1581_v48 }
 0x4e9   :  { %2390 = vtanh.f32 %v1579_v44 }
 0x4ea   :  { %2392 = vtanh.f32 %v1582_v27  ;;  %v2141_v27 = vld [vmem:[#allocation5 + $0x1e0] sm:$0xff] }
 0x4f3   :  { %v2387_v1 = vpop.eup %2386 }
 0x4f4   :  { %v1586_v58 = vmul.f32 0.5, %v2387_v1 }
 0x4f5   :  { %v2389_v60 = vpop.eup %2388 }
 0x4f6   :  { %v1589_v53 = vadd.f32 0.5, %v1586_v58  ;;  %v1587_v29 = vmul.f32 0.5, %v2389_v60  ;;  %v2391_v61 = vpop.eup %2390  ;;  %v2143_v58 = vld [vmem:[#allocation5 + $0x1f0] sm:$0xff] }
 0x4f7   :  { %v2393_v59 = vpop.eup %2392 }
 0x4f8   :  { %v1590_v55 = vadd.f32 0.5, %v1587_v29  ;;  %v1594_v2 = vmul.f32 %v2391_v61, %v1589_v53  ;;  %v1588_v44 = vmul.f32 0.5, %v2393_v59  ;;  %v2138_v29 = vld [vmem:[#allocation5 + $0x1c8] sm:$0xff]  ;;  %v2140_v61 = vld [vmem:[#allocation5 + $0x1d8] sm:$0xff] }
 0x4f9   :  { %v2136_v59 = vld [vmem:[#allocation5 + $0x1b8] sm:$0xff] }
 0x4fa   :  { %v1593_v50 = vmul.f32 %v1590_v55, %v3284_v63  ;;  %v1591_v3 = vadd.f32 0.5, %v1588_v44  ;;  %v2133_v44 = vld [vmem:[#allocation5 + $0x1a0] sm:$0xff] }
 0x4fc   :  { %v3361_v49 = vadd.f32 %v1594_v2, %v1593_v50  ;;  %v2137_v2 = vld [vmem:[#allocation5 + $0x1c0] sm:$0xff]  ;;  %v2139_v50 = vld [vmem:[#allocation5 + $0x1d0] sm:$0xff] }
 0x4fe   :  { %2394 = vtanh.f32 %v3361_v49 }
 0x50b   :  { %v2395_v47 = vpop.eup %2394 }
 0x50c   :  { %v1597_v46 = vmul.f32 %v2395_v47, %v1591_v3  ;;  %v2135_v3 = vld [vmem:[#allocation5 + $0x1b0] sm:$0xff]  ;;  %v2130_v47 = vld [vmem:[#allocation5 + $0x188] sm:$0xff] }
 0x50e   :  { %2337 = vst [vmem:[%s3471_s6 + $0x20] sm:$0xff] %v1597_v46  ;;  %1736 = vmatmul.mubr.f32.vlgmr.msra.gmra.mxu0 %v1597_v46  ;;  %1807 = vmatmul.mubr.f32.vlgmr.msra.gmra.mxu1 %v1597_v46  ;;  %v2132_v46 = vld [vmem:[#allocation5 + $0x198] sm:$0xff] }
 0x50f   :  { %1909 = vmatpush1.msra.mxu0 %v3014_v20  ;;  %1980 = vmatpush1.msra.mxu1 %v3016_v52  ;;  %v3700_v20 = vld [vmem:[#allocation11_spill] sm:$0xff]  ;;  %v3701_v52 = vld [vmem:[#allocation12_spill] sm:$0xff] }
 0x510   :  { %1910 = vmatprep.subr.mxu0 %v3020_v51  ;;  %1981 = vmatprep.subr.mxu1 %v3022_v57  ;;  %v3702_v51 = vld [vmem:[#allocation13_spill] sm:$0xff]  ;;  %v3703_v57 = vld [vmem:[#allocation14_spill] sm:$0xff] }
 0x511   :  { %1911 = vmatpush1.msra.mxu0 %v3026_v38  ;;  %1982 = vmatpush1.msra.mxu1 %v3028_v4  ;;  %v3704_v38 = vld [vmem:[#allocation15_spill] sm:$0xff]  ;;  %v3705_v4 = vld [vmem:[#allocation16_spill] sm:$0xff] }
 0x512   :  { %1912 = vmatprep.subr.mxu0 %v3032_v56  ;;  %1983 = vmatprep.subr.mxu1 %v3034_v11  ;;  %v3706_v56 = vld [vmem:[#allocation17_spill] sm:$0xff]  ;;  %v3707_v11 = vld [vmem:[#allocation18_spill] sm:$0xff] }
 0x513   :  { %1913 = vmatpush1.msra.mxu0 %v3038_v62  ;;  %1984 = vmatpush1.msra.mxu1 %v3040_v5  ;;  %v3708_v62 = vld [vmem:[#allocation19_spill] sm:$0xff]  ;;  %v3709_v5 = vld [vmem:[#allocation20_spill] sm:$0xff] }
 0x514   :  { %1914 = vmatprep.subr.mxu0 %v3044_v6  ;;  %1985 = vmatprep.subr.mxu1 %v3046_v7  ;;  %v3710_v6 = vld [vmem:[#allocation21_spill] sm:$0xff]  ;;  %v3711_v7 = vld [vmem:[#allocation22_spill] sm:$0xff] }
 0x515   :  { %1915 = vmatpush1.msra.mxu0 %v3050_v8  ;;  %1986 = vmatpush1.msra.mxu1 %v3052_v9  ;;  %v3712_v8 = vld [vmem:[#allocation23_spill] sm:$0xff]  ;;  %v3713_v9 = vld [vmem:[#allocation24_spill] sm:$0xff] }
 0x516   :  { %1916 = vmatprep.subr.mxu0 %v3056_v10  ;;  %1987 = vmatprep.subr.mxu1 %v3058_v12  ;;  %v3714_v10 = vld [vmem:[#allocation25_spill] sm:$0xff]  ;;  %v3715_v12 = vld [vmem:[#allocation26_spill] sm:$0xff] }
 0x517   :  { %1917 = vmatpush1.msra.mxu0 %v3062_v13  ;;  %1988 = vmatpush1.msra.mxu1 %v3064_v14  ;;  %v3716_v13 = vld [vmem:[#allocation27_spill] sm:$0xff]  ;;  %v3717_v14 = vld [vmem:[#allocation28_spill] sm:$0xff] }
 0x518   :  { %1918 = vmatprep.subr.mxu0 %v3068_v15  ;;  %1989 = vmatprep.subr.mxu1 %v3070_v16  ;;  %v3718_v15 = vmov 0.0   ;;  %v3719_v16 = vld [vmem:[#allocation29_spill] sm:$0xff] }
 0x519   :  { %1919 = vmatpush1.msra.mxu0 %v3074_v17  ;;  %1990 = vmatpush1.msra.mxu1 %v3076_v18 }
 0x51a   :  { %1920 = vmatprep.subr.mxu0 %v3080_v19  ;;  %1991 = vmatprep.subr.mxu1 %v3082_v21  ;;  %v3720_v19 = vld [vmem:[#allocation46_spill] sm:$0xff] }
 0x51b   :  { %1921 = vmatpush1.msra.mxu0 %v3086_v22  ;;  %1992 = vmatpush1.msra.mxu1 %v3088_v23 }
 0x51c   :  { %1922 = vmatprep.subr.mxu0 %v3092_v24  ;;  %1993 = vmatprep.subr.mxu1 %v3094_v25  ;;  %v3721_v25 = vld [vmem:[#allocation48_spill] sm:$0xff] }
 0x51d   :  { %1923 = vmatpush1.msra.mxu0 %v3096_v26  ;;  %1994 = vmatpush1.msra.mxu1 %v3100_v28 }
 0x51e   :  { %1924 = vmatprep.subr.mxu0 %v3102_v30  ;;  %1995 = vmatprep.subr.mxu1 %v3104_v31  ;;  %v3722_v30 = vld [vmem:[#allocation49_spill] sm:$0xff] }
 0x51f   :  { %1925 = vmatpush1.msra.mxu0 %v3108_v32  ;;  %1996 = vmatpush1.msra.mxu1 %v3110_v33  ;;  %v3723_v32 = vld [vmem:[#allocation47_spill] sm:$0xff] }
 0x520   :  { %1926 = vmatprep.subr.mxu0 %v3112_v34  ;;  %1997 = vmatprep.subr.mxu1 %v3116_v35 }
 0x521   :  { %1927 = vmatpush1.msra.mxu0 %v3118_v36  ;;  %1998 = vmatpush1.msra.mxu1 %v3120_v37 }
 0x522   :  { %1928 = vmatprep.subr.mxu0 %v3124_v39  ;;  %1999 = vmatprep.subr.mxu1 %v3126_v40 }
 0x523   :  { %1929 = vmatpush1.msra.mxu0 %v3130_v41  ;;  %2000 = vmatpush1.msra.mxu1 %v3132_v42 }
 0x524   :  { %1930 = vmatprep.subr.mxu0 %v3136_v43  ;;  %2001 = vmatprep.subr.mxu1 %v3700_v20  ;;  %v2129_v20 = vld [vmem:[#allocation5 + $0x180] sm:$0xff] }
 0x525   :  { %1931 = vmatpush1.msra.mxu0 %v3701_v52  ;;  %2002 = vmatpush1.msra.mxu1 %v3702_v51  ;;  %v2131_v52 = vld [vmem:[#allocation5 + $0x190] sm:$0xff]  ;;  %v2126_v51 = vld [vmem:[#allocation5 + $0x168] sm:$0xff] }
 0x526   :  { %1932 = vmatprep.subr.mxu0 %v3703_v57  ;;  %2003 = vmatprep.subr.mxu1 %v3704_v38  ;;  %v2128_v57 = vld [vmem:[#allocation5 + $0x178] sm:$0xff]  ;;  %v2125_v38 = vld [vmem:[#allocation5 + $0x160] sm:$0xff] }
 0x527   :  { %1933 = vmatpush1.msra.mxu0 %v3705_v4  ;;  %2004 = vmatpush1.msra.mxu1 %v3706_v56  ;;  %v2127_v4 = vld [vmem:[#allocation5 + $0x170] sm:$0xff]  ;;  %v2122_v56 = vld [vmem:[#allocation5 + $0x148] sm:$0xff] }
 0x528   :  { %1934 = vmatprep.subr.mxu0 %v3707_v11  ;;  %2005 = vmatprep.subr.mxu1 %v3708_v62  ;;  %v2124_v11 = vld [vmem:[#allocation5 + $0x158] sm:$0xff]  ;;  %v2121_v62 = vld [vmem:[#allocation5 + $0x140] sm:$0xff] }
 0x529   :  { %1935 = vmatpush1.msra.mxu0 %v3709_v5  ;;  %2006 = vmatpush1.msra.mxu1 %v3710_v6  ;;  %v2123_v5 = vld [vmem:[#allocation5 + $0x150] sm:$0xff]  ;;  %v2118_v6 = vld [vmem:[#allocation5 + $0x128] sm:$0xff] }
 0x52a   :  { %1936 = vmatprep.subr.mxu0 %v3711_v7  ;;  %2007 = vmatprep.subr.mxu1 %v3712_v8  ;;  %v2120_v7 = vld [vmem:[#allocation5 + $0x138] sm:$0xff]  ;;  %v2117_v8 = vld [vmem:[#allocation5 + $0x120] sm:$0xff] }
 0x52b   :  { %1937 = vmatpush1.msra.mxu0 %v3713_v9  ;;  %2008 = vmatpush1.msra.mxu1 %v3714_v10  ;;  %v2119_v9 = vld [vmem:[#allocation5 + $0x130] sm:$0xff]  ;;  %v2114_v10 = vld [vmem:[#allocation5 + $0x108] sm:$0xff] }
 0x52c   :  { %1938 = vmatprep.subr.mxu0 %v3715_v12  ;;  %2009 = vmatprep.subr.mxu1 %v3716_v13  ;;  %v2116_v12 = vld [vmem:[#allocation5 + $0x118] sm:$0xff]  ;;  %v2113_v13 = vld [vmem:[#allocation5 + $0x100] sm:$0xff] }
 0x52d   :  { %1939 = vmatpush1.msra.mxu0 %v3717_v14  ;;  %1972 = vmatprep.mubr.f32.mxu0 %v3718_v15  ;;  %v2115_v14 = vld [vmem:[#allocation5 + $0x110] sm:$0xff] }
 0x52e   :  { %2010 = vmatpush1.msra.mxu1 %v3719_v16  ;;  %2043 = vmatprep.mubr.f32.mxu1 %v3718_v15  ;;  %v2112_v16 = vld [vmem:[#allocation5 + $0xf8] sm:$0xff] }
 0x52f   :  { %2145 = vmatprep.subr.mxu0 %v2142_v0  ;;  %2216 = vmatprep.subr.mxu1 %v2144_v54  ;;  %v2083_v0 = vld [vmem:[#allocation5 + $0x10] sm:$0xff] }
 0x5ce   :  { %v1737_v17 = vpop.f32.mrf.mxu0  ;;  %v1808_v18 = vpop.f32.mrf.mxu1 }
 0x5cf   :  { %v1813_v21 = vadd.f32 %v1737_v17, %v3720_v19  ;;  %v1815_v33 = vadd.f32 %v1808_v18, %v3723_v32  ;;  %v2109_v17 = vld [vmem:[#allocation5 + $0xe0] sm:$0xff]  ;;  %v2111_v18 = vld [vmem:[#allocation5 + $0xf0] sm:$0xff]  ;;  %v2106_v19 = vld [vmem:[#allocation5 + $0xc8] sm:$0xff] }
 0x5d0   :  { %v1739_v22 = vpop.f32.mrf.mxu0  ;;  %v1810_v23 = vpop.f32.mrf.mxu1  ;;  %v2097_v32 = vld [vmem:[#allocation5 + $0x80] sm:$0xff] }
 0x5d1   :  { %v1817_v24 = vmul.f32 0.5, %v1813_v21  ;;  %v1814_v26 = vadd.f32 %v1739_v22, %v3721_v25  ;;  %v1816_v31 = vadd.f32 %v1810_v23, %v3722_v30  ;;  %v1819_v34 = vmul.f32 0.5, %v1815_v33  ;;  %v2108_v21 = vld [vmem:[#allocation5 + $0xd8] sm:$0xff]  ;;  %v2105_v22 = vld [vmem:[#allocation5 + $0xc0] sm:$0xff]  ;;  %v2107_v23 = vld [vmem:[#allocation5 + $0xd0] sm:$0xff] }
 0x5d2   :  { %v2104_v25 = vld [vmem:[#allocation5 + $0xb8] sm:$0xff]  ;;  %v2098_v30 = vld [vmem:[#allocation5 + $0x88] sm:$0xff]  ;;  %v2099_v33 = vld [vmem:[#allocation5 + $0x90] sm:$0xff] }
 0x5d3   :  { %2396 = vtanh.f32 %v1817_v24  ;;  %v1818_v28 = vmul.f32 0.5, %v1814_v26  ;;  %v2102_v24 = vld [vmem:[#allocation5 + $0xa8] sm:$0xff]  ;;  %v2101_v26 = vld [vmem:[#allocation5 + $0xa0] sm:$0xff] }
 0x5d5   :  { %2398 = vtanh.f32 %v1818_v28  ;;  %v2103_v28 = vld [vmem:[#allocation5 + $0xb0] sm:$0xff] }
 0x5d6   :  { %2400 = vtanh.f32 %v1816_v31  ;;  %v2100_v31 = vld [vmem:[#allocation5 + $0x98] sm:$0xff] }
 0x5d7   :  { %2402 = vtanh.f32 %v1819_v34  ;;  %v2094_v34 = vld [vmem:[#allocation5 + $0x68] sm:$0xff] }
 0x5e0   :  { %v2397_v35 = vpop.eup %2396 }
 0x5e1   :  { %v1823_v36 = vmul.f32 0.5, %v2397_v35  ;;  %v2096_v35 = vld [vmem:[#allocation5 + $0x78] sm:$0xff] }
 0x5e2   :  { %v2399_v37 = vpop.eup %2398 }
 0x5e3   :  { %v1826_v39 = vadd.f32 0.5, %v1823_v36  ;;  %v1824_v40 = vmul.f32 0.5, %v2399_v37  ;;  %v2401_v41 = vpop.eup %2400  ;;  %v2093_v36 = vld [vmem:[#allocation5 + $0x60] sm:$0xff]  ;;  %v2095_v37 = vld [vmem:[#allocation5 + $0x70] sm:$0xff] }
 0x5e4   :  { %v2403_v53 = vpop.eup %2402 }
 0x5e5   :  { %v1827_v42 = vadd.f32 0.5, %v1824_v40  ;;  %v1831_v43 = vmul.f32 %v2401_v41, %v1826_v39  ;;  %v1825_v60 = vmul.f32 0.5, %v2403_v53  ;;  %v2090_v39 = vld [vmem:[#allocation5 + $0x48] sm:$0xff]  ;;  %v2092_v40 = vld [vmem:[#allocation5 + $0x58] sm:$0xff]  ;;  %v2089_v41 = vld [vmem:[#allocation5 + $0x40] sm:$0xff] }
 0x5e6   :  { %v2085_v53 = vld [vmem:[#allocation5 + $0x20] sm:$0xff] }
 0x5e7   :  { %v1830_v63 = vmul.f32 %v1827_v42, %v3361_v49  ;;  %v1828_v1 = vadd.f32 0.5, %v1825_v60  ;;  %v2134_v49 = vld [vmem:[#allocation5 + $0x1a8] sm:$0xff]  ;;  %v2091_v42 = vld [vmem:[#allocation5 + $0x50] sm:$0xff] }
 0x5e8   :  { %v2087_v60 = vld [vmem:[#allocation5 + $0x30] sm:$0xff] }
 0x5e9   :  { %v3436_v55 = vadd.f32 %v1831_v43, %v1830_v63  ;;  %v2086_v43 = vld [vmem:[#allocation5 + $0x28] sm:$0xff]  ;;  %v2088_v63 = vld [vmem:[#allocation5 + $0x38] sm:$0xff] }
 0x5eb   :  { %2404 = vtanh.f32 %v3436_v55 }
 0x5f8   :  { %v2405_v45 = vpop.eup %2404 }
 0x5f9   :  { %v1834_v48 = vmul.f32 %v2405_v45, %v1828_v1  ;;  %v2082_v1 = vld [vmem:[#allocation5 + $0x8] sm:$0xff]  ;;  %v2084_v45 = vld [vmem:[#allocation5 + $0x18] sm:$0xff] }
 0x5fb   :  { %2338 = vst [vmem:[%s3471_s6 + $0x28] sm:$0xff] %v1834_v48  ;;  %1973 = vmatmul.mubr.f32.vlgmr.msra.gmra.mxu0 %v1834_v48  ;;  %2044 = vmatmul.mubr.f32.vlgmr.msra.gmra.mxu1 %v1834_v48  ;;  %v2081_v48 = vld [vmem:[#allocation5] sm:$0xff] }
 0x5fc   :  { %2209 = vmatprep.mubr.f32.mxu0 %v3718_v15  ;;  %2280 = vmatprep.mubr.f32.mxu1 %v3718_v15  ;;  %v2110_v15 = vld [vmem:[#allocation5 + $0xe8] sm:$0xff] }
 0x5fd   :  { %2146 = vmatpush1.msra.mxu0 %v2141_v27  ;;  %2217 = vmatpush1.msra.mxu1 %v2143_v58  ;;  %v3724_v58 = vld [vmem:[#allocation50_spill] sm:$0xff] }
 0x5fe   :  { %2147 = vmatprep.subr.mxu0 %v2138_v29  ;;  %2218 = vmatprep.subr.mxu1 %v2140_v61 }
 0x5ff   :  { %2148 = vmatpush1.msra.mxu0 %v2137_v2  ;;  %2219 = vmatpush1.msra.mxu1 %v2139_v50 }
 0x600   :  { %2149 = vmatprep.subr.mxu0 %v2134_v49  ;;  %2220 = vmatprep.subr.mxu1 %v2136_v59  ;;  %v3725_v49 = vld [vmem:[#allocation52_spill] sm:$0xff] }
 0x601   :  { %2150 = vmatpush1.msra.mxu0 %v2133_v44  ;;  %2221 = vmatpush1.msra.mxu1 %v2135_v3  ;;  %v3726_v3 = vld [vmem:[#allocation53_spill] sm:$0xff] }
 0x602   :  { %2151 = vmatprep.subr.mxu0 %v2130_v47  ;;  %2222 = vmatprep.subr.mxu1 %v2132_v46  ;;  %v3727_v46 = vld [vmem:[#allocation51_spill] sm:$0xff] }
 0x603   :  { %2152 = vmatpush1.msra.mxu0 %v2129_v20  ;;  %2223 = vmatpush1.msra.mxu1 %v2131_v52 }
 0x604   :  { %2153 = vmatprep.subr.mxu0 %v2126_v51  ;;  %2224 = vmatprep.subr.mxu1 %v2128_v57 }
 0x605   :  { %2154 = vmatpush1.msra.mxu0 %v2125_v38  ;;  %2225 = vmatpush1.msra.mxu1 %v2127_v4 }
 0x606   :  { %2155 = vmatprep.subr.mxu0 %v2122_v56  ;;  %2226 = vmatprep.subr.mxu1 %v2124_v11 }
 0x607   :  { %2156 = vmatpush1.msra.mxu0 %v2121_v62  ;;  %2227 = vmatpush1.msra.mxu1 %v2123_v5 }
 0x608   :  { %2157 = vmatprep.subr.mxu0 %v2118_v6  ;;  %2228 = vmatprep.subr.mxu1 %v2120_v7 }
 0x609   :  { %2158 = vmatpush1.msra.mxu0 %v2117_v8  ;;  %2229 = vmatpush1.msra.mxu1 %v2119_v9 }
 0x60a   :  { %2159 = vmatprep.subr.mxu0 %v2114_v10  ;;  %2230 = vmatprep.subr.mxu1 %v2116_v12 }
 0x60b   :  { %2160 = vmatpush1.msra.mxu0 %v2113_v13  ;;  %2231 = vmatpush1.msra.mxu1 %v2115_v14 }
 0x60c   :  { %2161 = vmatprep.subr.mxu0 %v2110_v15  ;;  %2232 = vmatprep.subr.mxu1 %v2112_v16  ;;  %v3728_v16 = vld [vmem:[#allocation54_spill] sm:$0xff] }
 0x60d   :  { %2162 = vmatpush1.msra.mxu0 %v2109_v17  ;;  %2233 = vmatpush1.msra.mxu1 %v2111_v18 }
 0x60e   :  { %2163 = vmatprep.subr.mxu0 %v2106_v19  ;;  %2234 = vmatprep.subr.mxu1 %v2108_v21  ;;  %v3729_v21 = vld [vmem:[#allocation56_spill] sm:$0xff] }
 0x60f   :  { %2164 = vmatpush1.msra.mxu0 %v2105_v22  ;;  %2235 = vmatpush1.msra.mxu1 %v2107_v23 }
 0x610   :  { %2165 = vmatprep.subr.mxu0 %v2102_v24  ;;  %2236 = vmatprep.subr.mxu1 %v2104_v25  ;;  %v3730_v24 = vld [vmem:[#allocation57_spill] sm:$0xff] }
 0x611   :  { %2166 = vmatpush1.msra.mxu0 %v2101_v26  ;;  %2237 = vmatpush1.msra.mxu1 %v2103_v28  ;;  %v3731_v26 = vld [vmem:[#allocation55_spill] sm:$0xff] }
 0x612   :  { %2167 = vmatprep.subr.mxu0 %v2098_v30  ;;  %2238 = vmatprep.subr.mxu1 %v2100_v31 }
 0x613   :  { %2168 = vmatpush1.msra.mxu0 %v2097_v32  ;;  %2239 = vmatpush1.msra.mxu1 %v2099_v33 }
 0x614   :  { %2169 = vmatprep.subr.mxu0 %v2094_v34  ;;  %2240 = vmatprep.subr.mxu1 %v2096_v35 }
 0x615   :  { %2170 = vmatpush1.msra.mxu0 %v2093_v36  ;;  %2241 = vmatpush1.msra.mxu1 %v2095_v37 }
 0x616   :  { %2171 = vmatprep.subr.mxu0 %v2090_v39  ;;  %2242 = vmatprep.subr.mxu1 %v2092_v40 }
 0x617   :  { %2172 = vmatpush1.msra.mxu0 %v2089_v41  ;;  %2243 = vmatpush1.msra.mxu1 %v2091_v42 }
 0x618   :  { %2173 = vmatprep.subr.mxu0 %v2086_v43  ;;  %2244 = vmatprep.subr.mxu1 %v2088_v63 }
 0x619   :  { %2174 = vmatpush1.msra.mxu0 %v2085_v53  ;;  %2245 = vmatpush1.msra.mxu1 %v2087_v60 }
 0x61a   :  { %2175 = vmatprep.subr.mxu0 %v2082_v1  ;;  %2246 = vmatprep.subr.mxu1 %v2084_v45 }
 0x61b   :  { %2176 = vmatpush1.msra.mxu0 %v2081_v48  ;;  %2247 = vmatpush1.msra.mxu1 %v2083_v0 }
 0x6bb   :  { %v1974_v54 = vpop.f32.mrf.mxu0  ;;  %v2045_v27 = vpop.f32.mrf.mxu1 }
 0x6bc   :  { %v2050_v29 = vadd.f32 %v1974_v54, %v3724_v58  ;;  %v2052_v20 = vadd.f32 %v2045_v27, %v3727_v46 }
 0x6bd   :  { %v1976_v61 = vpop.f32.mrf.mxu0  ;;  %v2047_v2 = vpop.f32.mrf.mxu1 }
 0x6be   :  { %v2054_v50 = vmul.f32 0.5, %v2050_v29  ;;  %v2051_v59 = vadd.f32 %v1976_v61, %v3725_v49  ;;  %v2053_v47 = vadd.f32 %v2047_v2, %v3726_v3  ;;  %v2056_v52 = vmul.f32 0.5, %v2052_v20 }
 0x6c0   :  { %2406 = vtanh.f32 %v2054_v50  ;;  %v2055_v44 = vmul.f32 0.5, %v2051_v59 }
 0x6c2   :  { %2408 = vtanh.f32 %v2055_v44 }
 0x6c3   :  { %2410 = vtanh.f32 %v2053_v47 }
 0x6c4   :  { %2412 = vtanh.f32 %v2056_v52 }
 0x6cd   :  { %v2407_v51 = vpop.eup %2406 }
 0x6ce   :  { %v2060_v57 = vmul.f32 0.5, %v2407_v51 }
 0x6cf   :  { %v2409_v38 = vpop.eup %2408 }
 0x6d0   :  { %v2063_v4 = vadd.f32 0.5, %v2060_v57  ;;  %v2061_v56 = vmul.f32 0.5, %v2409_v38  ;;  %v2411_v11 = vpop.eup %2410 }
 0x6d1   :  { %v2413_v8 = vpop.eup %2412 }
 0x6d2   :  { %v2064_v62 = vadd.f32 0.5, %v2061_v56  ;;  %v2068_v5 = vmul.f32 %v2411_v11, %v2063_v4  ;;  %v2062_v9 = vmul.f32 0.5, %v2413_v8 }
 0x6d4   :  { %v2067_v6 = vmul.f32 %v2064_v62, %v3436_v55  ;;  %v2065_v10 = vadd.f32 0.5, %v2062_v9 }
 0x6d6   :  { %v2069_v7 = vadd.f32 %v2068_v5, %v2067_v6 }
 0x6d8   :  { %2414 = vtanh.f32 %v2069_v7 }
 0x6e5   :  { %v2415_v12 = vpop.eup %2414 }
 0x6e6   :  { %v2071_v13 = vmul.f32 %v2415_v12, %v2065_v10 }
 0x6e8   :  { %2339 = vst [vmem:[%s3471_s6 + $0x30] sm:$0xff] %v2071_v13  ;;  %2210 = vmatmul.mubr.f32.vlgmr.msra.gmra.mxu0 %v2071_v13  ;;  %2281 = vmatmul.mubr.f32.vlgmr.msra.gmra.mxu1 %v2071_v13 }
 0x7a8   :  { %v2211_v14 = vpop.f32.mrf.mxu0  ;;  %v2282_v15 = vpop.f32.mrf.mxu1 }
 0x7a9   :  { %v2287_v17 = vadd.f32 %v2211_v14, %v3728_v16  ;;  %v2289_v28 = vadd.f32 %v2282_v15, %v3731_v26 }
 0x7aa   :  { %v2213_v18 = vpop.f32.mrf.mxu0  ;;  %v2284_v19 = vpop.f32.mrf.mxu1 }
 0x7ab   :  { %v2291_v55 = vmul.f32 0.5, %v2287_v17  ;;  %v2288_v22 = vadd.f32 %v2213_v18, %v3729_v21  ;;  %v2290_v25 = vadd.f32 %v2284_v19, %v3730_v24  ;;  %v2293_v30 = vmul.f32 0.5, %v2289_v28 }
 0x7ad   :  { %2416 = vtanh.f32 %v2291_v55  ;;  %v2292_v23 = vmul.f32 0.5, %v2288_v22 }
 0x7af   :  { %2418 = vtanh.f32 %v2292_v23 }
 0x7b0   :  { %2420 = vtanh.f32 %v2290_v25 }
 0x7b1   :  { %2422 = vtanh.f32 %v2293_v30 }
 0x7ba   :  { %v2417_v31 = vpop.eup %2416 }
 0x7bb   :  { %v2297_v32 = vmul.f32 0.5, %v2417_v31 }
 0x7bc   :  { %v2419_v33 = vpop.eup %2418 }
 0x7bd   :  { %v2300_v34 = vadd.f32 0.5, %v2297_v32  ;;  %v2298_v35 = vmul.f32 0.5, %v2419_v33  ;;  %v2421_v36 = vpop.eup %2420 }
 0x7be   :  { %v2423_v42 = vpop.eup %2422 }
 0x7bf   :  { %v2301_v37 = vadd.f32 0.5, %v2298_v35  ;;  %v2305_v39 = vmul.f32 %v2421_v36, %v2300_v34  ;;  %v2299_v43 = vmul.f32 0.5, %v2423_v42 }
 0x7c1   :  { %v2304_v40 = vmul.f32 %v2301_v37, %v2069_v7  ;;  %v2302_v63 = vadd.f32 0.5, %v2299_v43 }
 0x7c3   :  { %v2306_v41 = vadd.f32 %v2305_v39, %v2304_v40 }
 0x7c5   :  { %2424 = vtanh.f32 %v2306_v41  ;;  %2312 = vst [vmem:[%s3473_s8] sm:$0xff] %v2306_v41 }
 0x7d2   :  { %v2425_v53 = vpop.eup %2424 }
 0x7d3   :  { %v2308_v60 = vmul.f32 %v2425_v53, %v2302_v63 }
 0x7d5   :  { %2340 = vst [vmem:[%s3471_s6 + $0x38] sm:$0xff] %v2308_v60  ;;  %2311 = vst [vmem:[%s3472_s7] sm:$0xff] %v2308_v60 }
 0x7d6   :  { %2325 = vsyncpa [#allocation4], 1 }
 0x7d7   :  { %2326 = vsyncpa [#allocation6], 1 }

// kernel: char_lstm_forward.4
= control target key start
LH: loop header
LB: loop body
LE: loop exit
PB: predicated region body
PF: predicated region fallthrough
CT: control target
= control target key end

     0   :  { %v4154_v3 = vmov 0.0   ;;  %s4145_s1 = inlined_call_operand.vmem [shape: f32[128,512], index: 1, kind: input, shape index: {}]   ;;  %s4146_s0 = inlined_call_operand.vmem [shape: f32[8,8,128], index: 0, kind: input, shape index: {}]   ;;  %s4147_s3 = inlined_call_operand.vmem [shape: f32[128,512], index: 3, kind: input, shape index: {}]   ;;  %s4148_s4 = inlined_call_operand.vmem [shape: f32[8,128], index: 4, kind: input, shape index: {}]   ;;  %s4149_s2 = inlined_call_operand.vmem [shape: f32[1,512], index: 2, kind: input, shape index: {}]   ;;  %s4150_s5 = inlined_call_operand.vmem [shape: f32[8,128], index: 5, kind: input, shape index: {}]   ;;  %s4151_s6 = inlined_call_operand.vmem [shape: f32[8,8,128], index: 6, kind: output, shape index: {0}]   ;;  %s4152_s8 = inlined_call_operand.vmem [shape: f32[8,128], index: 8, kind: output, shape index: {2}]   ;;  %s4153_s7 = inlined_call_operand.vmem [shape: f32[8,128], index: 7, kind: output, shape index: {1}]  }
   0x1   :  { %v103_v0 = vld [vmem:[%s4145_s1 + $0x1e8] sm:$0xff]  ;;  %v105_v1 = vld [vmem:[%s4145_s1 + $0x1f8] sm:$0xff]  ;;  %v102_v2 = vld [vmem:[%s4145_s1 + $0x1e0] sm:$0xff]  ;;  %192 = vmatprep.mubr.f32.mxu0 %v4154_v3  ;;  %305 = vmatprep.mubr.f32.mxu1 %v4154_v3 }
   0x2   :  { %128 = vmatprep.subr.mxu0 %v103_v0  ;;  %241 = vmatprep.subr.mxu1 %v105_v1  ;;  %v104_v4 = vld [vmem:[%s4145_s1 + $0x1f0] sm:$0xff]  ;;  %v99_v5 = vld [vmem:[%s4145_s1 + $0x1c8] sm:$0xff]  ;;  %v101_v6 = vld [vmem:[%s4145_s1 + $0x1d8] sm:$0xff] }
   0x3   :  { %129 = vmatpush1.msra.mxu0 %v102_v2  ;;  %242 = vmatpush1.msra.mxu1 %v104_v4  ;;  %v98_v7 = vld [vmem:[%s4145_s1 + $0x1c0] sm:$0xff]  ;;  %v100_v8 = vld [vmem:[%s4145_s1 + $0x1d0] sm:$0xff]  ;;  %v95_v9 = vld [vmem:[%s4145_s1 + $0x1a8] sm:$0xff] }
   0x4   :  { %130 = vmatprep.subr.mxu0 %v99_v5  ;;  %243 = vmatprep.subr.mxu1 %v101_v6  ;;  %v97_v10 = vld [vmem:[%s4145_s1 + $0x1b8] sm:$0xff]  ;;  %v94_v11 = vld [vmem:[%s4145_s1 + $0x1a0] sm:$0xff]  ;;  %v96_v12 = vld [vmem:[%s4145_s1 + $0x1b0] sm:$0xff] }
   0x5   :  { %131 = vmatpush1.msra.mxu0 %v98_v7  ;;  %244 = vmatpush1.msra.mxu1 %v100_v8  ;;  %v91_v13 = vld [vmem:[%s4145_s1 + $0x188] sm:$0xff]  ;;  %v93_v14 = vld [vmem:[%s4145_s1 + $0x198] sm:$0xff]  ;;  %v90_v15 = vld [vmem:[%s4145_s1 + $0x180] sm:$0xff] }
   0x6   :  { %132 = vmatprep.subr.mxu0 %v95_v9  ;;  %245 = vmatprep.subr.mxu1 %v97_v10  ;;  %v92_v16 = vld [vmem:[%s4145_s1 + $0x190] sm:$0xff]  ;;  %v87_v17 = vld [vmem:[%s4145_s1 + $0x168] sm:$0xff]  ;;  %v89_v18 = vld [vmem:[%s4145_s1 + $0x178] sm:$0xff] }
   0x7   :  { %133 = vmatpush1.msra.mxu0 %v94_v11  ;;  %246 = vmatpush1.msra.mxu1 %v96_v12  ;;  %v86_v19 = vld [vmem:[%s4145_s1 + $0x160] sm:$0xff]  ;;  %v88_v20 = vld [vmem:[%s4145_s1 + $0x170] sm:$0xff]  ;;  %v83_v21 = vld [vmem:[%s4145_s1 + $0x148] sm:$0xff] }
   0x8   :  { %134 = vmatprep.subr.mxu0 %v91_v13  ;;  %247 = vmatprep.subr.mxu1 %v93_v14  ;;  %v85_v22 = vld [vmem:[%s4145_s1 + $0x158] sm:$0xff]  ;;  %v82_v23 = vld [vmem:[%s4145_s1 + $0x140] sm:$0xff]  ;;  %v84_v24 = vld [vmem:[%s4145_s1 + $0x150] sm:$0xff] }
   0x9   :  { %135 = vmatpush1.msra.mxu0 %v90_v15  ;;  %248 = vmatpush1.msra.mxu1 %v92_v16  ;;  %v79_v25 = vld [vmem:[%s4145_s1 + $0x128] sm:$0xff]  ;;  %v81_v26 = vld [vmem:[%s4145_s1 + $0x138] sm:$0xff]  ;;  %v78_v27 = vld [vmem:[%s4145_s1 + $0x120] sm:$0xff] }
   0xa   :  { %136 = vmatprep.subr.mxu0 %v87_v17  ;;  %249 = vmatprep.subr.mxu1 %v89_v18  ;;  %v80_v28 = vld [vmem:[%s4145_s1 + $0x130] sm:$0xff]  ;;  %v75_v29 = vld [vmem:[%s4145_s1 + $0x108] sm:$0xff]  ;;  %v77_v30 = vld [vmem:[%s4145_s1 + $0x118] sm:$0xff] }
   0xb   :  { %137 = vmatpush1.msra.mxu0 %v86_v19  ;;  %250 = vmatpush1.msra.mxu1 %v88_v20  ;;  %v74_v31 = vld [vmem:[%s4145_s1 + $0x100] sm:$0xff]  ;;  %v76_v32 = vld [vmem:[%s4145_s1 + $0x110] sm:$0xff]  ;;  %v71_v33 = vld [vmem:[%s4145_s1 + $0xe8] sm:$0xff] }
   0xc   :  { %138 = vmatprep.subr.mxu0 %v83_v21  ;;  %251 = vmatprep.subr.mxu1 %v85_v22  ;;  %v73_v34 = vld [vmem:[%s4145_s1 + $0xf8] sm:$0xff]  ;;  %v70_v35 = vld [vmem:[%s4145_s1 + $0xe0] sm:$0xff]  ;;  %v72_v36 = vld [vmem:[%s4145_s1 + $0xf0] sm:$0xff] }
   0xd   :  { %139 = vmatpush1.msra.mxu0 %v82_v23  ;;  %252 = vmatpush1.msra.mxu1 %v84_v24  ;;  %v67_v37 = vld [vmem:[%s4145_s1 + $0xc8] sm:$0xff]  ;;  %v69_v38 = vld [vmem:[%s4145_s1 + $0xd8] sm:$0xff]  ;;  %v66_v39 = vld [vmem:[%s4145_s1 + $0xc0] sm:$0xff] }
   0xe   :  { %140 = vmatprep.subr.mxu0 %v79_v25  ;;  %253 = vmatprep.subr.mxu1 %v81_v26  ;;  %v68_v40 = vld [vmem:[%s4145_s1 + $0xd0] sm:$0xff]  ;;  %v63_v41 = vld [vmem:[%s4145_s1 + $0xa8] sm:$0xff]  ;;  %v65_v42 = vld [vmem:[%s4145_s1 + $0xb8] sm:$0xff] }
   0xf   :  { %141 = vmatpush1.msra.mxu0 %v78_v27  ;;  %254 = vmatpush1.msra.mxu1 %v80_v28  ;;  %v62_v43 = vld [vmem:[%s4145_s1 + $0xa0] sm:$0xff]  ;;  %v64_v44 = vld [vmem:[%s4145_s1 + $0xb0] sm:$0xff]  ;;  %v59_v45 = vld [vmem:[%s4145_s1 + $0x88] sm:$0xff] }
  0x10   :  { %142 = vmatprep.subr.mxu0 %v75_v29  ;;  %255 = vmatprep.subr.mxu1 %v77_v30  ;;  %v61_v46 = vld [vmem:[%s4145_s1 + $0x98] sm:$0xff]  ;;  %v58_v47 = vld [vmem:[%s4145_s1 + $0x80] sm:$0xff]  ;;  %v60_v48 = vld [vmem:[%s4145_s1 + $0x90] sm:$0xff] }
  0x11   :  { %143 = vmatpush1.msra.mxu0 %v74_v31  ;;  %256 = vmatpush1.msra.mxu1 %v76_v32  ;;  %v55_v49 = vld [vmem:[%s4145_s1 + $0x68] sm:$0xff]  ;;  %v57_v50 = vld [vmem:[%s4145_s1 + $0x78] sm:$0xff]  ;;  %v54_v51 = vld [vmem:[%s4145_s1 + $0x60] sm:$0xff] }
  0x12   :  { %144 = vmatprep.subr.mxu0 %v71_v33  ;;  %257 = vmatprep.subr.mxu1 %v73_v34  ;;  %v56_v52 = vld [vmem:[%s4145_s1 + $0x70] sm:$0xff]  ;;  %v51_v53 = vld [vmem:[%s4145_s1 + $0x48] sm:$0xff]  ;;  %v53_v54 = vld [vmem:[%s4145_s1 + $0x58] sm:$0xff] }
  0x13   :  { %145 = vmatpush1.msra.mxu0 %v70_v35  ;;  %258 = vmatpush1.msra.mxu1 %v72_v36  ;;  %v50_v55 = vld [vmem:[%s4145_s1 + $0x40] sm:$0xff]  ;;  %v52_v56 = vld [vmem:[%s4145_s1 + $0x50] sm:$0xff]  ;;  %v47_v57 = vld [vmem:[%s4145_s1 + $0x28] sm:$0xff] }
  0x14   :  { %146 = vmatprep.subr.mxu0 %v67_v37  ;;  %259 = vmatprep.subr.mxu1 %v69_v38  ;;  %v49_v58 = vld [vmem:[%s4145_s1 + $0x38] sm:$0xff]  ;;  %v46_v59 = vld [vmem:[%s4145_s1 + $0x20] sm:$0xff]  ;;  %v48_v60 = vld [vmem:[%s4145_s1 + $0x30] sm:$0xff] }
  0x15   :  { %147 = vmatpush1.msra.mxu0 %v66_v39  ;;  %260 = vmatpush1.msra.mxu1 %v68_v40  ;;  %v43_v61 = vld [vmem:[%s4145_s1 + $0x8] sm:$0xff]  ;;  %v45_v62 = vld [vmem:[%s4145_s1 + $0x18] sm:$0xff]  ;;  %v42_v63 = vld [vmem:[%s4145_s1] sm:$0xff] }
  0x16   :  { %148 = vmatprep.subr.mxu0 %v63_v41  ;;  %261 = vmatprep.subr.mxu1 %v65_v42  ;;  %v44_v0 = vld [vmem:[%s4145_s1 + $0x10] sm:$0xff]  ;;  %v34_v1 = vld [vmem:[%s4146_s0] sm:$0xff]  ;;  %v2638_v2 = vld [vmem:[%s4147_s3 + $0x1e8] sm:$0xff] }
  0x17   :  { %149 = vmatpush1.msra.mxu0 %v62_v43  ;;  %262 = vmatpush1.msra.mxu1 %v64_v44  ;;  %v2643_v4 = vld [vmem:[%s4147_s3 + $0x1f8] sm:$0xff]  ;;  %v2648_v5 = vld [vmem:[%s4147_s3 + $0x1e0] sm:$0xff]  ;;  %v2653_v6 = vld [vmem:[%s4147_s3 + $0x1f0] sm:$0xff] }
  0x18   :  { %150 = vmatprep.subr.mxu0 %v59_v45  ;;  %263 = vmatprep.subr.mxu1 %v61_v46  ;;  %v2658_v7 = vld [vmem:[%s4147_s3 + $0x1c8] sm:$0xff]  ;;  %v2663_v8 = vld [vmem:[%s4147_s3 + $0x1d8] sm:$0xff]  ;;  %v2672_v9 = vld [vmem:[%s4147_s3 + $0x1c0] sm:$0xff] }
  0x19   :  { %151 = vmatpush1.msra.mxu0 %v58_v47  ;;  %264 = vmatpush1.msra.mxu1 %v60_v48  ;;  %v2677_v10 = vld [vmem:[%s4147_s3 + $0x1d0] sm:$0xff]  ;;  %v35_v11 = vld [vmem:[%s4146_s0 + $0x8] sm:$0xff]  ;;  %v2694_v13 = vld [vmem:[%s4147_s3 + $0x1b8] sm:$0xff] }
  0x1a   :  { %152 = vmatprep.subr.mxu0 %v55_v49  ;;  %265 = vmatprep.subr.mxu1 %v57_v50  ;;  %v2689_v12 = vld [vmem:[%s4147_s3 + $0x1a8] sm:$0xff]  ;;  %v2701_v14 = vld [vmem:[%s4147_s3 + $0x1a0] sm:$0xff]  ;;  %v2706_v15 = vld [vmem:[%s4147_s3 + $0x1b0] sm:$0xff] }
  0x1b   :  { %153 = vmatpush1.msra.mxu0 %v54_v51  ;;  %266 = vmatpush1.msra.mxu1 %v56_v52  ;;  %v2711_v16 = vld [vmem:[%s4147_s3 + $0x188] sm:$0xff]  ;;  %v2716_v17 = vld [vmem:[%s4147_s3 + $0x198] sm:$0xff]  ;;  %v2725_v18 = vld [vmem:[%s4147_s3 + $0x180] sm:$0xff] }
  0x1c   :  { %154 = vmatprep.subr.mxu0 %v51_v53  ;;  %267 = vmatprep.subr.mxu1 %v53_v54  ;;  %v2730_v19 = vld [vmem:[%s4147_s3 + $0x190] sm:$0xff]  ;;  %v2742_v21 = vld [vmem:[%s4147_s3 + $0x168] sm:$0xff]  ;;  %v2747_v22 = vld [vmem:[%s4147_s3 + $0x178] sm:$0xff] }
  0x1d   :  { %155 = vmatpush1.msra.mxu0 %v50_v55  ;;  %268 = vmatpush1.msra.mxu1 %v52_v56  ;;  %v36_v20 = vld [vmem:[%s4146_s0 + $0x10] sm:$0xff]  ;;  %v2754_v23 = vld [vmem:[%s4147_s3 + $0x160] sm:$0xff]  ;;  %v2764_v25 = vld [vmem:[%s4147_s3 + $0x148] sm:$0xff] }
  0x1e   :  { %156 = vmatprep.subr.mxu0 %v47_v57  ;;  %269 = vmatprep.subr.mxu1 %v49_v58  ;;  %v2759_v24 = vld [vmem:[%s4147_s3 + $0x170] sm:$0xff]  ;;  %v2769_v26 = vld [vmem:[%s4147_s3 + $0x158] sm:$0xff]  ;;  %v2778_v27 = vld [vmem:[%s4147_s3 + $0x140] sm:$0xff] }
  0x1f   :  { %157 = vmatpush1.msra.mxu0 %v46_v59  ;;  %270 = vmatpush1.msra.mxu1 %v48_v60  ;;  %v2783_v28 = vld [vmem:[%s4147_s3 + $0x150] sm:$0xff]  ;;  %v37_v29 = vld [vmem:[%s4146_s0 + $0x18] sm:$0xff]  ;;  %v2795_v30 = vld [vmem:[%s4147_s3 + $0x128] sm:$0xff] }
  0x20   :  { %158 = vmatprep.subr.mxu0 %v43_v61  ;;  %271 = vmatprep.subr.mxu1 %v45_v62  ;;  %v2800_v31 = vld [vmem:[%s4147_s3 + $0x138] sm:$0xff]  ;;  %v2807_v32 = vld [vmem:[%s4147_s3 + $0x120] sm:$0xff]  ;;  %v2812_v33 = vld [vmem:[%s4147_s3 + $0x130] sm:$0xff] }
  0x21   :  { %159 = vmatpush1.msra.mxu0 %v42_v63  ;;  %272 = vmatpush1.msra.mxu1 %v44_v0  ;;  %v2817_v34 = vld [vmem:[%s4147_s3 + $0x108] sm:$0xff]  ;;  %v2822_v35 = vld [vmem:[%s4147_s3 + $0x118] sm:$0xff]  ;;  %v2831_v36 = vld [vmem:[%s4147_s3 + $0x100] sm:$0xff] }
  0x22   :  { %193 = vmatmul.mubr.f32.vlgmr.msra.gmra.mxu0 %v34_v1  ;;  %306 = vmatmul.mubr.f32.vlgmr.msra.gmra.mxu1 %v34_v1  ;;  %v2836_v37 = vld [vmem:[%s4147_s3 + $0x110] sm:$0xff]  ;;  %v38_v38 = vld [vmem:[%s4146_s0 + $0x20] sm:$0xff]  ;;  %v2848_v39 = vld [vmem:[%s4147_s3 + $0xe8] sm:$0xff] }
  0x23   :  { %459 = vmatprep.subr.mxu0 %v2638_v2  ;;  %530 = vmatprep.subr.mxu1 %v2643_v4  ;;  %v2853_v40 = vld [vmem:[%s4147_s3 + $0xf8] sm:$0xff]  ;;  %v2860_v41 = vld [vmem:[%s4147_s3 + $0xe0] sm:$0xff]  ;;  %v2865_v42 = vld [vmem:[%s4147_s3 + $0xf0] sm:$0xff] }
  0x24   :  { %460 = vmatpush1.msra.mxu0 %v2648_v5  ;;  %531 = vmatpush1.msra.mxu1 %v2653_v6  ;;  %v2870_v43 = vld [vmem:[%s4147_s3 + $0xc8] sm:$0xff]  ;;  %v2875_v44 = vld [vmem:[%s4147_s3 + $0xd8] sm:$0xff]  ;;  %v2884_v45 = vld [vmem:[%s4147_s3 + $0xc0] sm:$0xff] }
  0x25   :  { %461 = vmatprep.subr.mxu0 %v2658_v7  ;;  %532 = vmatprep.subr.mxu1 %v2663_v8  ;;  %v2889_v46 = vld [vmem:[%s4147_s3 + $0xd0] sm:$0xff]  ;;  %v39_v47 = vld [vmem:[%s4146_s0 + $0x28] sm:$0xff]  ;;  %v2906_v49 = vld [vmem:[%s4147_s3 + $0xb8] sm:$0xff] }
  0x26   :  { %198 = vmatprep.mubr.f32.mxu0 %v4154_v3  ;;  %311 = vmatprep.mubr.f32.mxu1 %v4154_v3  ;;  %v2901_v48 = vld [vmem:[%s4147_s3 + $0xa8] sm:$0xff]  ;;  %v2913_v50 = vld [vmem:[%s4147_s3 + $0xa0] sm:$0xff]  ;;  %v2918_v51 = vld [vmem:[%s4147_s3 + $0xb0] sm:$0xff] }
  0x27   :  { %462 = vmatpush1.msra.mxu0 %v2672_v9  ;;  %533 = vmatpush1.msra.mxu1 %v2677_v10  ;;  %4225 = vst [vmem:[#allocation3_spill] sm:$0xff] %v2918_v51  ;;  %v2923_v52 = vld [vmem:[%s4147_s3 + $0x88] sm:$0xff]  ;;  %v2928_v53 = vld [vmem:[%s4147_s3 + $0x98] sm:$0xff]  ;;  %v2937_v54 = vld [vmem:[%s4147_s3 + $0x80] sm:$0xff] }
  0x28   :  { %199 = vmatmul.mubr.f32.gmra.mxu0 %v35_v11  ;;  %312 = vmatmul.mubr.f32.gmra.mxu1 %v35_v11  ;;  %4226 = vst [vmem:[#allocation4_spill] sm:$0xff] %v2923_v52  ;;  %4227 = vst [vmem:[#allocation5_spill] sm:$0xff] %v2928_v53  ;;  %v2942_v55 = vld [vmem:[%s4147_s3 + $0x90] sm:$0xff]  ;;  %v2954_v57 = vld [vmem:[%s4147_s3 + $0x68] sm:$0xff] }
  0x29   :  { %463 = vmatprep.subr.mxu0 %v2689_v12  ;;  %534 = vmatprep.subr.mxu1 %v2694_v13  ;;  %4228 = vst [vmem:[#allocation6_spill] sm:$0xff] %v2937_v54  ;;  %4229 = vst [vmem:[#allocation7_spill] sm:$0xff] %v2942_v55  ;;  %v40_v56 = vld [vmem:[%s4146_s0 + $0x30] sm:$0xff]  ;;  %v2959_v58 = vld [vmem:[%s4147_s3 + $0x78] sm:$0xff] }
  0x2a   :  { %464 = vmatpush1.msra.mxu0 %v2701_v14  ;;  %535 = vmatpush1.msra.mxu1 %v2706_v15  ;;  %4230 = vst [vmem:[#allocation8_spill] sm:$0xff] %v2954_v57  ;;  %4231 = vst [vmem:[#allocation9_spill] sm:$0xff] %v2959_v58  ;;  %v2966_v59 = vld [vmem:[%s4147_s3 + $0x60] sm:$0xff]  ;;  %v2971_v60 = vld [vmem:[%s4147_s3 + $0x70] sm:$0xff] }
  0x2b   :  { %465 = vmatprep.subr.mxu0 %v2711_v16  ;;  %536 = vmatprep.subr.mxu1 %v2716_v17  ;;  %4232 = vst [vmem:[#allocation10_spill] sm:$0xff] %v2966_v59  ;;  %4233 = vst [vmem:[#allocation11_spill] sm:$0xff] %v2971_v60  ;;  %v2976_v61 = vld [vmem:[%s4147_s3 + $0x48] sm:$0xff]  ;;  %v2981_v62 = vld [vmem:[%s4147_s3 + $0x58] sm:$0xff] }
  0x2c   :  { %204 = vmatprep.mubr.f32.mxu0 %v4154_v3  ;;  %317 = vmatprep.mubr.f32.mxu1 %v4154_v3  ;;  %4234 = vst [vmem:[#allocation12_spill] sm:$0xff] %v2976_v61  ;;  %4235 = vst [vmem:[#allocation13_spill] sm:$0xff] %v2981_v62  ;;  %v2990_v63 = vld [vmem:[%s4147_s3 + $0x40] sm:$0xff]  ;;  %v2995_v0 = vld [vmem:[%s4147_s3 + $0x50] sm:$0xff] }
  0x2d   :  { %466 = vmatpush1.msra.mxu0 %v2725_v18  ;;  %537 = vmatpush1.msra.mxu1 %v2730_v19  ;;  %4236 = vst [vmem:[#allocation14_spill] sm:$0xff] %v2990_v63  ;;  %4237 = vst [vmem:[#allocation15_spill] sm:$0xff] %v2995_v0  ;;  %v41_v1 = vld [vmem:[%s4146_s0 + $0x38] sm:$0xff]  ;;  %v3007_v11 = vld [vmem:[%s4147_s3 + $0x28] sm:$0xff] }
  0x2e   :  { %205 = vmatmul.mubr.f32.gmra.mxu0 %v36_v20  ;;  %318 = vmatmul.mubr.f32.gmra.mxu1 %v36_v20  ;;  %4238 = vst [vmem:[#allocation16_spill] sm:$0xff] %v3007_v11  ;;  %v3012_v20 = vld [vmem:[%s4147_s3 + $0x38] sm:$0xff] }
  0x2f   :  { %467 = vmatprep.subr.mxu0 %v2742_v21  ;;  %538 = vmatprep.subr.mxu1 %v2747_v22  ;;  %4239 = vst [vmem:[#allocation17_spill] sm:$0xff] %v3012_v20 }
  0x30   :  { %468 = vmatpush1.msra.mxu0 %v2754_v23  ;;  %539 = vmatpush1.msra.mxu1 %v2759_v24 }
  0x31   :  { %469 = vmatprep.subr.mxu0 %v2764_v25  ;;  %540 = vmatprep.subr.mxu1 %v2769_v26 }
  0x32   :  { %210 = vmatprep.mubr.f32.mxu0 %v4154_v3  ;;  %323 = vmatprep.mubr.f32.mxu1 %v4154_v3 }
  0x33   :  { %470 = vmatpush1.msra.mxu0 %v2778_v27  ;;  %541 = vmatpush1.msra.mxu1 %v2783_v28 }
  0x34   :  { %211 = vmatmul.mubr.f32.gmra.mxu0 %v37_v29  ;;  %324 = vmatmul.mubr.f32.gmra.mxu1 %v37_v29  ;;  %v3019_v29 = vld [vmem:[%s4147_s3 + $0x20] sm:$0xff] }
  0x35   :  { %471 = vmatprep.subr.mxu0 %v2795_v30  ;;  %542 = vmatprep.subr.mxu1 %v2800_v31  ;;  %4240 = vst [vmem:[#allocation18_spill] sm:$0xff] %v3019_v29 }
  0x36   :  { %472 = vmatpush1.msra.mxu0 %v2807_v32  ;;  %543 = vmatpush1.msra.mxu1 %v2812_v33 }
  0x37   :  { %473 = vmatprep.subr.mxu0 %v2817_v34  ;;  %544 = vmatprep.subr.mxu1 %v2822_v35 }
  0x38   :  { %216 = vmatprep.mubr.f32.mxu0 %v4154_v3  ;;  %329 = vmatprep.mubr.f32.mxu1 %v4154_v3 }
  0x39   :  { %474 = vmatpush1.msra.mxu0 %v2831_v36  ;;  %545 = vmatpush1.msra.mxu1 %v2836_v37 }
  0x3a   :  { %217 = vmatmul.mubr.f32.gmra.mxu0 %v38_v38  ;;  %330 = vmatmul.mubr.f32.gmra.mxu1 %v38_v38  ;;  %v3024_v38 = vld [vmem:[%s4147_s3 + $0x30] sm:$0xff] }
  0x3b   :  { %475 = vmatprep.subr.mxu0 %v2848_v39  ;;  %546 = vmatprep.subr.mxu1 %v2853_v40  ;;  %4241 = vst [vmem:[#allocation19_spill] sm:$0xff] %v3024_v38 }
  0x3c   :  { %476 = vmatpush1.msra.mxu0 %v2860_v41  ;;  %547 = vmatpush1.msra.mxu1 %v2865_v42 }
  0x3d   :  { %477 = vmatprep.subr.mxu0 %v2870_v43  ;;  %548 = vmatprep.subr.mxu1 %v2875_v44 }
  0x3e   :  { %222 = vmatprep.mubr.f32.mxu0 %v4154_v3  ;;  %335 = vmatprep.mubr.f32.mxu1 %v4154_v3 }
  0x3f   :  { %478 = vmatpush1.msra.mxu0 %v2884_v45  ;;  %549 = vmatpush1.msra.mxu1 %v2889_v46 }
  0x40   :  { %223 = vmatmul.mubr.f32.gmra.mxu0 %v39_v47  ;;  %336 = vmatmul.mubr.f32.gmra.mxu1 %v39_v47  ;;  %v3029_v47 = vld [vmem:[%s4147_s3 + $0x8] sm:$0xff] }
  0x41   :  { %479 = vmatprep.subr.mxu0 %v2901_v48  ;;  %550 = vmatprep.subr.mxu1 %v2906_v49  ;;  %4242 = vst [vmem:[#allocation20_spill] sm:$0xff] %v3029_v47 }
  0x42   :  { %480 = vmatpush1.msra.mxu0 %v2913_v50  ;;  %551 = vmatpush1.msra.mxu1 %v2918_v51 }
  0x43   :  { %481 = vmatprep.subr.mxu0 %v2923_v52  ;;  %552 = vmatprep.subr.mxu1 %v2928_v53 }
  0x44   :  { %228 = vmatprep.mubr.f32.mxu0 %v4154_v3  ;;  %341 = vmatprep.mubr.f32.mxu1 %v4154_v3 }
  0x45   :  { %482 = vmatpush1.msra.mxu0 %v2937_v54  ;;  %553 = vmatpush1.msra.mxu1 %v2942_v55 }
  0x46   :  { %229 = vmatmul.mubr.f32.gmra.mxu0 %v40_v56  ;;  %342 = vmatmul.mubr.f32.gmra.mxu1 %v40_v56  ;;  %v3034_v56 = vld [vmem:[%s4147_s3 + $0x18] sm:$0xff] }
  0x47   :  { %483 = vmatprep.subr.mxu0 %v2954_v57  ;;  %554 = vmatprep.subr.mxu1 %v2959_v58  ;;  %4243 = vst [vmem:[#allocation21_spill] sm:$0xff] %v3034_v56 }
  0x48   :  { %484 = vmatpush1.msra.mxu0 %v2966_v59  ;;  %555 = vmatpush1.msra.mxu1 %v2971_v60 }
  0x49   :  { %485 = vmatprep.subr.mxu0 %v2976_v61  ;;  %556 = vmatprep.subr.mxu1 %v2981_v62 }
  0x4a   :  { %234 = vmatprep.mubr.f32.mxu0 %v4154_v3  ;;  %347 = vmatprep.mubr.f32.mxu1 %v4154_v3  ;;  %v3041_v3 = vld [vmem:[%s4147_s3] sm:$0xff] }
  0x4b   :  { %486 = vmatpush1.msra.mxu0 %v2990_v63  ;;  %557 = vmatpush1.msra.mxu1 %v2995_v0  ;;  %4244 = vst [vmem:[#allocation22_spill] sm:$0xff] %v3041_v3 }
  0x4c   :  { %235 = vmatmul.mubr.f32.gmra.mxu0 %v41_v1  ;;  %348 = vmatmul.mubr.f32.gmra.mxu1 %v41_v1  ;;  %v3048_v1 = vld [vmem:[%s4147_s3 + $0x10] sm:$0xff] }
  0x4d   :  { %487 = vmatprep.subr.mxu0 %v3007_v11  ;;  %558 = vmatprep.subr.mxu1 %v3012_v20  ;;  %4245 = vst [vmem:[#allocation23_spill] sm:$0xff] %v3048_v1  ;;  %v30_v20 = vld [vmem:[%s4148_s4] sm:$0xff]  ;;  %v4246_v11 = vmov 0.0  }
  0x4e   :  { %488 = vmatpush1.msra.mxu0 %v3019_v29  ;;  %559 = vmatpush1.msra.mxu1 %v3024_v38 }
  0x4f   :  { %489 = vmatprep.subr.mxu0 %v3029_v47  ;;  %560 = vmatprep.subr.mxu1 %v3034_v56 }
  0x50   :  { %490 = vmatpush1.msra.mxu0 %v3041_v3  ;;  %523 = vmatprep.mubr.f32.mxu0 %v4246_v11 }
  0x51   :  { %561 = vmatpush1.msra.mxu1 %v3048_v1  ;;  %594 = vmatprep.mubr.f32.mxu1 %v4246_v11 }
  0x52   :  { %524 = vmatmul.mubr.f32.vlgmr.msra.gmra.mxu0 %v30_v20  ;;  %595 = vmatmul.mubr.f32.vlgmr.msra.gmra.mxu1 %v30_v20  ;;  %v4247_v20 = vld [vmem:[#allocation16_spill] sm:$0xff] }
  0x53   :  { %695 = vmatprep.subr.mxu0 %v2638_v2  ;;  %766 = vmatprep.subr.mxu1 %v2643_v4 }
  0x54   :  { %696 = vmatpush1.msra.mxu0 %v2648_v5  ;;  %767 = vmatpush1.msra.mxu1 %v2653_v6 }
  0x55   :  { %697 = vmatprep.subr.mxu0 %v2658_v7  ;;  %768 = vmatprep.subr.mxu1 %v2663_v8 }
  0x56   :  { %698 = vmatpush1.msra.mxu0 %v2672_v9  ;;  %769 = vmatpush1.msra.mxu1 %v2677_v10 }
  0x57   :  { %699 = vmatprep.subr.mxu0 %v2689_v12  ;;  %770 = vmatprep.subr.mxu1 %v2694_v13 }
  0x58   :  { %700 = vmatpush1.msra.mxu0 %v2701_v14  ;;  %771 = vmatpush1.msra.mxu1 %v2706_v15 }
  0x59   :  { %701 = vmatprep.subr.mxu0 %v2711_v16  ;;  %772 = vmatprep.subr.mxu1 %v2716_v17 }
  0x5a   :  { %702 = vmatpush1.msra.mxu0 %v2725_v18  ;;  %773 = vmatpush1.msra.mxu1 %v2730_v19 }
  0x5b   :  { %703 = vmatprep.subr.mxu0 %v2742_v21  ;;  %774 = vmatprep.subr.mxu1 %v2747_v22 }
  0x5c   :  { %704 = vmatpush1.msra.mxu0 %v2754_v23  ;;  %775 = vmatpush1.msra.mxu1 %v2759_v24 }
  0x5d   :  { %705 = vmatprep.subr.mxu0 %v2764_v25  ;;  %776 = vmatprep.subr.mxu1 %v2769_v26 }
  0x5e   :  { %706 = vmatpush1.msra.mxu0 %v2778_v27  ;;  %777 = vmatpush1.msra.mxu1 %v2783_v28 }
  0x5f   :  { %707 = vmatprep.subr.mxu0 %v2795_v30  ;;  %778 = vmatprep.subr.mxu1 %v2800_v31 }
  0x60   :  { %708 = vmatpush1.msra.mxu0 %v2807_v32  ;;  %779 = vmatpush1.msra.mxu1 %v2812_v33 }
  0x61   :  { %709 = vmatprep.subr.mxu0 %v2817_v34  ;;  %780 = vmatprep.subr.mxu1 %v2822_v35 }
  0x62   :  { %710 = vmatpush1.msra.mxu0 %v2831_v36  ;;  %781 = vmatpush1.msra.mxu1 %v2836_v37 }
  0x63   :  { %711 = vmatprep.subr.mxu0 %v2848_v39  ;;  %782 = vmatprep.subr.mxu1 %v2853_v40 }
  0x64   :  { %712 = vmatpush1.msra.mxu0 %v2860_v41  ;;  %783 = vmatpush1.msra.mxu1 %v2865_v42 }
  0x65   :  { %713 = vmatprep.subr.mxu0 %v2870_v43  ;;  %784 = vmatprep.subr.mxu1 %v2875_v44 }
  0x66   :  { %714 = vmatpush1.msra.mxu0 %v2884_v45  ;;  %785 = vmatpush1.msra.mxu1 %v2889_v46 }
  0x67   :  { %715 = vmatprep.subr.mxu0 %v2901_v48  ;;  %786 = vmatprep.subr.mxu1 %v2906_v49 }
  0x68   :  { %716 = vmatpush1.msra.mxu0 %v2913_v50  ;;  %787 = vmatpush1.msra.mxu1 %v2918_v51 }
  0x69   :  { %717 = vmatprep.subr.mxu0 %v2923_v52  ;;  %788 = vmatprep.subr.mxu1 %v2928_v53 }
  0x6a   :  { %718 = vmatpush1.msra.mxu0 %v2937_v54  ;;  %789 = vmatpush1.msra.mxu1 %v2942_v55  ;;  %v4248_v54 = vld [vmem:[#allocation17_spill] sm:$0xff] }
  0x6b   :  { %719 = vmatprep.subr.mxu0 %v2954_v57  ;;  %790 = vmatprep.subr.mxu1 %v2959_v58 }
  0x6c   :  { %720 = vmatpush1.msra.mxu0 %v2966_v59  ;;  %791 = vmatpush1.msra.mxu1 %v2971_v60 }
  0x6d   :  { %721 = vmatprep.subr.mxu0 %v2976_v61  ;;  %792 = vmatprep.subr.mxu1 %v2981_v62 }
  0x6e   :  { %722 = vmatpush1.msra.mxu0 %v2990_v63  ;;  %793 = vmatpush1.msra.mxu1 %v2995_v0 }
  0x6f   :  { %723 = vmatprep.subr.mxu0 %v4247_v20  ;;  %794 = vmatprep.subr.mxu1 %v4248_v54  ;;  %v108_v54 = vlaneseq }
  0x70   :  { %724 = vmatpush1.msra.mxu0 %v3019_v29  ;;  %795 = vmatpush1.msra.mxu1 %v3024_v38 }
  0x71   :  { %725 = vmatprep.subr.mxu0 %v3029_v47  ;;  %796 = vmatprep.subr.mxu1 %v3034_v56  ;;  %v109_v29 = vshrl.u32 %v108_v54, 7 }
  0x72   :  { %726 = vmatpush1.msra.mxu0 %v3041_v3  ;;  %759 = vmatprep.mubr.f32.mxu0 %v4246_v11  ;;  %v106_v3 = vld [vmem:[%s4149_s2] sm:$0xf] }
  0x73   :  { %797 = vmatpush1.msra.mxu1 %v3048_v1  ;;  %830 = vmatprep.mubr.f32.mxu1 %v4246_v11  ;;  %v110_v47 = vsub.s32 0, %v109_v29  ;;  %v118_v56 = vsub.s32 2, %v109_v29  ;;  %v114_v11 = vsub.s32 1, %v109_v29 }
  0x74   :  { %932 = vmatprep.subr.mxu0 %v2638_v2  ;;  %1003 = vmatprep.subr.mxu1 %v2643_v4  ;;  %v122_v2 = vsub.s32 3, %v109_v29 }
  0x75   :  { %v111_v63 = vrot.slane %v106_v3, %v110_v47  ;;  %v3138_v4 = vrot.slane %v106_v3, %v118_v56  ;;  %v115_v61 = vrot.slane %v106_v3, %v114_v11 }
  0x76   :  { %v3140_v60 = vrot.slane %v106_v3, %v122_v2 }
  0xe2   :  { %v3127_v20 = vpop.f32.mrf.mxu0  ;;  %v3129_v38 = vpop.f32.mrf.mxu1 }
  0xe4   :  { %v3134_v0 = vpop.f32.mrf.mxu0  ;;  %v3136_v1 = vpop.f32.mrf.mxu1 }
  0xe8   :  { %v200_v54 = vpop.f32.mrf.mxu0  ;;  %v313_v62 = vpop.f32.mrf.mxu1 }
  0xe9   :  { %v3142_v59 = vadd.f32 %v200_v54, %v111_v63  ;;  %v3145_v58 = vadd.f32 %v313_v62, %v3138_v4 }
  0xea   :  { %v202_v57 = vpop.f32.mrf.mxu0  ;;  %v315_v55 = vpop.f32.mrf.mxu1 }
  0xeb   :  { %4249 = vst [vmem:[#allocation24_spill] sm:$0xff] %v3142_v59  ;;  %4250 = vst [vmem:[#allocation25_spill] sm:$0xff] %v3145_v58  ;;  %v3147_v53 = vadd.f32 %v202_v57, %v115_v61  ;;  %v3150_v52 = vadd.f32 %v315_v55, %v3140_v60 }
  0xed   :  { %4251 = vst [vmem:[#allocation26_spill] sm:$0xff] %v3147_v53  ;;  %4252 = vst [vmem:[#allocation27_spill] sm:$0xff] %v3150_v52 }
  0xee   :  { %v206_v29 = vpop.f32.mrf.mxu0  ;;  %v319_v47 = vpop.f32.mrf.mxu1 }
  0xef   :  { %v3152_v56 = vadd.f32 %v206_v29, %v111_v63  ;;  %v3155_v11 = vadd.f32 %v319_v47, %v3138_v4 }
  0xf0   :  { %v208_v3 = vpop.f32.mrf.mxu0  ;;  %v321_v2 = vpop.f32.mrf.mxu1 }
  0xf1   :  { %4253 = vst [vmem:[#allocation28_spill] sm:$0xff] %v3152_v56  ;;  %4254 = vst [vmem:[#allocation29_spill] sm:$0xff] %v3155_v11  ;;  %v3157_v54 = vadd.f32 %v208_v3, %v115_v61  ;;  %v3160_v62 = vadd.f32 %v321_v2, %v3140_v60 }
  0xf3   :  { %4255 = vst [vmem:[#allocation30_spill] sm:$0xff] %v3157_v54  ;;  %4256 = vst [vmem:[#allocation31_spill] sm:$0xff] %v3160_v62 }
  0xf4   :  { %v212_v58 = vpop.f32.mrf.mxu0  ;;  %v325_v57 = vpop.f32.mrf.mxu1 }
  0xf5   :  { %v3162_v53 = vadd.f32 %v212_v58, %v111_v63  ;;  %v3165_v55 = vadd.f32 %v325_v57, %v3138_v4 }
  0xf6   :  { %v214_v52 = vpop.f32.mrf.mxu0  ;;  %v327_v29 = vpop.f32.mrf.mxu1 }
  0xf7   :  { %4257 = vst [vmem:[#allocation32_spill] sm:$0xff] %v3162_v53  ;;  %4258 = vst [vmem:[#allocation33_spill] sm:$0xff] %v3165_v55  ;;  %v3167_v56 = vadd.f32 %v214_v52, %v115_v61  ;;  %v3170_v47 = vadd.f32 %v327_v29, %v3140_v60 }
  0xf9   :  { %4259 = vst [vmem:[#allocation34_spill] sm:$0xff] %v3167_v56  ;;  %4260 = vst [vmem:[#allocation35_spill] sm:$0xff] %v3170_v47 }
  0xfa   :  { %v218_v11 = vpop.f32.mrf.mxu0  ;;  %v331_v3 = vpop.f32.mrf.mxu1 }
  0xfb   :  { %v3172_v54 = vadd.f32 %v218_v11, %v111_v63  ;;  %v3175_v2 = vadd.f32 %v331_v3, %v3138_v4 }
  0xfc   :  { %v220_v62 = vpop.f32.mrf.mxu0  ;;  %v333_v58 = vpop.f32.mrf.mxu1 }
  0xfd   :  { %4261 = vst [vmem:[#allocation36_spill] sm:$0xff] %v3172_v54  ;;  %4262 = vst [vmem:[#allocation37_spill] sm:$0xff] %v3175_v2  ;;  %v3177_v53 = vadd.f32 %v220_v62, %v115_v61  ;;  %v3180_v57 = vadd.f32 %v333_v58, %v3140_v60 }
  0xff   :  { %4263 = vst [vmem:[#allocation38_spill] sm:$0xff] %v3177_v53  ;;  %4264 = vst [vmem:[#allocation39_spill] sm:$0xff] %v3180_v57 }
 0x100   :  { %v224_v55 = vpop.f32.mrf.mxu0  ;;  %v337_v52 = vpop.f32.mrf.mxu1 }
 0x101   :  { %v3182_v56 = vadd.f32 %v224_v55, %v111_v63  ;;  %v3185_v29 = vadd.f32 %v337_v52, %v3138_v4 }
 0x102   :  { %v226_v47 = vpop.f32.mrf.mxu0  ;;  %v339_v11 = vpop.f32.mrf.mxu1 }
 0x103   :  { %4265 = vst [vmem:[#allocation40_spill] sm:$0xff] %v3182_v56  ;;  %4266 = vst [vmem:[#allocation41_spill] sm:$0xff] %v3185_v29  ;;  %v3187_v54 = vadd.f32 %v226_v47, %v115_v61  ;;  %v3190_v3 = vadd.f32 %v339_v11, %v3140_v60 }
 0x105   :  { %4267 = vst [vmem:[#allocation42_spill] sm:$0xff] %v3187_v54  ;;  %4268 = vst [vmem:[#allocation43_spill] sm:$0xff] %v3190_v3 }
 0x106   :  { %v230_v2 = vpop.f32.mrf.mxu0  ;;  %v343_v62 = vpop.f32.mrf.mxu1 }
 0x107   :  { %v3192_v53 = vadd.f32 %v230_v2, %v111_v63  ;;  %v3195_v58 = vadd.f32 %v343_v62, %v3138_v4 }
 0x108   :  { %v232_v57 = vpop.f32.mrf.mxu0  ;;  %v345_v55 = vpop.f32.mrf.mxu1 }
 0x109   :  { %4269 = vst [vmem:[#allocation44_spill] sm:$0xff] %v3192_v53  ;;  %4270 = vst [vmem:[#allocation45_spill] sm:$0xff] %v3195_v58  ;;  %v3197_v56 = vadd.f32 %v232_v57, %v115_v61  ;;  %v3200_v52 = vadd.f32 %v345_v55, %v3140_v60  ;;  %v195_v57 = vadd.f32 %v3127_v20, %v111_v63 }
 0x10a   :  { %v197_v55 = vadd.f32 %v3134_v0, %v115_v61 }
 0x10b   :  { %4271 = vst [vmem:[#allocation46_spill] sm:$0xff] %v3197_v56  ;;  %4272 = vst [vmem:[#allocation47_spill] sm:$0xff] %v3200_v52 }
 0x10c   :  { %v236_v29 = vpop.f32.mrf.mxu0  ;;  %v349_v47 = vpop.f32.mrf.mxu1 }
 0x10d   :  { %v3202_v54 = vadd.f32 %v236_v29, %v111_v63  ;;  %v3205_v11 = vadd.f32 %v349_v47, %v3138_v4  ;;  %v310_v47 = vadd.f32 %v3136_v1, %v3140_v60 }
 0x10e   :  { %v238_v3 = vpop.f32.mrf.mxu0  ;;  %v351_v2 = vpop.f32.mrf.mxu1 }
 0x10f   :  { %4273 = vst [vmem:[#allocation48_spill] sm:$0xff] %v3202_v54  ;;  %4274 = vst [vmem:[#allocation49_spill] sm:$0xff] %v3205_v11  ;;  %v3207_v53 = vadd.f32 %v238_v3, %v115_v61  ;;  %v3210_v62 = vadd.f32 %v351_v2, %v3140_v60  ;;  %v308_v2 = vadd.f32 %v3129_v38, %v3138_v4  ;;  %v32_v60 = vld [vmem:[%s4150_s5] sm:$0xff] }
 0x111   :  { %4275 = vst [vmem:[#allocation50_spill] sm:$0xff] %v3207_v53  ;;  %4276 = vst [vmem:[#allocation51_spill] sm:$0xff] %v3210_v62  ;;  %v3668_v53 = vld [vmem:[%s4147_s3 + $0x18] sm:$0xff] }
 0x112   :  { %v525_v58 = vpop.f32.mrf.mxu0  ;;  %v596_v56 = vpop.f32.mrf.mxu1 }
 0x113   :  { %v601_v52 = vadd.f32 %v525_v58, %v195_v57  ;;  %v603_v63 = vadd.f32 %v596_v56, %v308_v2 }
 0x114   :  { %v527_v59 = vpop.f32.mrf.mxu0  ;;  %v598_v51 = vpop.f32.mrf.mxu1 }
 0x115   :  { %v605_v29 = vmul.f32 0.5, %v601_v52  ;;  %v602_v54 = vadd.f32 %v527_v59, %v197_v55  ;;  %v604_v11 = vadd.f32 %v598_v51, %v310_v47  ;;  %v607_v20 = vmul.f32 0.5, %v603_v63 }
 0x117   :  { %2312 = vtanh.f32 %v605_v29  ;;  %v606_v3 = vmul.f32 0.5, %v602_v54 }
 0x119   :  { %2314 = vtanh.f32 %v606_v3 }
 0x11a   :  { %2316 = vtanh.f32 %v604_v11 }
 0x11b   :  { %2318 = vtanh.f32 %v607_v20 }
 0x124   :  { %v2313_v62 = vpop.eup %2312 }
 0x125   :  { %v611_v61 = vmul.f32 0.5, %v2313_v62 }
 0x126   :  { %v2315_v0 = vpop.eup %2314 }
 0x127   :  { %v614_v58 = vadd.f32 0.5, %v611_v61  ;;  %v612_v59 = vmul.f32 0.5, %v2315_v0  ;;  %v2317_v54 = vpop.eup %2316 }
 0x128   :  { %v2319_v38 = vpop.eup %2318 }
 0x129   :  { %v615_v1 = vadd.f32 0.5, %v612_v59  ;;  %v619_v51 = vmul.f32 %v2317_v54, %v614_v58  ;;  %v613_v4 = vmul.f32 0.5, %v2319_v38  ;;  %v3319_v54 = vld [vmem:[%s4147_s3 + $0x1e0] sm:$0xff] }
 0x12a   :  { %v3343_v38 = vld [vmem:[%s4147_s3 + $0x1c0] sm:$0xff] }
 0x12b   :  { %v618_v52 = vmul.f32 %v615_v1, %v32_v60  ;;  %v616_v56 = vadd.f32 0.5, %v613_v4  ;;  %v3307_v60 = vld [vmem:[%s4147_s3 + $0x1e8] sm:$0xff]  ;;  %v3312_v1 = vld [vmem:[%s4147_s3 + $0x1f8] sm:$0xff]  ;;  %v3348_v4 = vld [vmem:[%s4147_s3 + $0x1d0] sm:$0xff] }
 0x12d   :  { %v3221_v57 = vadd.f32 %v619_v51, %v618_v52  ;;  %v3324_v52 = vld [vmem:[%s4147_s3 + $0x1f0] sm:$0xff]  ;;  %v3331_v51 = vld [vmem:[%s4147_s3 + $0x1c8] sm:$0xff] }
 0x12f   :  { %2320 = vtanh.f32 %v3221_v57 }
 0x13c   :  { %v2321_v11 = vpop.eup %2320 }
 0x13d   :  { %v622_v62 = vmul.f32 %v2321_v11, %v616_v56  ;;  %v3355_v56 = vld [vmem:[%s4147_s3 + $0x1a8] sm:$0xff]  ;;  %v3360_v11 = vld [vmem:[%s4147_s3 + $0x1b8] sm:$0xff] }
 0x13f   :  { %623 = vst [vmem:[%s4151_s6] sm:$0xff] %v622_v62  ;;  %760 = vmatmul.mubr.f32.vlgmr.msra.gmra.mxu0 %v622_v62  ;;  %831 = vmatmul.mubr.f32.vlgmr.msra.gmra.mxu1 %v622_v62  ;;  %v3367_v62 = vld [vmem:[%s4147_s3 + $0x1a0] sm:$0xff] }
 0x140   :  { %933 = vmatpush1.msra.mxu0 %v2648_v5  ;;  %1004 = vmatpush1.msra.mxu1 %v2653_v6  ;;  %v4277_v5 = vld [vmem:[#allocation3_spill] sm:$0xff]  ;;  %v4278_v6 = vld [vmem:[#allocation4_spill] sm:$0xff] }
 0x141   :  { %934 = vmatprep.subr.mxu0 %v2658_v7  ;;  %1005 = vmatprep.subr.mxu1 %v2663_v8  ;;  %v4279_v7 = vld [vmem:[#allocation5_spill] sm:$0xff]  ;;  %v4280_v8 = vld [vmem:[#allocation6_spill] sm:$0xff]  ;;  %4303 = vst [vmem:[#allocation3_spill] sm:$0xff] %v3307_v60  ;;  %4304 = vst [vmem:[#allocation4_spill] sm:$0xff] %v3312_v1 }
 0x142   :  { %935 = vmatpush1.msra.mxu0 %v2672_v9  ;;  %1006 = vmatpush1.msra.mxu1 %v2677_v10  ;;  %v4281_v9 = vld [vmem:[#allocation7_spill] sm:$0xff]  ;;  %v4282_v10 = vld [vmem:[#allocation8_spill] sm:$0xff] }
 0x143   :  { %936 = vmatprep.subr.mxu0 %v2689_v12  ;;  %1007 = vmatprep.subr.mxu1 %v2694_v13  ;;  %v4283_v12 = vld [vmem:[#allocation9_spill] sm:$0xff]  ;;  %v4284_v13 = vld [vmem:[#allocation10_spill] sm:$0xff] }
 0x144   :  { %937 = vmatpush1.msra.mxu0 %v2701_v14  ;;  %1008 = vmatpush1.msra.mxu1 %v2706_v15  ;;  %v4285_v14 = vld [vmem:[#allocation11_spill] sm:$0xff]  ;;  %v4286_v15 = vld [vmem:[#allocation12_spill] sm:$0xff] }
 0x145   :  { %938 = vmatprep.subr.mxu0 %v2711_v16  ;;  %1009 = vmatprep.subr.mxu1 %v2716_v17  ;;  %v4287_v16 = vld [vmem:[#allocation13_spill] sm:$0xff]  ;;  %v4288_v17 = vld [vmem:[#allocation14_spill] sm:$0xff] }
 0x146   :  { %939 = vmatpush1.msra.mxu0 %v2725_v18  ;;  %1010 = vmatpush1.msra.mxu1 %v2730_v19  ;;  %v4289_v18 = vld [vmem:[#allocation15_spill] sm:$0xff]  ;;  %v4290_v19 = vld [vmem:[#allocation16_spill] sm:$0xff] }
 0x147   :  { %940 = vmatprep.subr.mxu0 %v2742_v21  ;;  %1011 = vmatprep.subr.mxu1 %v2747_v22  ;;  %v4291_v21 = vld [vmem:[#allocation17_spill] sm:$0xff]  ;;  %v4292_v22 = vld [vmem:[#allocation18_spill] sm:$0xff] }
 0x148   :  { %941 = vmatpush1.msra.mxu0 %v2754_v23  ;;  %1012 = vmatpush1.msra.mxu1 %v2759_v24  ;;  %v4293_v23 = vld [vmem:[#allocation19_spill] sm:$0xff]  ;;  %v4294_v24 = vld [vmem:[#allocation20_spill] sm:$0xff] }
 0x149   :  { %942 = vmatprep.subr.mxu0 %v2764_v25  ;;  %1013 = vmatprep.subr.mxu1 %v2769_v26  ;;  %v4295_v25 = vld [vmem:[#allocation21_spill] sm:$0xff]  ;;  %v4296_v26 = vld [vmem:[#allocation22_spill] sm:$0xff] }
 0x14a   :  { %943 = vmatpush1.msra.mxu0 %v2778_v27  ;;  %1014 = vmatpush1.msra.mxu1 %v2783_v28  ;;  %v4297_v27 = vmov 0.0   ;;  %v4298_v28 = vld [vmem:[#allocation23_spill] sm:$0xff]  ;;  %4321 = vst [vmem:[#allocation21_spill] sm:$0xff] %v3668_v53 }
 0x14b   :  { %944 = vmatprep.subr.mxu0 %v2795_v30  ;;  %1015 = vmatprep.subr.mxu1 %v2800_v31 }
 0x14c   :  { %945 = vmatpush1.msra.mxu0 %v2807_v32  ;;  %1016 = vmatpush1.msra.mxu1 %v2812_v33  ;;  %v4299_v32 = vld [vmem:[#allocation24_spill] sm:$0xff] }
 0x14d   :  { %946 = vmatprep.subr.mxu0 %v2817_v34  ;;  %1017 = vmatprep.subr.mxu1 %v2822_v35 }
 0x14e   :  { %947 = vmatpush1.msra.mxu0 %v2831_v36  ;;  %1018 = vmatpush1.msra.mxu1 %v2836_v37  ;;  %v4300_v37 = vld [vmem:[#allocation26_spill] sm:$0xff] }
 0x14f   :  { %948 = vmatprep.subr.mxu0 %v2848_v39  ;;  %1019 = vmatprep.subr.mxu1 %v2853_v40 }
 0x150   :  { %949 = vmatpush1.msra.mxu0 %v2860_v41  ;;  %1020 = vmatpush1.msra.mxu1 %v2865_v42  ;;  %v4301_v41 = vld [vmem:[#allocation27_spill] sm:$0xff] }
 0x151   :  { %950 = vmatprep.subr.mxu0 %v2870_v43  ;;  %1021 = vmatprep.subr.mxu1 %v2875_v44  ;;  %v4302_v43 = vld [vmem:[#allocation25_spill] sm:$0xff] }
 0x152   :  { %951 = vmatpush1.msra.mxu0 %v2884_v45  ;;  %1022 = vmatpush1.msra.mxu1 %v2889_v46 }
 0x153   :  { %952 = vmatprep.subr.mxu0 %v2901_v48  ;;  %1023 = vmatprep.subr.mxu1 %v2906_v49 }
 0x154   :  { %953 = vmatpush1.msra.mxu0 %v2913_v50  ;;  %1024 = vmatpush1.msra.mxu1 %v4277_v5  ;;  %v3372_v5 = vld [vmem:[%s4147_s3 + $0x1b0] sm:$0xff] }
 0x155   :  { %954 = vmatprep.subr.mxu0 %v4278_v6  ;;  %1025 = vmatprep.subr.mxu1 %v4279_v7  ;;  %v3379_v6 = vld [vmem:[%s4147_s3 + $0x188] sm:$0xff]  ;;  %v3384_v7 = vld [vmem:[%s4147_s3 + $0x198] sm:$0xff] }
 0x156   :  { %955 = vmatpush1.msra.mxu0 %v4280_v8  ;;  %1026 = vmatpush1.msra.mxu1 %v4281_v9  ;;  %v3391_v8 = vld [vmem:[%s4147_s3 + $0x180] sm:$0xff]  ;;  %v3396_v9 = vld [vmem:[%s4147_s3 + $0x190] sm:$0xff] }
 0x157   :  { %956 = vmatprep.subr.mxu0 %v4282_v10  ;;  %1027 = vmatprep.subr.mxu1 %v4283_v12  ;;  %v3403_v10 = vld [vmem:[%s4147_s3 + $0x168] sm:$0xff]  ;;  %v3408_v12 = vld [vmem:[%s4147_s3 + $0x178] sm:$0xff] }
 0x158   :  { %957 = vmatpush1.msra.mxu0 %v4284_v13  ;;  %1028 = vmatpush1.msra.mxu1 %v4285_v14  ;;  %v3415_v13 = vld [vmem:[%s4147_s3 + $0x160] sm:$0xff]  ;;  %v3420_v14 = vld [vmem:[%s4147_s3 + $0x170] sm:$0xff] }
 0x159   :  { %958 = vmatprep.subr.mxu0 %v4286_v15  ;;  %1029 = vmatprep.subr.mxu1 %v4287_v16  ;;  %v3427_v15 = vld [vmem:[%s4147_s3 + $0x148] sm:$0xff]  ;;  %v3432_v16 = vld [vmem:[%s4147_s3 + $0x158] sm:$0xff] }
 0x15a   :  { %959 = vmatpush1.msra.mxu0 %v4288_v17  ;;  %1030 = vmatpush1.msra.mxu1 %v4289_v18  ;;  %v3439_v17 = vld [vmem:[%s4147_s3 + $0x140] sm:$0xff]  ;;  %v3444_v18 = vld [vmem:[%s4147_s3 + $0x150] sm:$0xff] }
 0x15b   :  { %960 = vmatprep.subr.mxu0 %v4290_v19  ;;  %1031 = vmatprep.subr.mxu1 %v4291_v21  ;;  %v3451_v19 = vld [vmem:[%s4147_s3 + $0x128] sm:$0xff]  ;;  %v3456_v21 = vld [vmem:[%s4147_s3 + $0x138] sm:$0xff] }
 0x15c   :  { %961 = vmatpush1.msra.mxu0 %v4292_v22  ;;  %1032 = vmatpush1.msra.mxu1 %v4293_v23  ;;  %v3463_v22 = vld [vmem:[%s4147_s3 + $0x120] sm:$0xff]  ;;  %v3468_v23 = vld [vmem:[%s4147_s3 + $0x130] sm:$0xff] }
 0x15d   :  { %962 = vmatprep.subr.mxu0 %v4294_v24  ;;  %1033 = vmatprep.subr.mxu1 %v4295_v25  ;;  %v3475_v24 = vld [vmem:[%s4147_s3 + $0x108] sm:$0xff]  ;;  %v3480_v25 = vld [vmem:[%s4147_s3 + $0x118] sm:$0xff] }
 0x15e   :  { %963 = vmatpush1.msra.mxu0 %v4296_v26  ;;  %996 = vmatprep.mubr.f32.mxu0 %v4297_v27  ;;  %v3485_v26 = vld [vmem:[%s4147_s3 + $0x100] sm:$0xff] }
 0x15f   :  { %1034 = vmatpush1.msra.mxu1 %v4298_v28  ;;  %1067 = vmatprep.mubr.f32.mxu1 %v4297_v27  ;;  %v3492_v28 = vld [vmem:[%s4147_s3 + $0x110] sm:$0xff] }
 0x160   :  { %1169 = vmatprep.subr.mxu0 %v3307_v60  ;;  %1240 = vmatprep.subr.mxu1 %v3312_v1 }
 0x1ff   :  { %v761_v30 = vpop.f32.mrf.mxu0  ;;  %v832_v31 = vpop.f32.mrf.mxu1 }
 0x200   :  { %v837_v33 = vadd.f32 %v761_v30, %v4299_v32  ;;  %v839_v44 = vadd.f32 %v832_v31, %v4302_v43  ;;  %v3497_v30 = vld [vmem:[%s4147_s3 + $0xe8] sm:$0xff]  ;;  %v3502_v31 = vld [vmem:[%s4147_s3 + $0xf8] sm:$0xff]  ;;  %v3509_v32 = vld [vmem:[%s4147_s3 + $0xe0] sm:$0xff] }
 0x201   :  { %v763_v34 = vpop.f32.mrf.mxu0  ;;  %v834_v35 = vpop.f32.mrf.mxu1  ;;  %v3567_v43 = vld [vmem:[%s4147_s3 + $0x88] sm:$0xff] }
 0x202   :  { %v841_v36 = vmul.f32 0.5, %v837_v33  ;;  %v838_v39 = vadd.f32 %v763_v34, %v4300_v37  ;;  %v840_v42 = vadd.f32 %v834_v35, %v4301_v41  ;;  %v843_v45 = vmul.f32 0.5, %v839_v44  ;;  %v3514_v33 = vld [vmem:[%s4147_s3 + $0xf0] sm:$0xff]  ;;  %v3519_v34 = vld [vmem:[%s4147_s3 + $0xc8] sm:$0xff]  ;;  %v3526_v35 = vld [vmem:[%s4147_s3 + $0xd8] sm:$0xff] }
 0x203   :  { %v3536_v37 = vld [vmem:[%s4147_s3 + $0xd0] sm:$0xff]  ;;  %v3555_v41 = vld [vmem:[%s4147_s3 + $0xa0] sm:$0xff]  ;;  %v3572_v44 = vld [vmem:[%s4147_s3 + $0x98] sm:$0xff] }
 0x204   :  { %2322 = vtanh.f32 %v841_v36  ;;  %v842_v40 = vmul.f32 0.5, %v838_v39  ;;  %v3531_v36 = vld [vmem:[%s4147_s3 + $0xc0] sm:$0xff]  ;;  %v3543_v39 = vld [vmem:[%s4147_s3 + $0xa8] sm:$0xff]  ;;  %4305 = vst [vmem:[#allocation5_spill] sm:$0xff] %v3572_v44 }
 0x206   :  { %2324 = vtanh.f32 %v842_v40  ;;  %v3548_v40 = vld [vmem:[%s4147_s3 + $0xb8] sm:$0xff] }
 0x207   :  { %2326 = vtanh.f32 %v840_v42  ;;  %v3560_v42 = vld [vmem:[%s4147_s3 + $0xb0] sm:$0xff] }
 0x208   :  { %2328 = vtanh.f32 %v843_v45  ;;  %v3579_v45 = vld [vmem:[%s4147_s3 + $0x80] sm:$0xff] }
 0x209   :  { %4306 = vst [vmem:[#allocation6_spill] sm:$0xff] %v3579_v45 }
 0x211   :  { %v2323_v46 = vpop.eup %2322 }
 0x212   :  { %v847_v48 = vmul.f32 0.5, %v2323_v46  ;;  %v3584_v46 = vld [vmem:[%s4147_s3 + $0x90] sm:$0xff] }
 0x213   :  { %v2325_v49 = vpop.eup %2324  ;;  %4307 = vst [vmem:[#allocation7_spill] sm:$0xff] %v3584_v46 }
 0x214   :  { %v850_v50 = vadd.f32 0.5, %v847_v48  ;;  %v848_v55 = vmul.f32 0.5, %v2325_v49  ;;  %v2327_v29 = vpop.eup %2326  ;;  %v3591_v48 = vld [vmem:[%s4147_s3 + $0x68] sm:$0xff]  ;;  %v3596_v49 = vld [vmem:[%s4147_s3 + $0x78] sm:$0xff] }
 0x215   :  { %v2329_v20 = vpop.eup %2328  ;;  %4308 = vst [vmem:[#allocation8_spill] sm:$0xff] %v3591_v48  ;;  %4309 = vst [vmem:[#allocation9_spill] sm:$0xff] %v3596_v49 }
 0x216   :  { %v851_v47 = vadd.f32 0.5, %v848_v55  ;;  %v855_v3 = vmul.f32 %v2327_v29, %v850_v50  ;;  %v849_v61 = vmul.f32 0.5, %v2329_v20  ;;  %v3603_v50 = vld [vmem:[%s4147_s3 + $0x60] sm:$0xff]  ;;  %v3608_v55 = vld [vmem:[%s4147_s3 + $0x70] sm:$0xff]  ;;  %v3615_v29 = vld [vmem:[%s4147_s3 + $0x48] sm:$0xff] }
 0x217   :  { %4310 = vst [vmem:[#allocation10_spill] sm:$0xff] %v3603_v50  ;;  %4311 = vst [vmem:[#allocation11_spill] sm:$0xff] %v3608_v55  ;;  %v3639_v20 = vld [vmem:[%s4147_s3 + $0x28] sm:$0xff] }
 0x218   :  { %v854_v2 = vmul.f32 %v851_v47, %v3221_v57  ;;  %v852_v0 = vadd.f32 0.5, %v849_v61  ;;  %v3336_v57 = vld [vmem:[%s4147_s3 + $0x1d8] sm:$0xff]  ;;  %4312 = vst [vmem:[#allocation12_spill] sm:$0xff] %v3615_v29  ;;  %4316 = vst [vmem:[#allocation16_spill] sm:$0xff] %v3639_v20 }
 0x219   :  { %v3620_v47 = vld [vmem:[%s4147_s3 + $0x58] sm:$0xff] }
 0x21a   :  { %v3296_v63 = vadd.f32 %v855_v3, %v854_v2  ;;  %4313 = vst [vmem:[#allocation13_spill] sm:$0xff] %v3620_v47  ;;  %v3627_v3 = vld [vmem:[%s4147_s3 + $0x40] sm:$0xff]  ;;  %v3632_v2 = vld [vmem:[%s4147_s3 + $0x50] sm:$0xff]  ;;  %v3644_v61 = vld [vmem:[%s4147_s3 + $0x38] sm:$0xff] }
 0x21b   :  { %4314 = vst [vmem:[#allocation14_spill] sm:$0xff] %v3627_v3  ;;  %4315 = vst [vmem:[#allocation15_spill] sm:$0xff] %v3632_v2 }
 0x21c   :  { %2330 = vtanh.f32 %v3296_v63  ;;  %4317 = vst [vmem:[#allocation17_spill] sm:$0xff] %v3644_v61 }
 0x229   :  { %v2331_v58 = vpop.eup %2330 }
 0x22a   :  { %v858_v59 = vmul.f32 %v2331_v58, %v852_v0  ;;  %v3651_v0 = vld [vmem:[%s4147_s3 + $0x20] sm:$0xff]  ;;  %v3656_v58 = vld [vmem:[%s4147_s3 + $0x30] sm:$0xff] }
 0x22b   :  { %4318 = vst [vmem:[#allocation18_spill] sm:$0xff] %v3651_v0  ;;  %4319 = vst [vmem:[#allocation19_spill] sm:$0xff] %v3656_v58 }
 0x22c   :  { %2304 = vst [vmem:[%s4151_s6 + $0x8] sm:$0xff] %v858_v59  ;;  %997 = vmatmul.mubr.f32.vlgmr.msra.gmra.mxu0 %v858_v59  ;;  %1068 = vmatmul.mubr.f32.vlgmr.msra.gmra.mxu1 %v858_v59  ;;  %v3663_v59 = vld [vmem:[%s4147_s3 + $0x8] sm:$0xff] }
 0x22d   :  { %1233 = vmatprep.mubr.f32.mxu0 %v4297_v27  ;;  %1304 = vmatprep.mubr.f32.mxu1 %v4297_v27  ;;  %4320 = vst [vmem:[#allocation20_spill] sm:$0xff] %v3663_v59  ;;  %v3675_v27 = vld [vmem:[%s4147_s3] sm:$0xff] }
 0x22e   :  { %1170 = vmatpush1.msra.mxu0 %v3319_v54  ;;  %1241 = vmatpush1.msra.mxu1 %v3324_v52  ;;  %4322 = vst [vmem:[#allocation22_spill] sm:$0xff] %v3675_v27 }
 0x22f   :  { %1171 = vmatprep.subr.mxu0 %v3331_v51  ;;  %1242 = vmatprep.subr.mxu1 %v3336_v57 }
 0x230   :  { %1172 = vmatpush1.msra.mxu0 %v3343_v38  ;;  %1243 = vmatpush1.msra.mxu1 %v3348_v4 }
 0x231   :  { %1173 = vmatprep.subr.mxu0 %v3355_v56  ;;  %1244 = vmatprep.subr.mxu1 %v3360_v11 }
 0x232   :  { %1174 = vmatpush1.msra.mxu0 %v3367_v62  ;;  %1245 = vmatpush1.msra.mxu1 %v3372_v5 }
 0x233   :  { %1175 = vmatprep.subr.mxu0 %v3379_v6  ;;  %1246 = vmatprep.subr.mxu1 %v3384_v7 }
 0x234   :  { %1176 = vmatpush1.msra.mxu0 %v3391_v8  ;;  %1247 = vmatpush1.msra.mxu1 %v3396_v9 }
 0x235   :  { %1177 = vmatprep.subr.mxu0 %v3403_v10  ;;  %1248 = vmatprep.subr.mxu1 %v3408_v12 }
 0x236   :  { %1178 = vmatpush1.msra.mxu0 %v3415_v13  ;;  %1249 = vmatpush1.msra.mxu1 %v3420_v14 }
 0x237   :  { %1179 = vmatprep.subr.mxu0 %v3427_v15  ;;  %1250 = vmatprep.subr.mxu1 %v3432_v16 }
 0x238   :  { %1180 = vmatpush1.msra.mxu0 %v3439_v17  ;;  %1251 = vmatpush1.msra.mxu1 %v3444_v18 }
 0x239   :  { %1181 = vmatprep.subr.mxu0 %v3451_v19  ;;  %1252 = vmatprep.subr.mxu1 %v3456_v21 }
 0x23a   :  { %1182 = vmatpush1.msra.mxu0 %v3463_v22  ;;  %1253 = vmatpush1.msra.mxu1 %v3468_v23 }
 0x23b   :  { %1183 = vmatprep.subr.mxu0 %v3475_v24  ;;  %1254 = vmatprep.subr.mxu1 %v3480_v25 }
 0x23c   :  { %1184 = vmatpush1.msra.mxu0 %v3485_v26  ;;  %1255 = vmatpush1.msra.mxu1 %v3492_v28 }
 0x23d   :  { %1185 = vmatprep.subr.mxu0 %v3497_v30  ;;  %1256 = vmatprep.subr.mxu1 %v3502_v31 }
 0x23e   :  { %1186 = vmatpush1.msra.mxu0 %v3509_v32  ;;  %1257 = vmatpush1.msra.mxu1 %v3514_v33 }
 0x23f   :  { %1187 = vmatprep.subr.mxu0 %v3519_v34  ;;  %1258 = vmatprep.subr.mxu1 %v3526_v35 }
 0x240   :  { %1188 = vmatpush1.msra.mxu0 %v3531_v36  ;;  %1259 = vmatpush1.msra.mxu1 %v3536_v37 }
 0x241   :  { %1189 = vmatprep.subr.mxu0 %v3543_v39  ;;  %1260 = vmatprep.subr.mxu1 %v3548_v40 }
 0x242   :  { %1190 = vmatpush1.msra.mxu0 %v3555_v41  ;;  %1261 = vmatpush1.msra.mxu1 %v3560_v42 }
 0x243   :  { %1191 = vmatprep.subr.mxu0 %v3567_v43  ;;  %1262 = vmatprep.subr.mxu1 %v3572_v44 }
 0x244   :  { %1192 = vmatpush1.msra.mxu0 %v3579_v45  ;;  %1263 = vmatpush1.msra.mxu1 %v3584_v46 }
 0x245   :  { %1193 = vmatprep.subr.mxu0 %v3591_v48  ;;  %1264 = vmatprep.subr.mxu1 %v3596_v49 }
 0x246   :  { %1194 = vmatpush1.msra.mxu0 %v3603_v50  ;;  %1265 = vmatpush1.msra.mxu1 %v3608_v55 }
 0x247   :  { %1195 = vmatprep.subr.mxu0 %v3615_v29  ;;  %1266 = vmatprep.subr.mxu1 %v3620_v47 }
 0x248   :  { %1196 = vmatpush1.msra.mxu0 %v3627_v3  ;;  %1267 = vmatpush1.msra.mxu1 %v3632_v2  ;;  %v3680_v2 = vld [vmem:[%s4147_s3 + $0x10] sm:$0xff]  ;;  %v4324_v3 = vld [vmem:[#allocation28_spill] sm:$0xff] }
 0x249   :  { %1197 = vmatprep.subr.mxu0 %v3639_v20  ;;  %1268 = vmatprep.subr.mxu1 %v3644_v61  ;;  %4323 = vst [vmem:[#allocation23_spill] sm:$0xff] %v3680_v2 }
 0x24a   :  { %1198 = vmatpush1.msra.mxu0 %v3651_v0  ;;  %1269 = vmatpush1.msra.mxu1 %v3656_v58  ;;  %v4325_v58 = vld [vmem:[#allocation30_spill] sm:$0xff] }
 0x24b   :  { %1199 = vmatprep.subr.mxu0 %v3663_v59  ;;  %1270 = vmatprep.subr.mxu1 %v3668_v53  ;;  %v4326_v53 = vld [vmem:[#allocation31_spill] sm:$0xff] }
 0x24c   :  { %1200 = vmatpush1.msra.mxu0 %v3675_v27  ;;  %1271 = vmatpush1.msra.mxu1 %v3680_v2  ;;  %v4327_v2 = vld [vmem:[#allocation29_spill] sm:$0xff] }
 0x24d   :  { %1406 = vmatprep.subr.mxu0 %v3307_v60  ;;  %1477 = vmatprep.subr.mxu1 %v3312_v1 }
 0x2ec   :  { %v998_v61 = vpop.f32.mrf.mxu0  ;;  %v1069_v20 = vpop.f32.mrf.mxu1 }
 0x2ed   :  { %v1074_v47 = vadd.f32 %v998_v61, %v4324_v3  ;;  %v1076_v27 = vadd.f32 %v1069_v20, %v4327_v2  ;;  %v4335_v20 = vld [vmem:[#allocation12_spill] sm:$0xff] }
 0x2ee   :  { %v1000_v29 = vpop.f32.mrf.mxu0  ;;  %v1071_v0 = vpop.f32.mrf.mxu1 }
 0x2ef   :  { %v1078_v55 = vmul.f32 0.5, %v1074_v47  ;;  %v1075_v50 = vadd.f32 %v1000_v29, %v4325_v58  ;;  %v1077_v49 = vadd.f32 %v1071_v0, %v4326_v53  ;;  %v1080_v60 = vmul.f32 0.5, %v1076_v27  ;;  %v4336_v0 = vld [vmem:[#allocation13_spill] sm:$0xff]  ;;  %v4337_v58 = vld [vmem:[#allocation14_spill] sm:$0xff] }
 0x2f1   :  { %2332 = vtanh.f32 %v1078_v55  ;;  %v1079_v59 = vmul.f32 0.5, %v1075_v50 }
 0x2f3   :  { %2334 = vtanh.f32 %v1079_v59  ;;  %v4338_v59 = vld [vmem:[#allocation15_spill] sm:$0xff] }
 0x2f4   :  { %2336 = vtanh.f32 %v1077_v49 }
 0x2f5   :  { %2338 = vtanh.f32 %v1080_v60  ;;  %v4329_v60 = vld [vmem:[#allocation6_spill] sm:$0xff] }
 0x2fe   :  { %v2333_v48 = vpop.eup %2332 }
 0x2ff   :  { %v1084_v1 = vmul.f32 0.5, %v2333_v48  ;;  %v4334_v48 = vld [vmem:[#allocation11_spill] sm:$0xff] }
 0x300   :  { %v2335_v46 = vpop.eup %2334 }
 0x301   :  { %v1087_v45 = vadd.f32 0.5, %v1084_v1  ;;  %v1085_v3 = vmul.f32 0.5, %v2335_v46  ;;  %v2337_v61 = vpop.eup %2336  ;;  %v4330_v1 = vld [vmem:[#allocation7_spill] sm:$0xff]  ;;  %v4333_v46 = vld [vmem:[#allocation10_spill] sm:$0xff] }
 0x302   :  { %v2339_v53 = vpop.eup %2338 }
 0x303   :  { %v1088_v44 = vadd.f32 0.5, %v1085_v3  ;;  %v1092_v47 = vmul.f32 %v2337_v61, %v1087_v45  ;;  %v1086_v49 = vmul.f32 0.5, %v2339_v53  ;;  %v4332_v45 = vld [vmem:[#allocation9_spill] sm:$0xff]  ;;  %v4339_v3 = vld [vmem:[#allocation16_spill] sm:$0xff] }
 0x304   :  { %v4340_v61 = vld [vmem:[#allocation17_spill] sm:$0xff]  ;;  %v4343_v53 = vld [vmem:[#allocation20_spill] sm:$0xff] }
 0x305   :  { %v1091_v29 = vmul.f32 %v1088_v44, %v3296_v63  ;;  %v1089_v50 = vadd.f32 0.5, %v1086_v49  ;;  %v4328_v63 = vld [vmem:[#allocation5_spill] sm:$0xff]  ;;  %v4331_v44 = vld [vmem:[#allocation8_spill] sm:$0xff] }
 0x306   :  { %v4344_v49 = vld [vmem:[#allocation21_spill] sm:$0xff] }
 0x307   :  { %v3695_v55 = vadd.f32 %v1092_v47, %v1091_v29  ;;  %v4341_v47 = vld [vmem:[#allocation18_spill] sm:$0xff]  ;;  %v4342_v29 = vld [vmem:[#allocation19_spill] sm:$0xff] }
 0x309   :  { %2340 = vtanh.f32 %v3695_v55 }
 0x316   :  { %v2341_v2 = vpop.eup %2340 }
 0x317   :  { %v1095_v27 = vmul.f32 %v2341_v2, %v1089_v50  ;;  %v4345_v50 = vld [vmem:[#allocation22_spill] sm:$0xff]  ;;  %v4346_v2 = vmov 0.0  }
 0x319   :  { %2305 = vst [vmem:[%s4151_s6 + $0x10] sm:$0xff] %v1095_v27  ;;  %1234 = vmatmul.mubr.f32.vlgmr.msra.gmra.mxu0 %v1095_v27  ;;  %1305 = vmatmul.mubr.f32.vlgmr.msra.gmra.mxu1 %v1095_v27  ;;  %v4347_v27 = vld [vmem:[#allocation23_spill] sm:$0xff] }
 0x31a   :  { %1407 = vmatpush1.msra.mxu0 %v3319_v54  ;;  %1478 = vmatpush1.msra.mxu1 %v3324_v52 }
 0x31b   :  { %1408 = vmatprep.subr.mxu0 %v3331_v51  ;;  %1479 = vmatprep.subr.mxu1 %v3336_v57 }
 0x31c   :  { %1409 = vmatpush1.msra.mxu0 %v3343_v38  ;;  %1480 = vmatpush1.msra.mxu1 %v3348_v4 }
 0x31d   :  { %1410 = vmatprep.subr.mxu0 %v3355_v56  ;;  %1481 = vmatprep.subr.mxu1 %v3360_v11 }
 0x31e   :  { %1411 = vmatpush1.msra.mxu0 %v3367_v62  ;;  %1482 = vmatpush1.msra.mxu1 %v3372_v5 }
 0x31f   :  { %1412 = vmatprep.subr.mxu0 %v3379_v6  ;;  %1483 = vmatprep.subr.mxu1 %v3384_v7 }
 0x320   :  { %1413 = vmatpush1.msra.mxu0 %v3391_v8  ;;  %1484 = vmatpush1.msra.mxu1 %v3396_v9 }
 0x321   :  { %1414 = vmatprep.subr.mxu0 %v3403_v10  ;;  %1485 = vmatprep.subr.mxu1 %v3408_v12 }
 0x322   :  { %1415 = vmatpush1.msra.mxu0 %v3415_v13  ;;  %1486 = vmatpush1.msra.mxu1 %v3420_v14 }
 0x323   :  { %1416 = vmatprep.subr.mxu0 %v3427_v15  ;;  %1487 = vmatprep.subr.mxu1 %v3432_v16 }
 0x324   :  { %1417 = vmatpush1.msra.mxu0 %v3439_v17  ;;  %1488 = vmatpush1.msra.mxu1 %v3444_v18 }
 0x325   :  { %1418 = vmatprep.subr.mxu0 %v3451_v19  ;;  %1489 = vmatprep.subr.mxu1 %v3456_v21 }
 0x326   :  { %1419 = vmatpush1.msra.mxu0 %v3463_v22  ;;  %1490 = vmatpush1.msra.mxu1 %v3468_v23 }
 0x327   :  { %1420 = vmatprep.subr.mxu0 %v3475_v24  ;;  %1491 = vmatprep.subr.mxu1 %v3480_v25 }
 0x328   :  { %1421 = vmatpush1.msra.mxu0 %v3485_v26  ;;  %1492 = vmatpush1.msra.mxu1 %v3492_v28 }
 0x329   :  { %1422 = vmatprep.subr.mxu0 %v3497_v30  ;;  %1493 = vmatprep.subr.mxu1 %v3502_v31 }
 0x32a   :  { %1423 = vmatpush1.msra.mxu0 %v3509_v32  ;;  %1494 = vmatpush1.msra.mxu1 %v3514_v33 }
 0x32b   :  { %1424 = vmatprep.subr.mxu0 %v3519_v34  ;;  %1495 = vmatprep.subr.mxu1 %v3526_v35 }
 0x32c   :  { %1425 = vmatpush1.msra.mxu0 %v3531_v36  ;;  %1496 = vmatpush1.msra.mxu1 %v3536_v37 }
 0x32d   :  { %1426 = vmatprep.subr.mxu0 %v3543_v39  ;;  %1497 = vmatprep.subr.mxu1 %v3548_v40 }
 0x32e   :  { %1427 = vmatpush1.msra.mxu0 %v3555_v41  ;;  %1498 = vmatpush1.msra.mxu1 %v3560_v42 }
 0x32f   :  { %1428 = vmatprep.subr.mxu0 %v3567_v43  ;;  %1499 = vmatprep.subr.mxu1 %v4328_v63 }
 0x330   :  { %1429 = vmatpush1.msra.mxu0 %v4329_v60  ;;  %1500 = vmatpush1.msra.mxu1 %v4330_v1 }
 0x331   :  { %1430 = vmatprep.subr.mxu0 %v4331_v44  ;;  %1501 = vmatprep.subr.mxu1 %v4332_v45 }
 0x332   :  { %1431 = vmatpush1.msra.mxu0 %v4333_v46  ;;  %1502 = vmatpush1.msra.mxu1 %v4334_v48  ;;  %v4352_v46 = vld [vmem:[#allocation35_spill] sm:$0xff] }
 0x333   :  { %1432 = vmatprep.subr.mxu0 %v4335_v20  ;;  %1503 = vmatprep.subr.mxu1 %v4336_v0 }
 0x334   :  { %1433 = vmatpush1.msra.mxu0 %v4337_v58  ;;  %1504 = vmatpush1.msra.mxu1 %v4338_v59  ;;  %v4348_v59 = vld [vmem:[#allocation3_spill] sm:$0xff]  ;;  %v4350_v58 = vld [vmem:[#allocation32_spill] sm:$0xff] }
 0x335   :  { %1434 = vmatprep.subr.mxu0 %v4339_v3  ;;  %1505 = vmatprep.subr.mxu1 %v4340_v61  ;;  %v4349_v3 = vld [vmem:[#allocation4_spill] sm:$0xff] }
 0x336   :  { %1435 = vmatpush1.msra.mxu0 %v4341_v47  ;;  %1506 = vmatpush1.msra.mxu1 %v4342_v29 }
 0x337   :  { %1436 = vmatprep.subr.mxu0 %v4343_v53  ;;  %1507 = vmatprep.subr.mxu1 %v4344_v49  ;;  %v4351_v49 = vld [vmem:[#allocation34_spill] sm:$0xff] }
 0x338   :  { %1437 = vmatpush1.msra.mxu0 %v4345_v50  ;;  %1470 = vmatprep.mubr.f32.mxu0 %v4346_v2 }
 0x339   :  { %1508 = vmatpush1.msra.mxu1 %v4347_v27  ;;  %1541 = vmatprep.mubr.f32.mxu1 %v4346_v2  ;;  %v4353_v27 = vld [vmem:[#allocation33_spill] sm:$0xff] }
 0x33a   :  { %1643 = vmatprep.subr.mxu0 %v4348_v59  ;;  %1714 = vmatprep.subr.mxu1 %v4349_v3 }
 0x3d9   :  { %v1235_v61 = vpop.f32.mrf.mxu0  ;;  %v1306_v47 = vpop.f32.mrf.mxu1 }
 0x3da   :  { %v1311_v29 = vadd.f32 %v1235_v61, %v4350_v58  ;;  %v1313_v2 = vadd.f32 %v1306_v47, %v4353_v27  ;;  %v4364_v27 = vld [vmem:[#allocation15_spill] sm:$0xff] }
 0x3db   :  { %v1237_v0 = vpop.f32.mrf.mxu0  ;;  %v1308_v53 = vpop.f32.mrf.mxu1 }
 0x3dc   :  { %v1315_v20 = vmul.f32 0.5, %v1311_v29  ;;  %v1312_v48 = vadd.f32 %v1237_v0, %v4351_v49  ;;  %v1314_v45 = vadd.f32 %v1308_v53, %v4352_v46  ;;  %v1317_v59 = vmul.f32 0.5, %v1313_v2  ;;  %v4361_v49 = vld [vmem:[#allocation12_spill] sm:$0xff]  ;;  %v4363_v2 = vld [vmem:[#allocation14_spill] sm:$0xff] }
 0x3de   :  { %2342 = vtanh.f32 %v1315_v20  ;;  %v1316_v50 = vmul.f32 0.5, %v1312_v48 }
 0x3e0   :  { %2344 = vtanh.f32 %v1316_v50  ;;  %v4362_v50 = vld [vmem:[#allocation13_spill] sm:$0xff] }
 0x3e1   :  { %2346 = vtanh.f32 %v1314_v45 }
 0x3e2   :  { %2348 = vtanh.f32 %v1317_v59  ;;  %v4359_v59 = vld [vmem:[#allocation10_spill] sm:$0xff] }
 0x3eb   :  { %v2343_v44 = vpop.eup %2342 }
 0x3ec   :  { %v1321_v3 = vmul.f32 0.5, %v2343_v44  ;;  %v4358_v44 = vld [vmem:[#allocation9_spill] sm:$0xff] }
 0x3ed   :  { %v2345_v1 = vpop.eup %2344 }
 0x3ee   :  { %v1324_v60 = vadd.f32 0.5, %v1321_v3  ;;  %v1322_v58 = vmul.f32 0.5, %v2345_v1  ;;  %v2347_v61 = vpop.eup %2346  ;;  %v4357_v1 = vld [vmem:[#allocation8_spill] sm:$0xff]  ;;  %v4360_v3 = vld [vmem:[#allocation11_spill] sm:$0xff] }
 0x3ef   :  { %v2349_v46 = vpop.eup %2348 }
 0x3f0   :  { %v1325_v63 = vadd.f32 0.5, %v1322_v58  ;;  %v1329_v29 = vmul.f32 %v2347_v61, %v1324_v60  ;;  %v1323_v45 = vmul.f32 0.5, %v2349_v46  ;;  %v4356_v60 = vld [vmem:[#allocation7_spill] sm:$0xff]  ;;  %v4365_v58 = vld [vmem:[#allocation16_spill] sm:$0xff]  ;;  %v4366_v61 = vld [vmem:[#allocation17_spill] sm:$0xff] }
 0x3f1   :  { %v4369_v46 = vld [vmem:[#allocation20_spill] sm:$0xff] }
 0x3f2   :  { %v1328_v0 = vmul.f32 %v1325_v63, %v3695_v55  ;;  %v1326_v48 = vadd.f32 0.5, %v1323_v45  ;;  %v4354_v55 = vld [vmem:[#allocation5_spill] sm:$0xff]  ;;  %v4355_v63 = vld [vmem:[#allocation6_spill] sm:$0xff] }
 0x3f3   :  { %v4370_v45 = vld [vmem:[#allocation21_spill] sm:$0xff] }
 0x3f4   :  { %v3772_v20 = vadd.f32 %v1329_v29, %v1328_v0  ;;  %v4367_v29 = vld [vmem:[#allocation18_spill] sm:$0xff]  ;;  %v4368_v0 = vld [vmem:[#allocation19_spill] sm:$0xff] }
 0x3f6   :  { %2350 = vtanh.f32 %v3772_v20 }
 0x403   :  { %v2351_v47 = vpop.eup %2350 }
 0x404   :  { %v1332_v53 = vmul.f32 %v2351_v47, %v1326_v48  ;;  %v4371_v48 = vld [vmem:[#allocation22_spill] sm:$0xff]  ;;  %v4372_v47 = vmov 0.0  }
 0x406   :  { %2306 = vst [vmem:[%s4151_s6 + $0x18] sm:$0xff] %v1332_v53  ;;  %1471 = vmatmul.mubr.f32.vlgmr.msra.gmra.mxu0 %v1332_v53  ;;  %1542 = vmatmul.mubr.f32.vlgmr.msra.gmra.mxu1 %v1332_v53  ;;  %v4373_v53 = vld [vmem:[#allocation23_spill] sm:$0xff] }
 0x407   :  { %1644 = vmatpush1.msra.mxu0 %v3319_v54  ;;  %1715 = vmatpush1.msra.mxu1 %v3324_v52 }
 0x408   :  { %1645 = vmatprep.subr.mxu0 %v3331_v51  ;;  %1716 = vmatprep.subr.mxu1 %v3336_v57 }
 0x409   :  { %1646 = vmatpush1.msra.mxu0 %v3343_v38  ;;  %1717 = vmatpush1.msra.mxu1 %v3348_v4 }
 0x40a   :  { %1647 = vmatprep.subr.mxu0 %v3355_v56  ;;  %1718 = vmatprep.subr.mxu1 %v3360_v11 }
 0x40b   :  { %1648 = vmatpush1.msra.mxu0 %v3367_v62  ;;  %1719 = vmatpush1.msra.mxu1 %v3372_v5 }
 0x40c   :  { %1649 = vmatprep.subr.mxu0 %v3379_v6  ;;  %1720 = vmatprep.subr.mxu1 %v3384_v7 }
 0x40d   :  { %1650 = vmatpush1.msra.mxu0 %v3391_v8  ;;  %1721 = vmatpush1.msra.mxu1 %v3396_v9 }
 0x40e   :  { %1651 = vmatprep.subr.mxu0 %v3403_v10  ;;  %1722 = vmatprep.subr.mxu1 %v3408_v12 }
 0x40f   :  { %1652 = vmatpush1.msra.mxu0 %v3415_v13  ;;  %1723 = vmatpush1.msra.mxu1 %v3420_v14 }
 0x410   :  { %1653 = vmatprep.subr.mxu0 %v3427_v15  ;;  %1724 = vmatprep.subr.mxu1 %v3432_v16 }
 0x411   :  { %1654 = vmatpush1.msra.mxu0 %v3439_v17  ;;  %1725 = vmatpush1.msra.mxu1 %v3444_v18 }
 0x412   :  { %1655 = vmatprep.subr.mxu0 %v3451_v19  ;;  %1726 = vmatprep.subr.mxu1 %v3456_v21 }
 0x413   :  { %1656 = vmatpush1.msra.mxu0 %v3463_v22  ;;  %1727 = vmatpush1.msra.mxu1 %v3468_v23 }
 0x414   :  { %1657 = vmatprep.subr.mxu0 %v3475_v24  ;;  %1728 = vmatprep.subr.mxu1 %v3480_v25 }
 0x415   :  { %1658 = vmatpush1.msra.mxu0 %v3485_v26  ;;  %1729 = vmatpush1.msra.mxu1 %v3492_v28 }
 0x416   :  { %1659 = vmatprep.subr.mxu0 %v3497_v30  ;;  %1730 = vmatprep.subr.mxu1 %v3502_v31 }
 0x417   :  { %1660 = vmatpush1.msra.mxu0 %v3509_v32  ;;  %1731 = vmatpush1.msra.mxu1 %v3514_v33 }
 0x418   :  { %1661 = vmatprep.subr.mxu0 %v3519_v34  ;;  %1732 = vmatprep.subr.mxu1 %v3526_v35 }
 0x419   :  { %1662 = vmatpush1.msra.mxu0 %v3531_v36  ;;  %1733 = vmatpush1.msra.mxu1 %v3536_v37 }
 0x41a   :  { %1663 = vmatprep.subr.mxu0 %v3543_v39  ;;  %1734 = vmatprep.subr.mxu1 %v3548_v40 }
 0x41b   :  { %1664 = vmatpush1.msra.mxu0 %v3555_v41  ;;  %1735 = vmatpush1.msra.mxu1 %v3560_v42 }
 0x41c   :  { %1665 = vmatprep.subr.mxu0 %v3567_v43  ;;  %1736 = vmatprep.subr.mxu1 %v4354_v55 }
 0x41d   :  { %1666 = vmatpush1.msra.mxu0 %v4355_v63  ;;  %1737 = vmatpush1.msra.mxu1 %v4356_v60 }
 0x41e   :  { %1667 = vmatprep.subr.mxu0 %v4357_v1  ;;  %1738 = vmatprep.subr.mxu1 %v4358_v44 }
 0x41f   :  { %1668 = vmatpush1.msra.mxu0 %v4359_v59  ;;  %1739 = vmatpush1.msra.mxu1 %v4360_v3  ;;  %v4378_v59 = vld [vmem:[#allocation39_spill] sm:$0xff] }
 0x420   :  { %1669 = vmatprep.subr.mxu0 %v4361_v49  ;;  %1740 = vmatprep.subr.mxu1 %v4362_v50 }
 0x421   :  { %1670 = vmatpush1.msra.mxu0 %v4363_v2  ;;  %1741 = vmatpush1.msra.mxu1 %v4364_v27  ;;  %v4374_v27 = vld [vmem:[#allocation3_spill] sm:$0xff]  ;;  %v4376_v2 = vld [vmem:[#allocation36_spill] sm:$0xff] }
 0x422   :  { %1671 = vmatprep.subr.mxu0 %v4365_v58  ;;  %1742 = vmatprep.subr.mxu1 %v4366_v61  ;;  %v4375_v58 = vld [vmem:[#allocation4_spill] sm:$0xff] }
 0x423   :  { %1672 = vmatpush1.msra.mxu0 %v4367_v29  ;;  %1743 = vmatpush1.msra.mxu1 %v4368_v0 }
 0x424   :  { %1673 = vmatprep.subr.mxu0 %v4369_v46  ;;  %1744 = vmatprep.subr.mxu1 %v4370_v45  ;;  %v4377_v45 = vld [vmem:[#allocation38_spill] sm:$0xff] }
 0x425   :  { %1674 = vmatpush1.msra.mxu0 %v4371_v48  ;;  %1707 = vmatprep.mubr.f32.mxu0 %v4372_v47 }
 0x426   :  { %1745 = vmatpush1.msra.mxu1 %v4373_v53  ;;  %1778 = vmatprep.mubr.f32.mxu1 %v4372_v47  ;;  %v4379_v53 = vld [vmem:[#allocation37_spill] sm:$0xff] }
 0x427   :  { %1880 = vmatprep.subr.mxu0 %v4374_v27  ;;  %1951 = vmatprep.subr.mxu1 %v4375_v58 }
 0x4c6   :  { %v1472_v61 = vpop.f32.mrf.mxu0  ;;  %v1543_v29 = vpop.f32.mrf.mxu1 }
 0x4c7   :  { %v1548_v0 = vadd.f32 %v1472_v61, %v4376_v2  ;;  %v1550_v47 = vadd.f32 %v1543_v29, %v4379_v53  ;;  %v2116_v53 = vld [vmem:[%s4147_s3 + $0x1f8] sm:$0xff] }
 0x4c8   :  { %v1474_v50 = vpop.f32.mrf.mxu0  ;;  %v1545_v46 = vpop.f32.mrf.mxu1 }
 0x4c9   :  { %v1552_v49 = vmul.f32 0.5, %v1548_v0  ;;  %v1549_v3 = vadd.f32 %v1474_v50, %v4377_v45  ;;  %v1551_v44 = vadd.f32 %v1545_v46, %v4378_v59  ;;  %v1554_v27 = vmul.f32 0.5, %v1550_v47  ;;  %v2114_v47 = vld [vmem:[%s4147_s3 + $0x1e8] sm:$0xff] }
 0x4cb   :  { %2352 = vtanh.f32 %v1552_v49  ;;  %v1553_v48 = vmul.f32 0.5, %v1549_v3 }
 0x4cd   :  { %2354 = vtanh.f32 %v1553_v48 }
 0x4ce   :  { %2356 = vtanh.f32 %v1551_v44 }
 0x4cf   :  { %2358 = vtanh.f32 %v1554_v27  ;;  %v2113_v27 = vld [vmem:[%s4147_s3 + $0x1e0] sm:$0xff] }
 0x4d8   :  { %v2353_v1 = vpop.eup %2352 }
 0x4d9   :  { %v1558_v58 = vmul.f32 0.5, %v2353_v1 }
 0x4da   :  { %v2355_v60 = vpop.eup %2354 }
 0x4db   :  { %v1561_v63 = vadd.f32 0.5, %v1558_v58  ;;  %v1559_v2 = vmul.f32 0.5, %v2355_v60  ;;  %v2357_v61 = vpop.eup %2356  ;;  %v2115_v58 = vld [vmem:[%s4147_s3 + $0x1f0] sm:$0xff] }
 0x4dc   :  { %v2359_v59 = vpop.eup %2358 }
 0x4dd   :  { %v1562_v55 = vadd.f32 0.5, %v1559_v2  ;;  %v1566_v0 = vmul.f32 %v2357_v61, %v1561_v63  ;;  %v1560_v44 = vmul.f32 0.5, %v2359_v59  ;;  %v2110_v2 = vld [vmem:[%s4147_s3 + $0x1c8] sm:$0xff]  ;;  %v2112_v61 = vld [vmem:[%s4147_s3 + $0x1d8] sm:$0xff] }
 0x4de   :  { %v2108_v59 = vld [vmem:[%s4147_s3 + $0x1b8] sm:$0xff] }
 0x4df   :  { %v1565_v50 = vmul.f32 %v1562_v55, %v3772_v20  ;;  %v1563_v3 = vadd.f32 0.5, %v1560_v44  ;;  %v2105_v44 = vld [vmem:[%s4147_s3 + $0x1a0] sm:$0xff] }
 0x4e1   :  { %v3849_v49 = vadd.f32 %v1566_v0, %v1565_v50  ;;  %v2109_v0 = vld [vmem:[%s4147_s3 + $0x1c0] sm:$0xff]  ;;  %v2111_v50 = vld [vmem:[%s4147_s3 + $0x1d0] sm:$0xff] }
 0x4e3   :  { %2360 = vtanh.f32 %v3849_v49 }
 0x4f0   :  { %v2361_v29 = vpop.eup %2360 }
 0x4f1   :  { %v1569_v46 = vmul.f32 %v2361_v29, %v1563_v3  ;;  %v2107_v3 = vld [vmem:[%s4147_s3 + $0x1b0] sm:$0xff]  ;;  %v2102_v29 = vld [vmem:[%s4147_s3 + $0x188] sm:$0xff] }
 0x4f3   :  { %2307 = vst [vmem:[%s4151_s6 + $0x20] sm:$0xff] %v1569_v46  ;;  %1708 = vmatmul.mubr.f32.vlgmr.msra.gmra.mxu0 %v1569_v46  ;;  %1779 = vmatmul.mubr.f32.vlgmr.msra.gmra.mxu1 %v1569_v46  ;;  %v2104_v46 = vld [vmem:[%s4147_s3 + $0x198] sm:$0xff] }
 0x4f4   :  { %1881 = vmatpush1.msra.mxu0 %v3319_v54  ;;  %1952 = vmatpush1.msra.mxu1 %v3324_v52  ;;  %v4380_v54 = vld [vmem:[#allocation5_spill] sm:$0xff]  ;;  %v4381_v52 = vld [vmem:[#allocation6_spill] sm:$0xff] }
 0x4f5   :  { %1882 = vmatprep.subr.mxu0 %v3331_v51  ;;  %1953 = vmatprep.subr.mxu1 %v3336_v57  ;;  %v4382_v51 = vld [vmem:[#allocation7_spill] sm:$0xff]  ;;  %v4383_v57 = vld [vmem:[#allocation8_spill] sm:$0xff] }
 0x4f6   :  { %1883 = vmatpush1.msra.mxu0 %v3343_v38  ;;  %1954 = vmatpush1.msra.mxu1 %v3348_v4  ;;  %v4384_v38 = vld [vmem:[#allocation9_spill] sm:$0xff]  ;;  %v4385_v4 = vld [vmem:[#allocation10_spill] sm:$0xff] }
 0x4f7   :  { %1884 = vmatprep.subr.mxu0 %v3355_v56  ;;  %1955 = vmatprep.subr.mxu1 %v3360_v11  ;;  %v4386_v56 = vld [vmem:[#allocation11_spill] sm:$0xff]  ;;  %v4387_v11 = vld [vmem:[#allocation12_spill] sm:$0xff] }
 0x4f8   :  { %1885 = vmatpush1.msra.mxu0 %v3367_v62  ;;  %1956 = vmatpush1.msra.mxu1 %v3372_v5  ;;  %v4388_v62 = vld [vmem:[#allocation13_spill] sm:$0xff]  ;;  %v4389_v5 = vld [vmem:[#allocation14_spill] sm:$0xff] }
 0x4f9   :  { %1886 = vmatprep.subr.mxu0 %v3379_v6  ;;  %1957 = vmatprep.subr.mxu1 %v3384_v7  ;;  %v4390_v6 = vld [vmem:[#allocation15_spill] sm:$0xff]  ;;  %v4391_v7 = vld [vmem:[#allocation16_spill] sm:$0xff] }
 0x4fa   :  { %1887 = vmatpush1.msra.mxu0 %v3391_v8  ;;  %1958 = vmatpush1.msra.mxu1 %v3396_v9  ;;  %v4392_v8 = vld [vmem:[#allocation17_spill] sm:$0xff]  ;;  %v4393_v9 = vld [vmem:[#allocation18_spill] sm:$0xff] }
 0x4fb   :  { %1888 = vmatprep.subr.mxu0 %v3403_v10  ;;  %1959 = vmatprep.subr.mxu1 %v3408_v12  ;;  %v4394_v10 = vld [vmem:[#allocation19_spill] sm:$0xff]  ;;  %v4395_v12 = vld [vmem:[#allocation20_spill] sm:$0xff] }
 0x4fc   :  { %1889 = vmatpush1.msra.mxu0 %v3415_v13  ;;  %1960 = vmatpush1.msra.mxu1 %v3420_v14  ;;  %v4396_v13 = vld [vmem:[#allocation21_spill] sm:$0xff]  ;;  %v4397_v14 = vld [vmem:[#allocation22_spill] sm:$0xff] }
 0x4fd   :  { %1890 = vmatprep.subr.mxu0 %v3427_v15  ;;  %1961 = vmatprep.subr.mxu1 %v3432_v16  ;;  %v4398_v15 = vmov 0.0   ;;  %v4399_v16 = vld [vmem:[#allocation23_spill] sm:$0xff] }
 0x4fe   :  { %1891 = vmatpush1.msra.mxu0 %v3439_v17  ;;  %1962 = vmatpush1.msra.mxu1 %v3444_v18 }
 0x4ff   :  { %1892 = vmatprep.subr.mxu0 %v3451_v19  ;;  %1963 = vmatprep.subr.mxu1 %v3456_v21  ;;  %v4400_v19 = vld [vmem:[#allocation40_spill] sm:$0xff] }
 0x500   :  { %1893 = vmatpush1.msra.mxu0 %v3463_v22  ;;  %1964 = vmatpush1.msra.mxu1 %v3468_v23 }
 0x501   :  { %1894 = vmatprep.subr.mxu0 %v3475_v24  ;;  %1965 = vmatprep.subr.mxu1 %v3480_v25  ;;  %v4401_v25 = vld [vmem:[#allocation42_spill] sm:$0xff] }
 0x502   :  { %1895 = vmatpush1.msra.mxu0 %v3485_v26  ;;  %1966 = vmatpush1.msra.mxu1 %v3492_v28 }
 0x503   :  { %1896 = vmatprep.subr.mxu0 %v3497_v30  ;;  %1967 = vmatprep.subr.mxu1 %v3502_v31  ;;  %v4402_v30 = vld [vmem:[#allocation43_spill] sm:$0xff] }
 0x504   :  { %1897 = vmatpush1.msra.mxu0 %v3509_v32  ;;  %1968 = vmatpush1.msra.mxu1 %v3514_v33  ;;  %v4403_v32 = vld [vmem:[#allocation41_spill] sm:$0xff] }
 0x505   :  { %1898 = vmatprep.subr.mxu0 %v3519_v34  ;;  %1969 = vmatprep.subr.mxu1 %v3526_v35 }
 0x506   :  { %1899 = vmatpush1.msra.mxu0 %v3531_v36  ;;  %1970 = vmatpush1.msra.mxu1 %v3536_v37 }
 0x507   :  { %1900 = vmatprep.subr.mxu0 %v3543_v39  ;;  %1971 = vmatprep.subr.mxu1 %v3548_v40 }
 0x508   :  { %1901 = vmatpush1.msra.mxu0 %v3555_v41  ;;  %1972 = vmatpush1.msra.mxu1 %v3560_v42 }
 0x509   :  { %1902 = vmatprep.subr.mxu0 %v3567_v43  ;;  %1973 = vmatprep.subr.mxu1 %v4380_v54  ;;  %v2101_v54 = vld [vmem:[%s4147_s3 + $0x180] sm:$0xff] }
 0x50a   :  { %1903 = vmatpush1.msra.mxu0 %v4381_v52  ;;  %1974 = vmatpush1.msra.mxu1 %v4382_v51  ;;  %v2103_v52 = vld [vmem:[%s4147_s3 + $0x190] sm:$0xff]  ;;  %v2098_v51 = vld [vmem:[%s4147_s3 + $0x168] sm:$0xff] }
 0x50b   :  { %1904 = vmatprep.subr.mxu0 %v4383_v57  ;;  %1975 = vmatprep.subr.mxu1 %v4384_v38  ;;  %v2100_v57 = vld [vmem:[%s4147_s3 + $0x178] sm:$0xff]  ;;  %v2097_v38 = vld [vmem:[%s4147_s3 + $0x160] sm:$0xff] }
 0x50c   :  { %1905 = vmatpush1.msra.mxu0 %v4385_v4  ;;  %1976 = vmatpush1.msra.mxu1 %v4386_v56  ;;  %v2099_v4 = vld [vmem:[%s4147_s3 + $0x170] sm:$0xff]  ;;  %v2094_v56 = vld [vmem:[%s4147_s3 + $0x148] sm:$0xff] }
 0x50d   :  { %1906 = vmatprep.subr.mxu0 %v4387_v11  ;;  %1977 = vmatprep.subr.mxu1 %v4388_v62  ;;  %v2096_v11 = vld [vmem:[%s4147_s3 + $0x158] sm:$0xff]  ;;  %v2093_v62 = vld [vmem:[%s4147_s3 + $0x140] sm:$0xff] }
 0x50e   :  { %1907 = vmatpush1.msra.mxu0 %v4389_v5  ;;  %1978 = vmatpush1.msra.mxu1 %v4390_v6  ;;  %v2095_v5 = vld [vmem:[%s4147_s3 + $0x150] sm:$0xff]  ;;  %v2090_v6 = vld [vmem:[%s4147_s3 + $0x128] sm:$0xff] }
 0x50f   :  { %1908 = vmatprep.subr.mxu0 %v4391_v7  ;;  %1979 = vmatprep.subr.mxu1 %v4392_v8  ;;  %v2092_v7 = vld [vmem:[%s4147_s3 + $0x138] sm:$0xff]  ;;  %v2089_v8 = vld [vmem:[%s4147_s3 + $0x120] sm:$0xff] }
 0x510   :  { %1909 = vmatpush1.msra.mxu0 %v4393_v9  ;;  %1980 = vmatpush1.msra.mxu1 %v4394_v10  ;;  %v2091_v9 = vld [vmem:[%s4147_s3 + $0x130] sm:$0xff]  ;;  %v2086_v10 = vld [vmem:[%s4147_s3 + $0x108] sm:$0xff] }
 0x511   :  { %1910 = vmatprep.subr.mxu0 %v4395_v12  ;;  %1981 = vmatprep.subr.mxu1 %v4396_v13  ;;  %v2088_v12 = vld [vmem:[%s4147_s3 + $0x118] sm:$0xff]  ;;  %v2085_v13 = vld [vmem:[%s4147_s3 + $0x100] sm:$0xff] }
 0x512   :  { %1911 = vmatpush1.msra.mxu0 %v4397_v14  ;;  %1944 = vmatprep.mubr.f32.mxu0 %v4398_v15  ;;  %v2087_v14 = vld [vmem:[%s4147_s3 + $0x110] sm:$0xff] }
 0x513   :  { %1982 = vmatpush1.msra.mxu1 %v4399_v16  ;;  %2015 = vmatprep.mubr.f32.mxu1 %v4398_v15  ;;  %v2084_v16 = vld [vmem:[%s4147_s3 + $0xf8] sm:$0xff] }
 0x514   :  { %2117 = vmatprep.subr.mxu0 %v2114_v47  ;;  %2188 = vmatprep.subr.mxu1 %v2116_v53  ;;  %v2055_v47 = vld [vmem:[%s4147_s3 + $0x10] sm:$0xff] }
 0x5b3   :  { %v1709_v17 = vpop.f32.mrf.mxu0  ;;  %v1780_v18 = vpop.f32.mrf.mxu1 }
 0x5b4   :  { %v1785_v21 = vadd.f32 %v1709_v17, %v4400_v19  ;;  %v1787_v33 = vadd.f32 %v1780_v18, %v4403_v32  ;;  %v2081_v17 = vld [vmem:[%s4147_s3 + $0xe0] sm:$0xff]  ;;  %v2083_v18 = vld [vmem:[%s4147_s3 + $0xf0] sm:$0xff]  ;;  %v2078_v19 = vld [vmem:[%s4147_s3 + $0xc8] sm:$0xff] }
 0x5b5   :  { %v1711_v22 = vpop.f32.mrf.mxu0  ;;  %v1782_v23 = vpop.f32.mrf.mxu1  ;;  %v2069_v32 = vld [vmem:[%s4147_s3 + $0x80] sm:$0xff] }
 0x5b6   :  { %v1789_v24 = vmul.f32 0.5, %v1785_v21  ;;  %v1786_v26 = vadd.f32 %v1711_v22, %v4401_v25  ;;  %v1788_v31 = vadd.f32 %v1782_v23, %v4402_v30  ;;  %v1791_v34 = vmul.f32 0.5, %v1787_v33  ;;  %v2080_v21 = vld [vmem:[%s4147_s3 + $0xd8] sm:$0xff]  ;;  %v2077_v22 = vld [vmem:[%s4147_s3 + $0xc0] sm:$0xff]  ;;  %v2079_v23 = vld [vmem:[%s4147_s3 + $0xd0] sm:$0xff] }
 0x5b7   :  { %v2076_v25 = vld [vmem:[%s4147_s3 + $0xb8] sm:$0xff]  ;;  %v2070_v30 = vld [vmem:[%s4147_s3 + $0x88] sm:$0xff]  ;;  %v2071_v33 = vld [vmem:[%s4147_s3 + $0x90] sm:$0xff] }
 0x5b8   :  { %2362 = vtanh.f32 %v1789_v24  ;;  %v1790_v28 = vmul.f32 0.5, %v1786_v26  ;;  %v2074_v24 = vld [vmem:[%s4147_s3 + $0xa8] sm:$0xff]  ;;  %v2073_v26 = vld [vmem:[%s4147_s3 + $0xa0] sm:$0xff] }
 0x5ba   :  { %2364 = vtanh.f32 %v1790_v28  ;;  %v2075_v28 = vld [vmem:[%s4147_s3 + $0xb0] sm:$0xff] }
 0x5bb   :  { %2366 = vtanh.f32 %v1788_v31  ;;  %v2072_v31 = vld [vmem:[%s4147_s3 + $0x98] sm:$0xff] }
 0x5bc   :  { %2368 = vtanh.f32 %v1791_v34  ;;  %v2066_v34 = vld [vmem:[%s4147_s3 + $0x68] sm:$0xff] }
 0x5c5   :  { %v2363_v35 = vpop.eup %2362 }
 0x5c6   :  { %v1795_v36 = vmul.f32 0.5, %v2363_v35  ;;  %v2068_v35 = vld [vmem:[%s4147_s3 + $0x78] sm:$0xff] }
 0x5c7   :  { %v2365_v37 = vpop.eup %2364 }
 0x5c8   :  { %v1798_v39 = vadd.f32 0.5, %v1795_v36  ;;  %v1796_v40 = vmul.f32 0.5, %v2365_v37  ;;  %v2367_v41 = vpop.eup %2366  ;;  %v2065_v36 = vld [vmem:[%s4147_s3 + $0x60] sm:$0xff]  ;;  %v2067_v37 = vld [vmem:[%s4147_s3 + $0x70] sm:$0xff] }
 0x5c9   :  { %v2369_v63 = vpop.eup %2368 }
 0x5ca   :  { %v1799_v42 = vadd.f32 0.5, %v1796_v40  ;;  %v1803_v43 = vmul.f32 %v2367_v41, %v1798_v39  ;;  %v1797_v60 = vmul.f32 0.5, %v2369_v63  ;;  %v2062_v39 = vld [vmem:[%s4147_s3 + $0x48] sm:$0xff]  ;;  %v2064_v40 = vld [vmem:[%s4147_s3 + $0x58] sm:$0xff]  ;;  %v2061_v41 = vld [vmem:[%s4147_s3 + $0x40] sm:$0xff] }
 0x5cb   :  { %v2057_v63 = vld [vmem:[%s4147_s3 + $0x20] sm:$0xff] }
 0x5cc   :  { %v1802_v20 = vmul.f32 %v1799_v42, %v3849_v49  ;;  %v1800_v1 = vadd.f32 0.5, %v1797_v60  ;;  %v2106_v49 = vld [vmem:[%s4147_s3 + $0x1a8] sm:$0xff]  ;;  %v2063_v42 = vld [vmem:[%s4147_s3 + $0x50] sm:$0xff] }
 0x5cd   :  { %v2059_v60 = vld [vmem:[%s4147_s3 + $0x30] sm:$0xff] }
 0x5ce   :  { %v3924_v55 = vadd.f32 %v1803_v43, %v1802_v20  ;;  %v2058_v43 = vld [vmem:[%s4147_s3 + $0x28] sm:$0xff]  ;;  %v2060_v20 = vld [vmem:[%s4147_s3 + $0x38] sm:$0xff] }
 0x5d0   :  { %2370 = vtanh.f32 %v3924_v55 }
 0x5dd   :  { %v2371_v45 = vpop.eup %2370 }
 0x5de   :  { %v1806_v48 = vmul.f32 %v2371_v45, %v1800_v1  ;;  %v2054_v1 = vld [vmem:[%s4147_s3 + $0x8] sm:$0xff]  ;;  %v2056_v45 = vld [vmem:[%s4147_s3 + $0x18] sm:$0xff] }
 0x5e0   :  { %2308 = vst [vmem:[%s4151_s6 + $0x28] sm:$0xff] %v1806_v48  ;;  %1945 = vmatmul.mubr.f32.vlgmr.msra.gmra.mxu0 %v1806_v48  ;;  %2016 = vmatmul.mubr.f32.vlgmr.msra.gmra.mxu1 %v1806_v48  ;;  %v2053_v48 = vld [vmem:[%s4147_s3] sm:$0xff] }
 0x5e1   :  { %2181 = vmatprep.mubr.f32.mxu0 %v4398_v15  ;;  %2252 = vmatprep.mubr.f32.mxu1 %v4398_v15  ;;  %v2082_v15 = vld [vmem:[%s4147_s3 + $0xe8] sm:$0xff] }
 0x5e2   :  { %2118 = vmatpush1.msra.mxu0 %v2113_v27  ;;  %2189 = vmatpush1.msra.mxu1 %v2115_v58  ;;  %v4404_v58 = vld [vmem:[#allocation44_spill] sm:$0xff] }
 0x5e3   :  { %2119 = vmatprep.subr.mxu0 %v2110_v2  ;;  %2190 = vmatprep.subr.mxu1 %v2112_v61 }
 0x5e4   :  { %2120 = vmatpush1.msra.mxu0 %v2109_v0  ;;  %2191 = vmatpush1.msra.mxu1 %v2111_v50 }
 0x5e5   :  { %2121 = vmatprep.subr.mxu0 %v2106_v49  ;;  %2192 = vmatprep.subr.mxu1 %v2108_v59  ;;  %v4405_v49 = vld [vmem:[#allocation46_spill] sm:$0xff] }
 0x5e6   :  { %2122 = vmatpush1.msra.mxu0 %v2105_v44  ;;  %2193 = vmatpush1.msra.mxu1 %v2107_v3  ;;  %v4406_v3 = vld [vmem:[#allocation47_spill] sm:$0xff] }
 0x5e7   :  { %2123 = vmatprep.subr.mxu0 %v2102_v29  ;;  %2194 = vmatprep.subr.mxu1 %v2104_v46  ;;  %v4407_v46 = vld [vmem:[#allocation45_spill] sm:$0xff] }
 0x5e8   :  { %2124 = vmatpush1.msra.mxu0 %v2101_v54  ;;  %2195 = vmatpush1.msra.mxu1 %v2103_v52 }
 0x5e9   :  { %2125 = vmatprep.subr.mxu0 %v2098_v51  ;;  %2196 = vmatprep.subr.mxu1 %v2100_v57 }
 0x5ea   :  { %2126 = vmatpush1.msra.mxu0 %v2097_v38  ;;  %2197 = vmatpush1.msra.mxu1 %v2099_v4 }
 0x5eb   :  { %2127 = vmatprep.subr.mxu0 %v2094_v56  ;;  %2198 = vmatprep.subr.mxu1 %v2096_v11 }
 0x5ec   :  { %2128 = vmatpush1.msra.mxu0 %v2093_v62  ;;  %2199 = vmatpush1.msra.mxu1 %v2095_v5 }
 0x5ed   :  { %2129 = vmatprep.subr.mxu0 %v2090_v6  ;;  %2200 = vmatprep.subr.mxu1 %v2092_v7 }
 0x5ee   :  { %2130 = vmatpush1.msra.mxu0 %v2089_v8  ;;  %2201 = vmatpush1.msra.mxu1 %v2091_v9 }
 0x5ef   :  { %2131 = vmatprep.subr.mxu0 %v2086_v10  ;;  %2202 = vmatprep.subr.mxu1 %v2088_v12 }
 0x5f0   :  { %2132 = vmatpush1.msra.mxu0 %v2085_v13  ;;  %2203 = vmatpush1.msra.mxu1 %v2087_v14 }
 0x5f1   :  { %2133 = vmatprep.subr.mxu0 %v2082_v15  ;;  %2204 = vmatprep.subr.mxu1 %v2084_v16  ;;  %v4408_v16 = vld [vmem:[#allocation48_spill] sm:$0xff] }
 0x5f2   :  { %2134 = vmatpush1.msra.mxu0 %v2081_v17  ;;  %2205 = vmatpush1.msra.mxu1 %v2083_v18 }
 0x5f3   :  { %2135 = vmatprep.subr.mxu0 %v2078_v19  ;;  %2206 = vmatprep.subr.mxu1 %v2080_v21  ;;  %v4409_v21 = vld [vmem:[#allocation50_spill] sm:$0xff] }
 0x5f4   :  { %2136 = vmatpush1.msra.mxu0 %v2077_v22  ;;  %2207 = vmatpush1.msra.mxu1 %v2079_v23 }
 0x5f5   :  { %2137 = vmatprep.subr.mxu0 %v2074_v24  ;;  %2208 = vmatprep.subr.mxu1 %v2076_v25  ;;  %v4410_v24 = vld [vmem:[#allocation51_spill] sm:$0xff] }
 0x5f6   :  { %2138 = vmatpush1.msra.mxu0 %v2073_v26  ;;  %2209 = vmatpush1.msra.mxu1 %v2075_v28  ;;  %v4411_v26 = vld [vmem:[#allocation49_spill] sm:$0xff] }
 0x5f7   :  { %2139 = vmatprep.subr.mxu0 %v2070_v30  ;;  %2210 = vmatprep.subr.mxu1 %v2072_v31 }
 0x5f8   :  { %2140 = vmatpush1.msra.mxu0 %v2069_v32  ;;  %2211 = vmatpush1.msra.mxu1 %v2071_v33 }
 0x5f9   :  { %2141 = vmatprep.subr.mxu0 %v2066_v34  ;;  %2212 = vmatprep.subr.mxu1 %v2068_v35 }
 0x5fa   :  { %2142 = vmatpush1.msra.mxu0 %v2065_v36  ;;  %2213 = vmatpush1.msra.mxu1 %v2067_v37 }
 0x5fb   :  { %2143 = vmatprep.subr.mxu0 %v2062_v39  ;;  %2214 = vmatprep.subr.mxu1 %v2064_v40 }
 0x5fc   :  { %2144 = vmatpush1.msra.mxu0 %v2061_v41  ;;  %2215 = vmatpush1.msra.mxu1 %v2063_v42 }
 0x5fd   :  { %2145 = vmatprep.subr.mxu0 %v2058_v43  ;;  %2216 = vmatprep.subr.mxu1 %v2060_v20 }
 0x5fe   :  { %2146 = vmatpush1.msra.mxu0 %v2057_v63  ;;  %2217 = vmatpush1.msra.mxu1 %v2059_v60 }
 0x5ff   :  { %2147 = vmatprep.subr.mxu0 %v2054_v1  ;;  %2218 = vmatprep.subr.mxu1 %v2056_v45 }
 0x600   :  { %2148 = vmatpush1.msra.mxu0 %v2053_v48  ;;  %2219 = vmatpush1.msra.mxu1 %v2055_v47 }
 0x6a0   :  { %v1946_v53 = vpop.f32.mrf.mxu0  ;;  %v2017_v27 = vpop.f32.mrf.mxu1 }
 0x6a1   :  { %v2022_v2 = vadd.f32 %v1946_v53, %v4404_v58  ;;  %v2024_v54 = vadd.f32 %v2017_v27, %v4407_v46 }
 0x6a2   :  { %v1948_v61 = vpop.f32.mrf.mxu0  ;;  %v2019_v0 = vpop.f32.mrf.mxu1 }
 0x6a3   :  { %v2026_v50 = vmul.f32 0.5, %v2022_v2  ;;  %v2023_v59 = vadd.f32 %v1948_v61, %v4405_v49  ;;  %v2025_v29 = vadd.f32 %v2019_v0, %v4406_v3  ;;  %v2028_v52 = vmul.f32 0.5, %v2024_v54 }
 0x6a5   :  { %2372 = vtanh.f32 %v2026_v50  ;;  %v2027_v44 = vmul.f32 0.5, %v2023_v59 }
 0x6a7   :  { %2374 = vtanh.f32 %v2027_v44 }
 0x6a8   :  { %2376 = vtanh.f32 %v2025_v29 }
 0x6a9   :  { %2378 = vtanh.f32 %v2028_v52 }
 0x6b2   :  { %v2373_v51 = vpop.eup %2372 }
 0x6b3   :  { %v2032_v57 = vmul.f32 0.5, %v2373_v51 }
 0x6b4   :  { %v2375_v38 = vpop.eup %2374 }
 0x6b5   :  { %v2035_v4 = vadd.f32 0.5, %v2032_v57  ;;  %v2033_v56 = vmul.f32 0.5, %v2375_v38  ;;  %v2377_v11 = vpop.eup %2376 }
 0x6b6   :  { %v2379_v8 = vpop.eup %2378 }
 0x6b7   :  { %v2036_v62 = vadd.f32 0.5, %v2033_v56  ;;  %v2040_v5 = vmul.f32 %v2377_v11, %v2035_v4  ;;  %v2034_v9 = vmul.f32 0.5, %v2379_v8 }
 0x6b9   :  { %v2039_v6 = vmul.f32 %v2036_v62, %v3924_v55  ;;  %v2037_v10 = vadd.f32 0.5, %v2034_v9 }
 0x6bb   :  { %v2041_v7 = vadd.f32 %v2040_v5, %v2039_v6 }
 0x6bd   :  { %2380 = vtanh.f32 %v2041_v7 }
 0x6ca   :  { %v2381_v12 = vpop.eup %2380 }
 0x6cb   :  { %v2043_v13 = vmul.f32 %v2381_v12, %v2037_v10 }
 0x6cd   :  { %2309 = vst [vmem:[%s4151_s6 + $0x30] sm:$0xff] %v2043_v13  ;;  %2182 = vmatmul.mubr.f32.vlgmr.msra.gmra.mxu0 %v2043_v13  ;;  %2253 = vmatmul.mubr.f32.vlgmr.msra.gmra.mxu1 %v2043_v13 }
 0x78d   :  { %v2183_v14 = vpop.f32.mrf.mxu0  ;;  %v2254_v15 = vpop.f32.mrf.mxu1 }
 0x78e   :  { %v2259_v17 = vadd.f32 %v2183_v14, %v4408_v16  ;;  %v2261_v28 = vadd.f32 %v2254_v15, %v4411_v26 }
 0x78f   :  { %v2185_v18 = vpop.f32.mrf.mxu0  ;;  %v2256_v19 = vpop.f32.mrf.mxu1 }
 0x790   :  { %v2263_v55 = vmul.f32 0.5, %v2259_v17  ;;  %v2260_v22 = vadd.f32 %v2185_v18, %v4409_v21  ;;  %v2262_v25 = vadd.f32 %v2256_v19, %v4410_v24  ;;  %v2265_v30 = vmul.f32 0.5, %v2261_v28 }
 0x792   :  { %2382 = vtanh.f32 %v2263_v55  ;;  %v2264_v23 = vmul.f32 0.5, %v2260_v22 }
 0x794   :  { %2384 = vtanh.f32 %v2264_v23 }
 0x795   :  { %2386 = vtanh.f32 %v2262_v25 }
 0x796   :  { %2388 = vtanh.f32 %v2265_v30 }
 0x79f   :  { %v2383_v31 = vpop.eup %2382 }
 0x7a0   :  { %v2269_v32 = vmul.f32 0.5, %v2383_v31 }
 0x7a1   :  { %v2385_v33 = vpop.eup %2384 }
 0x7a2   :  { %v2272_v34 = vadd.f32 0.5, %v2269_v32  ;;  %v2270_v35 = vmul.f32 0.5, %v2385_v33  ;;  %v2387_v36 = vpop.eup %2386 }
 0x7a3   :  { %v2389_v42 = vpop.eup %2388 }
 0x7a4   :  { %v2273_v37 = vadd.f32 0.5, %v2270_v35  ;;  %v2277_v39 = vmul.f32 %v2387_v36, %v2272_v34  ;;  %v2271_v43 = vmul.f32 0.5, %v2389_v42 }
 0x7a6   :  { %v2276_v40 = vmul.f32 %v2273_v37, %v2041_v7  ;;  %v2274_v20 = vadd.f32 0.5, %v2271_v43 }
 0x7a8   :  { %v2278_v41 = vadd.f32 %v2277_v39, %v2276_v40 }
 0x7aa   :  { %2390 = vtanh.f32 %v2278_v41  ;;  %2284 = vst [vmem:[%s4152_s8] sm:$0xff] %v2278_v41 }
 0x7b7   :  { %v2391_v63 = vpop.eup %2390 }
 0x7b8   :  { %v2280_v60 = vmul.f32 %v2391_v63, %v2274_v20 }
 0x7ba   :  { %2310 = vst [vmem:[%s4151_s6 + $0x38] sm:$0xff] %v2280_v60  ;;  %2283 = vst [vmem:[%s4153_s7] sm:$0xff] %v2280_v60 }

</bundles_post_ra>
